<compile_context>
chip_gen: v5e
topology: v5e:2x2
jax: 0.10.0
libtpu: 0.0.40
codegen_flags: <defaults>
</compile_context>

<pallas_src>
import functools

import jax
import jax.numpy as jnp
from jax.experimental import pallas as pl
from jax.experimental.pallas import tpu as pltpu


# Merged gate-slab order: i, f, o, g   (natural PyTorch LSTM gate order is i, f, g, o).
# Putting the three sigmoid gates first lets the kernel do one sigmoid over 12H lanes
# and one tanh over 4H lanes per step.
_GATE_ORDER = (0, 1, 3, 2)


# --------------------------------------------------------------------------
# In-kernel helpers
# --------------------------------------------------------------------------
def _self_attn_sum(x, w_in_ref, b_in_ref, w_out_ref, b_out_ref):
    """Single-head self-attention, summed over the sequence axis -> (B, D).

    The D**-0.5 query scale is pre-folded into w_in / b_in.  The sequence sum is
    pushed through the value contraction:  sum_q softmax(qk) @ v
    == (sum_q softmax(qk)) . v, so no (B, L, L) x (B, L, D) batched matmul.
    """
    B, L, D = x.shape
    x2 = x.reshape(B * L, D).astype(jnp.bfloat16)
    qkv = (jnp.dot(x2, w_in_ref[...], preferred_element_type=jnp.float32)
           + b_in_ref[...]).reshape(B, L, 3 * D)
    q = qkv[:, :, 0:D].astype(jnp.bfloat16)          # scale already folded in
    k = qkv[:, :, D:2 * D].astype(jnp.bfloat16)
    v = qkv[:, :, 2 * D:3 * D]                       # f32

    s = jnp.einsum('bqd,bkd->bqk', q, k, preferred_element_type=jnp.float32)
    s = s - s.max(axis=-1, keepdims=True)
    p = jnp.exp(s)
    attn = p * pl.reciprocal(p.sum(axis=-1, keepdims=True), approx=True)

    colsum = attn.sum(axis=1)                         # (B, L) weight per key position
    ctx_sum = jnp.sum(colsum[:, :, None] * v, axis=1)  # (B, D) f32

    # sum_q (ctx_q @ W_out + b_out) == (sum_q ctx_q) @ W_out + L * b_out
    return (jnp.dot(ctx_sum.astype(jnp.bfloat16), w_out_ref[...],
                    preferred_element_type=jnp.float32) + float(L) * b_out_ref[...])


# --------------------------------------------------------------------------
# Fused forward kernel
# --------------------------------------------------------------------------
def _opinion_mining3_kernel(
        xm_ref, wi_ref, wh_ref, b_ref,
        wt_in_ref, bt_in_ref, wt_out_ref, bt_out_ref,
        ww_in_ref, bw_in_ref, ww_out_ref, bw_out_ref,
        wfa_ref, wfb_ref, bfc_ref,
        o_ref, ys_ref, *, S, T, H):
    L, B, E4 = xm_ref.shape
    H4 = 4 * H
    H12 = 12 * H

    # ---- Stage 1: merged bidirectional LSTMs (lstm1 on words, lstm2 on target) ----
    # Hoisted input projection: ONE (L*B, 4E) x (4E, 16H) matmul covers every timestep of
    # all four (lstm, direction) channels; bias folded in.  Time-major, so the per-step
    # read below is a cheap leading-axis index.
    xg = (jnp.dot(xm_ref[...].reshape(L * B, E4), wi_ref[...],
                  preferred_element_type=jnp.float32)
          + b_ref[...]).reshape(L, B, 16 * H)
    wh = wh_ref[...]                                   # (4H, 16H) bf16, block-diagonal

    h = jnp.zeros((B, H4), jnp.float32)                # channels: [l1_fwd|l1_bwd|l2_fwd|l2_bwd]
    c = jnp.zeros((B, H4), jnp.float32)

    # Fully unrolled merged recurrence: per step, ONE K=4H MXU matmul + one sigmoid slab
    # + one tanh slab.  Element-wise math stays f32 (no bf16 VPU/EUP on v5e).
    # TODO(synk): for S/T beyond ~32 switch to lax.fori_loop(..., unroll=2..4).
    for step in range(L):
        gates = xg[step] + jnp.dot(h.astype(jnp.bfloat16), wh,
                                   preferred_element_type=jnp.float32)   # (B, 16H)
        ifo = jax.nn.sigmoid(gates[:, 0:H12])
        i_g = ifo[:, 0:H4]
        f_g = ifo[:, H4:2 * H4]
        o_g = ifo[:, 2 * H4:H12]
        g_g = jnp.tanh(gates[:, H12:])
        c_new = f_g * c + i_g * g_g
        h_new = o_g * jnp.tanh(c_new)

        # output tanh (== self.tanh(output) in the module); one lane-dense (128-lane) store.
        ys_ref[:, step:step + 1, :] = jnp.tanh(h_new)[:, None, :]

        if step < S and step < T:
            h, c = h_new, c_new
        else:
            # Freeze the finished LSTM's (h, c); the other keeps running.  (The recurrent
            # weight is block-diagonal so the frozen half never leaks into the live one.)
            lane = jax.lax.broadcasted_iota(jnp.int32, (1, H4), 1)
            keep = (lane < 2 * H) if step < S else (lane >= 2 * H)
            h = jnp.where(keep, h_new, h)
            c = jnp.where(keep, c_new, c)

    # Re-assemble batch-major sequences.  The backward-direction halves were produced in
    # reversed time order; re-align them with one tiny permutation matmul each (keeps the
    # per-step stores unmasked instead of scattering reversed 32-lane slices).
    ys = ys_ref[...]                                   # (B, L, 4H) f32

    def reverse_time(z):                               # (B, n, F) -> time-reversed copy
        n = z.shape[1]
        r = jax.lax.broadcasted_iota(jnp.int32, (B, n, n), 1)
        cc = jax.lax.broadcasted_iota(jnp.int32, (B, n, n), 2)
        perm = (r + cc == n - 1).astype(jnp.float32)
        return jnp.einsum('bts,bsf->btf', perm, z, preferred_element_type=jnp.float32)

    out_w = jnp.concatenate(
        [ys[:, :S, 0:H], reverse_time(ys[:, :S, H:2 * H])], axis=-1)            # (B, S, 2H)
    out_t = jnp.concatenate(
        [ys[:, :T, 2 * H:3 * H], reverse_time(ys[:, :T, 3 * H:4 * H])], axis=-1)  # (B, T, 2H)

    # ---- Stage 2: single-head self-attentions, summed over their sequences ----
    tvec = _self_attn_sum(out_t, wt_in_ref, bt_in_ref, wt_out_ref, bt_out_ref)  # (B, 2H)
    svec = _self_attn_sum(out_w, ww_in_ref, bw_in_ref, ww_out_ref, bw_out_ref)  # (B, 2H)

    # ---- Stage 3: target-conditioned softmax pooling over the word sequence ----
    scores = jnp.sum(out_w * tvec[:, None, :], axis=-1)          # (B, S)
    scores = scores - scores.max(axis=1, keepdims=True)
    p = jnp.exp(scores)
    alpha = p * pl.reciprocal(p.sum(axis=1, keepdims=True), approx=True)
    pooled = jnp.sum(out_w * alpha[:, :, None], axis=1)          # (B, 2H)

    # ---- Stage 4: final linear on [out_self | pooled] without a lane concat ----
    o_ref[...] = (jnp.dot(svec.astype(jnp.bfloat16), wfa_ref[...],
                          preferred_element_type=jnp.float32)
                  + jnp.dot(pooled.astype(jnp.bfloat16), wfb_ref[...],
                            preferred_element_type=jnp.float32)
                  + bfc_ref[...])
    # TODO(synk): nn.Dropout(p=0.5) after fc treated as inference-mode identity.


# --------------------------------------------------------------------------
# pallas_call wrapper
# --------------------------------------------------------------------------
def _flop_estimate(B, S, T, E, H, C):
    L = max(S, T)
    D = 2 * H
    flops = 2 * (L * B) * (4 * E) * (16 * H)        # hoisted merged input projection
    flops += 2 * L * B * (4 * H) * (16 * H)         # merged recurrent matmuls
    flops += 2 * B * (S * S + T * T) * H            # time-reversal permutation matmuls
    trans = L * B * 24 * H                          # gate sigmoid/tanh + cell/output tanh
    for La in (S, T):
        flops += 2 * (B * La) * D * (3 * D)         # attention qkv projection
        flops += 2 * B * La * La * D                # attention scores
        flops += 2 * B * La * D                     # colsum-weighted value sum
        flops += 2 * B * D * D                      # attention out projection
        trans += B * La * La
    flops += 4 * B * S * D                          # pooling scores + weighted sum
    flops += 2 * B * (2 * D) * C                    # final fc
    trans += B * S
    return int(flops), int(trans)


def opinion_mining3_pallas(xm, ops, *, S, T, H, num_classes):
    """xm: (L, B, 4E) bf16 time-major merged input -> (B, num_classes) f32 logits."""
    L, B, E4 = xm.shape
    C = num_classes

    args = (xm, ops["wi"], ops["wh"], ops["b"],
            ops["t_in"], ops["t_bin"], ops["t_out"], ops["t_bout"],
            ops["w_in"], ops["w_bin"], ops["w_out"], ops["w_bout"],
            ops["fc_a"], ops["fc_b"], ops["fc_bias"])

    # Single "parallel" grid axis over the batch.  The demo batch fits one tile; at
    # production batch sizes split here (batch tile < B) to use both v7x TensorCores and
    # to cap per-step VMEM (inputs + f32 gate pre-activations scale with the batch tile).
    in_specs = [pl.BlockSpec((L, B, E4), lambda i: (0, i, 0))]
    for a in args[1:]:
        in_specs.append(pl.BlockSpec(a.shape, lambda i, _n=a.ndim: (0,) * _n))

    flops, trans = _flop_estimate(B, S, T, E4 // 4, H, C)
    n_bytes = sum(a.size * a.dtype.itemsize for a in args) + B * C * 4

    return pl.pallas_call(
        functools.partial(_opinion_mining3_kernel, S=S, T=T, H=H),
        out_shape=jax.ShapeDtypeStruct((B, C), jnp.float32),
        grid=(1,),
        in_specs=in_specs,
        out_specs=pl.BlockSpec((B, C), lambda i: (i, 0)),
        scratch_shapes=[pltpu.VMEM((B, L, 4 * H), jnp.float32)],   # per-step tanh(h) slabs
        compiler_params=pltpu.CompilerParams(
            dimension_semantics=("parallel",),
            vmem_limit_bytes=32 * 1024 * 1024),
        cost_estimate=pl.CostEstimate(flops=flops, transcendentals=trans,
                                      bytes_accessed=int(n_bytes)),
    )(*args)


# --------------------------------------------------------------------------
# Parameter fusion (natural PyTorch-style layout -> merged kernel operands)
# --------------------------------------------------------------------------
def _merge_lstm_params(l1, l2):
    """Build block-structured merged LSTM weights for the fused 4-channel recurrence.

    Channels (each H wide in h/c): 0: lstm1-fwd, 1: lstm1-bwd, 2: lstm2-fwd, 3: lstm2-bwd.
    Merged gate columns (16H): [ i(4H) | f(4H) | o(4H) | g(4H) ], each slab spanning the
    4 channels.  Row blocks of wi match the merged input [x_in|rev(x_in)|x_tg|rev(x_tg)].
    """
    E = l1["wi_f"].shape[0]
    H = l1["wh_f"].shape[0]
    chans = [(l1["wi_f"], l1["wh_f"], l1["b_f"]),
             (l1["wi_b"], l1["wh_b"], l1["b_b"]),
             (l2["wi_f"], l2["wh_f"], l2["b_f"]),
             (l2["wi_b"], l2["wh_b"], l2["b_b"])]
    wi_all = jnp.zeros((4 * E, 16 * H), jnp.float32)
    wh_all = jnp.zeros((4 * H, 16 * H), jnp.float32)
    b_all = jnp.zeros((1, 16 * H), jnp.float32)
    for ch, (wi, wh, b) in enumerate(chans):
        for slot, g in enumerate(_GATE_ORDER):
            col = slot * 4 * H + ch * H
            wi_all = wi_all.at[ch * E:(ch + 1) * E, col:col + H].set(wi[:, g * H:(g + 1) * H])
            wh_all = wh_all.at[ch * H:(ch + 1) * H, col:col + H].set(wh[:, g * H:(g + 1) * H])
            b_all = b_all.at[:, col:col + H].set(b[:, g * H:(g + 1) * H])
    return wi_all, wh_all, b_all


def _prepare_kernel_operands(params):
    l1, l2 = params["lstm1"], params["lstm2"]
    H = l1["wh_f"].shape[0]
    D = 2 * H
    bf16 = jnp.bfloat16

    wi, wh, b = _merge_lstm_params(l1, l2)

    def prep_attn(p):
        # Fold the D**-0.5 query scale into the Q columns of the in-projection.
        scale = jnp.concatenate([jnp.full((D,), D ** -0.5, jnp.float32),
                                 jnp.ones((2 * D,), jnp.float32)])
        return ((p["w_in"] * scale[None, :]).astype(bf16),
                p["b_in"] * scale[None, :],
                p["w_out"].astype(bf16),
                p["b_out"])

    t_in, t_bin, t_out, t_bout = prep_attn(params["attn_t"])
    w_in, w_bin, w_out, w_bout = prep_attn(params["attn_w"])
    fc_w, fc_b = params["fc"]["w"], params["fc"]["b"]
    return {
        "wi": wi.astype(bf16), "wh": wh.astype(bf16), "b": b,
        "t_in": t_in, "t_bin": t_bin, "t_out": t_out, "t_bout": t_bout,
        "w_in": w_in, "w_bin": w_bin, "w_out": w_out, "w_bout": w_bout,
        "fc_a": fc_w[:D].astype(bf16),   # rows acting on out_self
        "fc_b": fc_w[D:].astype(bf16),   # rows acting on pooled
        "fc_bias": fc_b,
    }


@jax.jit
def opinion_mining3_forward(params, input_ids, target_ids):
    """input_ids: (B, S) int32, target_ids: (B, T) int32 -> (B, num_classes) logits."""
    emb = params["embedding"]
    # Embedding gathers stay in XLA; ship bf16 activations to the kernel (halves the DMA).
    x_in = emb[input_ids].astype(jnp.bfloat16)     # (B, S, E)
    x_tg = emb[target_ids].astype(jnp.bfloat16)    # (B, T, E)
    B, S, _E = x_in.shape
    T = x_tg.shape[1]
    L = max(S, T)

    def pad_to(x):
        n = L - x.shape[1]
        return x if n == 0 else jnp.pad(x, ((0, 0), (0, n), (0, 0)))

    # Merged, time-aligned input for the 4 (lstm, direction) channels, time-major layout.
    xm = jnp.concatenate(
        [pad_to(x_in), pad_to(jnp.flip(x_in, axis=1)),
         pad_to(x_tg), pad_to(jnp.flip(x_tg, axis=1))], axis=-1)     # (B, L, 4E)
    xm = jnp.transpose(xm, (1, 0, 2))                                # (L, B, 4E)

    ops = _prepare_kernel_operands(params)
    H = params["lstm1"]["wh_f"].shape[0]
    C = params["fc"]["b"].shape[-1]
    return opinion_mining3_pallas(xm, ops, S=S, T=T, H=H, num_classes=C)


# --------------------------------------------------------------------------
# Deterministic parameter construction (natural per-direction PyTorch layout)
# --------------------------------------------------------------------------
def make_params(key, vocab_size, E, H, num_classes):
    D = 2 * H
    keys = iter(jax.random.split(key, 32))

    def init(shape, scale=0.1):
        return (scale * jax.random.normal(next(keys), shape)).astype(jnp.float32)

    def lstm_params():
        # Transposed PyTorch layout, gate column order i, f, g, o.  b_* = b_ih + b_hh.
        return {"wi_f": init((E, 4 * H)), "wh_f": init((H, 4 * H)), "b_f": init((1, 4 * H)),
                "wi_b": init((E, 4 * H)), "wh_b": init((H, 4 * H)), "b_b": init((1, 4 * H))}

    def attn_params():
        return {"w_in": init((D, 3 * D)),   # = in_proj_weight.T
                "b_in": init((1, 3 * D)),
                "w_out": init((D, D)),      # = out_proj.weight.T
                "b_out": init((1, D))}

    return {
        "embedding": init((vocab_size, E), scale=1.0),
        "lstm1": lstm_params(),
        "lstm2": lstm_params(),
        "attn_t": attn_params(),
        "attn_w": attn_params(),
        "fc": {"w": init((2 * D, num_classes)),   # = fc.weight.T, rows [out_self | pooled]
               "b": init((1, num_classes))},
    }


# --------------------------------------------------------------------------
# Pure-JAX (f32) reference for a correctness sanity check
# --------------------------------------------------------------------------
def _reference_forward(params, input_ids, target_ids):
    emb = params["embedding"]

    def lstm_dir(x, wi, wh, b, reverse):
        B, L, _ = x.shape
        H = wh.shape[0]
        h = jnp.zeros((B, H)); c = jnp.zeros((B, H))
        outs = [None] * L
        order = range(L - 1, -1, -1) if reverse else range(L)
        for t in order:
            g = x[:, t, :] @ wi + h @ wh + b
            i = jax.nn.sigmoid(g[:, :H]); f = jax.nn.sigmoid(g[:, H:2 * H])
            gg = jnp.tanh(g[:, 2 * H:3 * H]); o = jax.nn.sigmoid(g[:, 3 * H:])
            c = f * c + i * gg
            h = o * jnp.tanh(c)
            outs[t] = h
        return jnp.stack(outs, axis=1)

    def bilstm(x, p):
        out = jnp.concatenate(
            [lstm_dir(x, p["wi_f"], p["wh_f"], p["b_f"], False),
             lstm_dir(x, p["wi_b"], p["wh_b"], p["b_b"], True)], axis=-1)
        return jnp.tanh(out)

    def attn_sum(x, p):
        D = x.shape[-1]
        qkv = x @ p["w_in"] + p["b_in"]
        q, k, v = qkv[..., :D] * (D ** -0.5), qkv[..., D:2 * D], qkv[..., 2 * D:]
        a = jax.nn.softmax(jnp.einsum('bqd,bkd->bqk', q, k), axis=-1)
        ctx = jnp.einsum('bqk,bkd->bqd', a, v)
        return (ctx @ p["w_out"] + p["b_out"]).sum(axis=1)

    output = bilstm(emb[input_ids], params["lstm1"])
    out_target = bilstm(emb[target_ids], params["lstm2"])
    tvec = attn_sum(out_target, params["attn_t"])
    svec = attn_sum(output, params["attn_w"])
    alpha = jax.nn.softmax(jnp.einsum('bsd,bd->bs', output, tvec), axis=1)
    pooled = (output * alpha[:, :, None]).sum(axis=1)
    feat = jnp.concatenate([svec, pooled], axis=-1)
    return feat @ params["fc"]["w"] + params["fc"]["b"]


if __name__ == "__main__":
    vocab_size, E, H, num_classes = 50, 32, 32, 3
    B, S, T = 2, 8, 4

    key = jax.random.PRNGKey(0)
    k_params, k_in, k_tg = jax.random.split(key, 3)
    params = make_params(k_params, vocab_size, E, H, num_classes)
    input_ids = jax.random.randint(k_in, (B, S), 0, vocab_size)
    target_ids = jax.random.randint(k_tg, (B, T), 0, vocab_size)

    logits = opinion_mining3_forward(params, input_ids, target_ids)
    jax.block_until_ready(logits)

    assert logits.shape == (B, num_classes)
    assert bool(jnp.all(jnp.isfinite(logits)))

    ref = _reference_forward(params, input_ids, target_ids)
    max_err = float(jnp.max(jnp.abs(logits - ref)))
    assert max_err < 1e-1, f"mismatch vs f32 reference: {max_err}"

    print("KERNEL_OK")
</pallas_src>

<mosaic_0001>
module attributes {stable_mosaic.version = 11 : i64} {
  func.func @_opinion_mining3_kernel(%arg0: i32, %arg1: memref<8x2x128xbf16, #tpu.memory_space<vmem>>, %arg2: memref<128x512xbf16, #tpu.memory_space<vmem>>, %arg3: memref<128x512xbf16, #tpu.memory_space<vmem>>, %arg4: memref<1x512xf32, #tpu.memory_space<vmem>>, %arg5: memref<64x192xbf16, #tpu.memory_space<vmem>>, %arg6: memref<1x192xf32, #tpu.memory_space<vmem>>, %arg7: memref<64x64xbf16, #tpu.memory_space<vmem>>, %arg8: memref<1x64xf32, #tpu.memory_space<vmem>>, %arg9: memref<64x192xbf16, #tpu.memory_space<vmem>>, %arg10: memref<1x192xf32, #tpu.memory_space<vmem>>, %arg11: memref<64x64xbf16, #tpu.memory_space<vmem>>, %arg12: memref<1x64xf32, #tpu.memory_space<vmem>>, %arg13: memref<64x3xbf16, #tpu.memory_space<vmem>>, %arg14: memref<64x3xbf16, #tpu.memory_space<vmem>>, %arg15: memref<1x3xf32, #tpu.memory_space<vmem>>, %arg16: memref<2x3xf32, #tpu.memory_space<vmem>>, %arg17: memref<2x8x128xf32, #tpu.memory_space<vmem>>) attributes {dimension_semantics = [#tpu.dimension_semantics<parallel>], iteration_bounds = array<i64: 1>, scalar_prefetch = 0 : i64, scratch_operands = 1 : i64, tpu.core_type = #tpu.core_type<tc>, window_params = [{transform_indices = @transform_0, window_bounds = array<i64: 8, 2, 128>}, {pipeline_mode = #tpu.pipeline_mode<synchronous>, transform_indices = @transform_1, window_bounds = array<i64: 128, 512>}, {pipeline_mode = #tpu.pipeline_mode<synchronous>, transform_indices = @transform_2, window_bounds = array<i64: 128, 512>}, {pipeline_mode = #tpu.pipeline_mode<synchronous>, transform_indices = @transform_3, window_bounds = array<i64: 1, 512>}, {pipeline_mode = #tpu.pipeline_mode<synchronous>, transform_indices = @transform_4, window_bounds = array<i64: 64, 192>}, {pipeline_mode = #tpu.pipeline_mode<synchronous>, transform_indices = @transform_5, window_bounds = array<i64: 1, 192>}, {pipeline_mode = #tpu.pipeline_mode<synchronous>, transform_indices = @transform_6, window_bounds = array<i64: 64, 64>}, {pipeline_mode = #tpu.pipeline_mode<synchronous>, transform_indices = @transform_7, window_bounds = array<i64: 1, 64>}, {pipeline_mode = #tpu.pipeline_mode<synchronous>, transform_indices = @transform_8, window_bounds = array<i64: 64, 192>}, {pipeline_mode = #tpu.pipeline_mode<synchronous>, transform_indices = @transform_9, window_bounds = array<i64: 1, 192>}, {pipeline_mode = #tpu.pipeline_mode<synchronous>, transform_indices = @transform_10, window_bounds = array<i64: 64, 64>}, {pipeline_mode = #tpu.pipeline_mode<synchronous>, transform_indices = @transform_11, window_bounds = array<i64: 1, 64>}, {pipeline_mode = #tpu.pipeline_mode<synchronous>, transform_indices = @transform_12, window_bounds = array<i64: 64, 3>}, {pipeline_mode = #tpu.pipeline_mode<synchronous>, transform_indices = @transform_13, window_bounds = array<i64: 64, 3>}, {pipeline_mode = #tpu.pipeline_mode<synchronous>, transform_indices = @transform_14, window_bounds = array<i64: 1, 3>}, {transform_indices = @transform_15, window_bounds = array<i64: 2, 3>}]} {
    %c0 = arith.constant 0 : index
    %c0_0 = arith.constant 0 : index
    %c0_1 = arith.constant 0 : index
    %0 = vector.load %arg1[%c0, %c0_0, %c0_1] : memref<8x2x128xbf16, #tpu.memory_space<vmem>>, vector<8x2x128xbf16>
    %1 = vector.shape_cast %0 : vector<8x2x128xbf16> to vector<16x128xbf16>
    %c0_2 = arith.constant 0 : index
    %c0_3 = arith.constant 0 : index
    %2 = vector.load %arg2[%c0_2, %c0_3] : memref<128x512xbf16, #tpu.memory_space<vmem>>, vector<128x512xbf16>
    %cst = arith.constant dense<0.000000e+00> : vector<16x512xf32>
    %3 = tpu.matmul %1, %2, %cst {dimension_numbers = #tpu.dot_dimension_numbers<[1], [0], [0], [1], [0, 0, 1, 1], [], []>} : vector<16x128xbf16>, vector<128x512xbf16>, vector<16x512xf32> -> vector<16x512xf32>
    %c0_4 = arith.constant 0 : index
    %c0_5 = arith.constant 0 : index
    %4 = vector.load %arg4[%c0_4, %c0_5] : memref<1x512xf32, #tpu.memory_space<vmem>>, vector<1x512xf32>
    %5 = vector.broadcast %4 : vector<1x512xf32> to vector<16x512xf32>
    %6 = arith.addf %3, %5 : vector<16x512xf32>
    %7 = vector.shape_cast %6 : vector<16x512xf32> to vector<8x2x512xf32>
    %c0_6 = arith.constant 0 : index
    %c0_7 = arith.constant 0 : index
    %8 = vector.load %arg3[%c0_6, %c0_7] : memref<128x512xbf16, #tpu.memory_space<vmem>>, vector<128x512xbf16>
    %cst_8 = arith.constant 0.000000e+00 : f32
    %9 = vector.broadcast %cst_8 : f32 to vector<2x128xf32>
    %cst_9 = arith.constant 0.000000e+00 : f32
    %10 = vector.broadcast %cst_9 : f32 to vector<2x128xf32>
    %11 = vector.extract_strided_slice %7 {offsets = [0, 0, 0], sizes = [1, 2, 512], strides = [1, 1, 1]} : vector<8x2x512xf32> to vector<1x2x512xf32>
    %12 = vector.shape_cast %11 : vector<1x2x512xf32> to vector<2x512xf32>
    %13 = arith.truncf %9 : vector<2x128xf32> to vector<2x128xbf16>
    %cst_10 = arith.constant dense<0.000000e+00> : vector<2x512xf32>
    %14 = tpu.matmul %13, %8, %cst_10 {dimension_numbers = #tpu.dot_dimension_numbers<[1], [0], [0], [1], [0, 0, 1, 1], [], []>} : vector<2x128xbf16>, vector<128x512xbf16>, vector<2x512xf32> -> vector<2x512xf32>
    %15 = arith.addf %12, %14 : vector<2x512xf32>
    %16 = vector.extract_strided_slice %15 {offsets = [0, 0], sizes = [2, 384], strides = [1, 1]} : vector<2x512xf32> to vector<2x384xf32>
    %17 = arith.negf %16 : vector<2x384xf32>
    %18 = math.exp %17 : vector<2x384xf32>
    %cst_11 = arith.constant 1.000000e+00 : f32
    %19 = vector.broadcast %cst_11 : f32 to vector<2x384xf32>
    %20 = arith.addf %19, %18 : vector<2x384xf32>
    %21 = arith.divf %19, %20 : vector<2x384xf32>
    %22 = vector.extract_strided_slice %21 {offsets = [0, 0], sizes = [2, 128], strides = [1, 1]} : vector<2x384xf32> to vector<2x128xf32>
    %23 = vector.extract_strided_slice %21 {offsets = [0, 128], sizes = [2, 128], strides = [1, 1]} : vector<2x384xf32> to vector<2x128xf32>
    %24 = vector.extract_strided_slice %21 {offsets = [0, 256], sizes = [2, 128], strides = [1, 1]} : vector<2x384xf32> to vector<2x128xf32>
    %25 = vector.extract_strided_slice %15 {offsets = [0, 384], sizes = [2, 128], strides = [1, 1]} : vector<2x512xf32> to vector<2x128xf32>
    %26 = math.tanh %25 : vector<2x128xf32>
    %27 = arith.mulf %23, %10 : vector<2x128xf32>
    %28 = arith.mulf %22, %26 : vector<2x128xf32>
    %29 = arith.addf %27, %28 : vector<2x128xf32>
    %30 = math.tanh %29 : vector<2x128xf32>
    %31 = arith.mulf %24, %30 : vector<2x128xf32>
    %32 = math.tanh %31 : vector<2x128xf32>
    %33 = vector.shape_cast %32 : vector<2x128xf32> to vector<2x1x128xf32>
    %c0_12 = arith.constant 0 : index
    %c0_13 = arith.constant 0 : index
    %c0_14 = arith.constant 0 : index
    %34 = vector.load %arg17[%c0_12, %c0_13, %c0_14] : memref<2x8x128xf32, #tpu.memory_space<vmem>>, vector<2x1x128xf32>
    tpu.vector_store %arg17[%c0_12, %c0_13, %c0_14], %33 {strides = array<i32>} : memref<2x8x128xf32, #tpu.memory_space<vmem>>, vector<2x1x128xf32>,
    %35 = vector.extract_strided_slice %7 {offsets = [1, 0, 0], sizes = [1, 2, 512], strides = [1, 1, 1]} : vector<8x2x512xf32> to vector<1x2x512xf32>
    %36 = vector.shape_cast %35 : vector<1x2x512xf32> to vector<2x512xf32>
    %37 = arith.truncf %31 : vector<2x128xf32> to vector<2x128xbf16>
    %cst_15 = arith.constant dense<0.000000e+00> : vector<2x512xf32>
    %38 = tpu.matmul %37, %8, %cst_15 {dimension_numbers = #tpu.dot_dimension_numbers<[1], [0], [0], [1], [0, 0, 1, 1], [], []>} : vector<2x128xbf16>, vector<128x512xbf16>, vector<2x512xf32> -> vector<2x512xf32>
    %39 = arith.addf %36, %38 : vector<2x512xf32>
    %40 = vector.extract_strided_slice %39 {offsets = [0, 0], sizes = [2, 384], strides = [1, 1]} : vector<2x512xf32> to vector<2x384xf32>
    %41 = arith.negf %40 : vector<2x384xf32>
    %42 = math.exp %41 : vector<2x384xf32>
    %cst_16 = arith.constant 1.000000e+00 : f32
    %43 = vector.broadcast %cst_16 : f32 to vector<2x384xf32>
    %44 = arith.addf %43, %42 : vector<2x384xf32>
    %45 = arith.divf %43, %44 : vector<2x384xf32>
    %46 = vector.extract_strided_slice %45 {offsets = [0, 0], sizes = [2, 128], strides = [1, 1]} : vector<2x384xf32> to vector<2x128xf32>
    %47 = vector.extract_strided_slice %45 {offsets = [0, 128], sizes = [2, 128], strides = [1, 1]} : vector<2x384xf32> to vector<2x128xf32>
    %48 = vector.extract_strided_slice %45 {offsets = [0, 256], sizes = [2, 128], strides = [1, 1]} : vector<2x384xf32> to vector<2x128xf32>
    %49 = vector.extract_strided_slice %39 {offsets = [0, 384], sizes = [2, 128], strides = [1, 1]} : vector<2x512xf32> to vector<2x128xf32>
    %50 = math.tanh %49 : vector<2x128xf32>
    %51 = arith.mulf %47, %29 : vector<2x128xf32>
    %52 = arith.mulf %46, %50 : vector<2x128xf32>
    %53 = arith.addf %51, %52 : vector<2x128xf32>
    %54 = math.tanh %53 : vector<2x128xf32>
    %55 = arith.mulf %48, %54 : vector<2x128xf32>
    %56 = math.tanh %55 : vector<2x128xf32>
    %57 = vector.shape_cast %56 : vector<2x128xf32> to vector<2x1x128xf32>
    %c0_17 = arith.constant 0 : index
    %c1 = arith.constant 1 : index
    %c0_18 = arith.constant 0 : index
    %58 = vector.load %arg17[%c0_17, %c1, %c0_18] : memref<2x8x128xf32, #tpu.memory_space<vmem>>, vector<2x1x128xf32>
    tpu.vector_store %arg17[%c0_17, %c1, %c0_18], %57 {strides = array<i32>} : memref<2x8x128xf32, #tpu.memory_space<vmem>>, vector<2x1x128xf32>,
    %59 = vector.extract_strided_slice %7 {offsets = [2, 0, 0], sizes = [1, 2, 512], strides = [1, 1, 1]} : vector<8x2x512xf32> to vector<1x2x512xf32>
    %60 = vector.shape_cast %59 : vector<1x2x512xf32> to vector<2x512xf32>
    %61 = arith.truncf %55 : vector<2x128xf32> to vector<2x128xbf16>
    %cst_19 = arith.constant dense<0.000000e+00> : vector<2x512xf32>
    %62 = tpu.matmul %61, %8, %cst_19 {dimension_numbers = #tpu.dot_dimension_numbers<[1], [0], [0], [1], [0, 0, 1, 1], [], []>} : vector<2x128xbf16>, vector<128x512xbf16>, vector<2x512xf32> -> vector<2x512xf32>
    %63 = arith.addf %60, %62 : vector<2x512xf32>
    %64 = vector.extract_strided_slice %63 {offsets = [0, 0], sizes = [2, 384], strides = [1, 1]} : vector<2x512xf32> to vector<2x384xf32>
    %65 = arith.negf %64 : vector<2x384xf32>
    %66 = math.exp %65 : vector<2x384xf32>
    %cst_20 = arith.constant 1.000000e+00 : f32
    %67 = vector.broadcast %cst_20 : f32 to vector<2x384xf32>
    %68 = arith.addf %67, %66 : vector<2x384xf32>
    %69 = arith.divf %67, %68 : vector<2x384xf32>
    %70 = vector.extract_strided_slice %69 {offsets = [0, 0], sizes = [2, 128], strides = [1, 1]} : vector<2x384xf32> to vector<2x128xf32>
    %71 = vector.extract_strided_slice %69 {offsets = [0, 128], sizes = [2, 128], strides = [1, 1]} : vector<2x384xf32> to vector<2x128xf32>
    %72 = vector.extract_strided_slice %69 {offsets = [0, 256], sizes = [2, 128], strides = [1, 1]} : vector<2x384xf32> to vector<2x128xf32>
    %73 = vector.extract_strided_slice %63 {offsets = [0, 384], sizes = [2, 128], strides = [1, 1]} : vector<2x512xf32> to vector<2x128xf32>
    %74 = math.tanh %73 : vector<2x128xf32>
    %75 = arith.mulf %71, %53 : vector<2x128xf32>
    %76 = arith.mulf %70, %74 : vector<2x128xf32>
    %77 = arith.addf %75, %76 : vector<2x128xf32>
    %78 = math.tanh %77 : vector<2x128xf32>
    %79 = arith.mulf %72, %78 : vector<2x128xf32>
    %80 = math.tanh %79 : vector<2x128xf32>
    %81 = vector.shape_cast %80 : vector<2x128xf32> to vector<2x1x128xf32>
    %c0_21 = arith.constant 0 : index
    %c2 = arith.constant 2 : index
    %c0_22 = arith.constant 0 : index
    %82 = vector.load %arg17[%c0_21, %c2, %c0_22] : memref<2x8x128xf32, #tpu.memory_space<vmem>>, vector<2x1x128xf32>
    tpu.vector_store %arg17[%c0_21, %c2, %c0_22], %81 {strides = array<i32>} : memref<2x8x128xf32, #tpu.memory_space<vmem>>, vector<2x1x128xf32>,
    %83 = vector.extract_strided_slice %7 {offsets = [3, 0, 0], sizes = [1, 2, 512], strides = [1, 1, 1]} : vector<8x2x512xf32> to vector<1x2x512xf32>
    %84 = vector.shape_cast %83 : vector<1x2x512xf32> to vector<2x512xf32>
    %85 = arith.truncf %79 : vector<2x128xf32> to vector<2x128xbf16>
    %cst_23 = arith.constant dense<0.000000e+00> : vector<2x512xf32>
    %86 = tpu.matmul %85, %8, %cst_23 {dimension_numbers = #tpu.dot_dimension_numbers<[1], [0], [0], [1], [0, 0, 1, 1], [], []>} : vector<2x128xbf16>, vector<128x512xbf16>, vector<2x512xf32> -> vector<2x512xf32>
    %87 = arith.addf %84, %86 : vector<2x512xf32>
    %88 = vector.extract_strided_slice %87 {offsets = [0, 0], sizes = [2, 384], strides = [1, 1]} : vector<2x512xf32> to vector<2x384xf32>
    %89 = arith.negf %88 : vector<2x384xf32>
    %90 = math.exp %89 : vector<2x384xf32>
    %cst_24 = arith.constant 1.000000e+00 : f32
    %91 = vector.broadcast %cst_24 : f32 to vector<2x384xf32>
    %92 = arith.addf %91, %90 : vector<2x384xf32>
    %93 = arith.divf %91, %92 : vector<2x384xf32>
    %94 = vector.extract_strided_slice %93 {offsets = [0, 0], sizes = [2, 128], strides = [1, 1]} : vector<2x384xf32> to vector<2x128xf32>
    %95 = vector.extract_strided_slice %93 {offsets = [0, 128], sizes = [2, 128], strides = [1, 1]} : vector<2x384xf32> to vector<2x128xf32>
    %96 = vector.extract_strided_slice %93 {offsets = [0, 256], sizes = [2, 128], strides = [1, 1]} : vector<2x384xf32> to vector<2x128xf32>
    %97 = vector.extract_strided_slice %87 {offsets = [0, 384], sizes = [2, 128], strides = [1, 1]} : vector<2x512xf32> to vector<2x128xf32>
    %98 = math.tanh %97 : vector<2x128xf32>
    %99 = arith.mulf %95, %77 : vector<2x128xf32>
    %100 = arith.mulf %94, %98 : vector<2x128xf32>
    %101 = arith.addf %99, %100 : vector<2x128xf32>
    %102 = math.tanh %101 : vector<2x128xf32>
    %103 = arith.mulf %96, %102 : vector<2x128xf32>
    %104 = math.tanh %103 : vector<2x128xf32>
    %105 = vector.shape_cast %104 : vector<2x128xf32> to vector<2x1x128xf32>
    %c0_25 = arith.constant 0 : index
    %c3 = arith.constant 3 : index
    %c0_26 = arith.constant 0 : index
    %106 = vector.load %arg17[%c0_25, %c3, %c0_26] : memref<2x8x128xf32, #tpu.memory_space<vmem>>, vector<2x1x128xf32>
    tpu.vector_store %arg17[%c0_25, %c3, %c0_26], %105 {strides = array<i32>} : memref<2x8x128xf32, #tpu.memory_space<vmem>>, vector<2x1x128xf32>,
    %107 = vector.extract_strided_slice %7 {offsets = [4, 0, 0], sizes = [1, 2, 512], strides = [1, 1, 1]} : vector<8x2x512xf32> to vector<1x2x512xf32>
    %108 = vector.shape_cast %107 : vector<1x2x512xf32> to vector<2x512xf32>
    %109 = arith.truncf %103 : vector<2x128xf32> to vector<2x128xbf16>
    %cst_27 = arith.constant dense<0.000000e+00> : vector<2x512xf32>
    %110 = tpu.matmul %109, %8, %cst_27 {dimension_numbers = #tpu.dot_dimension_numbers<[1], [0], [0], [1], [0, 0, 1, 1], [], []>} : vector<2x128xbf16>, vector<128x512xbf16>, vector<2x512xf32> -> vector<2x512xf32>
    %111 = arith.addf %108, %110 : vector<2x512xf32>
    %112 = vector.extract_strided_slice %111 {offsets = [0, 0], sizes = [2, 384], strides = [1, 1]} : vector<2x512xf32> to vector<2x384xf32>
    %113 = arith.negf %112 : vector<2x384xf32>
    %114 = math.exp %113 : vector<2x384xf32>
    %cst_28 = arith.constant 1.000000e+00 : f32
    %115 = vector.broadcast %cst_28 : f32 to vector<2x384xf32>
    %116 = arith.addf %115, %114 : vector<2x384xf32>
    %117 = arith.divf %115, %116 : vector<2x384xf32>
    %118 = vector.extract_strided_slice %117 {offsets = [0, 0], sizes = [2, 128], strides = [1, 1]} : vector<2x384xf32> to vector<2x128xf32>
    %119 = vector.extract_strided_slice %117 {offsets = [0, 128], sizes = [2, 128], strides = [1, 1]} : vector<2x384xf32> to vector<2x128xf32>
    %120 = vector.extract_strided_slice %117 {offsets = [0, 256], sizes = [2, 128], strides = [1, 1]} : vector<2x384xf32> to vector<2x128xf32>
    %121 = vector.extract_strided_slice %111 {offsets = [0, 384], sizes = [2, 128], strides = [1, 1]} : vector<2x512xf32> to vector<2x128xf32>
    %122 = math.tanh %121 : vector<2x128xf32>
    %123 = arith.mulf %119, %101 : vector<2x128xf32>
    %124 = arith.mulf %118, %122 : vector<2x128xf32>
    %125 = arith.addf %123, %124 : vector<2x128xf32>
    %126 = math.tanh %125 : vector<2x128xf32>
    %127 = arith.mulf %120, %126 : vector<2x128xf32>
    %128 = math.tanh %127 : vector<2x128xf32>
    %129 = vector.shape_cast %128 : vector<2x128xf32> to vector<2x1x128xf32>
    %c0_29 = arith.constant 0 : index
    %c4 = arith.constant 4 : index
    %c0_30 = arith.constant 0 : index
    %130 = vector.load %arg17[%c0_29, %c4, %c0_30] : memref<2x8x128xf32, #tpu.memory_space<vmem>>, vector<2x1x128xf32>
    tpu.vector_store %arg17[%c0_29, %c4, %c0_30], %129 {strides = array<i32>} : memref<2x8x128xf32, #tpu.memory_space<vmem>>, vector<2x1x128xf32>,
    %131 = tpu.iota {dimensions = array<i32: 1>} : vector<1x128xi32>
    %c64_i32 = arith.constant 64 : i32
    %132 = vector.broadcast %c64_i32 : i32 to vector<1x128xi32>
    %133 = arith.cmpi slt, %131, %132 : vector<1x128xi32>
    %134 = vector.shape_cast %133 : vector<1x128xi1> to vector<1x128xi1>
    %135 = vector.broadcast %134 : vector<1x128xi1> to vector<2x128xi1>
    %136 = arith.select %135, %127, %103 : vector<2x128xi1>, vector<2x128xf32>
    %137 = vector.shape_cast %133 : vector<1x128xi1> to vector<1x128xi1>
    %138 = vector.broadcast %137 : vector<1x128xi1> to vector<2x128xi1>
    %139 = arith.select %138, %125, %101 : vector<2x128xi1>, vector<2x128xf32>
    %140 = vector.extract_strided_slice %7 {offsets = [5, 0, 0], sizes = [1, 2, 512], strides = [1, 1, 1]} : vector<8x2x512xf32> to vector<1x2x512xf32>
    %141 = vector.shape_cast %140 : vector<1x2x512xf32> to vector<2x512xf32>
    %142 = arith.truncf %136 : vector<2x128xf32> to vector<2x128xbf16>
    %cst_31 = arith.constant dense<0.000000e+00> : vector<2x512xf32>
    %143 = tpu.matmul %142, %8, %cst_31 {dimension_numbers = #tpu.dot_dimension_numbers<[1], [0], [0], [1], [0, 0, 1, 1], [], []>} : vector<2x128xbf16>, vector<128x512xbf16>, vector<2x512xf32> -> vector<2x512xf32>
    %144 = arith.addf %141, %143 : vector<2x512xf32>
    %145 = vector.extract_strided_slice %144 {offsets = [0, 0], sizes = [2, 384], strides = [1, 1]} : vector<2x512xf32> to vector<2x384xf32>
    %146 = arith.negf %145 : vector<2x384xf32>
    %147 = math.exp %146 : vector<2x384xf32>
    %cst_32 = arith.constant 1.000000e+00 : f32
    %148 = vector.broadcast %cst_32 : f32 to vector<2x384xf32>
    %149 = arith.addf %148, %147 : vector<2x384xf32>
    %150 = arith.divf %148, %149 : vector<2x384xf32>
    %151 = vector.extract_strided_slice %150 {offsets = [0, 0], sizes = [2, 128], strides = [1, 1]} : vector<2x384xf32> to vector<2x128xf32>
    %152 = vector.extract_strided_slice %150 {offsets = [0, 128], sizes = [2, 128], strides = [1, 1]} : vector<2x384xf32> to vector<2x128xf32>
    %153 = vector.extract_strided_slice %150 {offsets = [0, 256], sizes = [2, 128], strides = [1, 1]} : vector<2x384xf32> to vector<2x128xf32>
    %154 = vector.extract_strided_slice %144 {offsets = [0, 384], sizes = [2, 128], strides = [1, 1]} : vector<2x512xf32> to vector<2x128xf32>
    %155 = math.tanh %154 : vector<2x128xf32>
    %156 = arith.mulf %152, %139 : vector<2x128xf32>
    %157 = arith.mulf %151, %155 : vector<2x128xf32>
    %158 = arith.addf %156, %157 : vector<2x128xf32>
    %159 = math.tanh %158 : vector<2x128xf32>
    %160 = arith.mulf %153, %159 : vector<2x128xf32>
    %161 = math.tanh %160 : vector<2x128xf32>
    %162 = vector.shape_cast %161 : vector<2x128xf32> to vector<2x1x128xf32>
    %c0_33 = arith.constant 0 : index
    %c5 = arith.constant 5 : index
    %c0_34 = arith.constant 0 : index
    %163 = vector.load %arg17[%c0_33, %c5, %c0_34] : memref<2x8x128xf32, #tpu.memory_space<vmem>>, vector<2x1x128xf32>
    tpu.vector_store %arg17[%c0_33, %c5, %c0_34], %162 {strides = array<i32>} : memref<2x8x128xf32, #tpu.memory_space<vmem>>, vector<2x1x128xf32>,
    %164 = tpu.iota {dimensions = array<i32: 1>} : vector<1x128xi32>
    %c64_i32_35 = arith.constant 64 : i32
    %165 = vector.broadcast %c64_i32_35 : i32 to vector<1x128xi32>
    %166 = arith.cmpi slt, %164, %165 : vector<1x128xi32>
    %167 = vector.shape_cast %166 : vector<1x128xi1> to vector<1x128xi1>
    %168 = vector.broadcast %167 : vector<1x128xi1> to vector<2x128xi1>
    %169 = arith.select %168, %160, %136 : vector<2x128xi1>, vector<2x128xf32>
    %170 = vector.shape_cast %166 : vector<1x128xi1> to vector<1x128xi1>
    %171 = vector.broadcast %170 : vector<1x128xi1> to vector<2x128xi1>
    %172 = arith.select %171, %158, %139 : vector<2x128xi1>, vector<2x128xf32>
    %173 = vector.extract_strided_slice %7 {offsets = [6, 0, 0], sizes = [1, 2, 512], strides = [1, 1, 1]} : vector<8x2x512xf32> to vector<1x2x512xf32>
    %174 = vector.shape_cast %173 : vector<1x2x512xf32> to vector<2x512xf32>
    %175 = arith.truncf %169 : vector<2x128xf32> to vector<2x128xbf16>
    %cst_36 = arith.constant dense<0.000000e+00> : vector<2x512xf32>
    %176 = tpu.matmul %175, %8, %cst_36 {dimension_numbers = #tpu.dot_dimension_numbers<[1], [0], [0], [1], [0, 0, 1, 1], [], []>} : vector<2x128xbf16>, vector<128x512xbf16>, vector<2x512xf32> -> vector<2x512xf32>
    %177 = arith.addf %174, %176 : vector<2x512xf32>
    %178 = vector.extract_strided_slice %177 {offsets = [0, 0], sizes = [2, 384], strides = [1, 1]} : vector<2x512xf32> to vector<2x384xf32>
    %179 = arith.negf %178 : vector<2x384xf32>
    %180 = math.exp %179 : vector<2x384xf32>
    %cst_37 = arith.constant 1.000000e+00 : f32
    %181 = vector.broadcast %cst_37 : f32 to vector<2x384xf32>
    %182 = arith.addf %181, %180 : vector<2x384xf32>
    %183 = arith.divf %181, %182 : vector<2x384xf32>
    %184 = vector.extract_strided_slice %183 {offsets = [0, 0], sizes = [2, 128], strides = [1, 1]} : vector<2x384xf32> to vector<2x128xf32>
    %185 = vector.extract_strided_slice %183 {offsets = [0, 128], sizes = [2, 128], strides = [1, 1]} : vector<2x384xf32> to vector<2x128xf32>
    %186 = vector.extract_strided_slice %183 {offsets = [0, 256], sizes = [2, 128], strides = [1, 1]} : vector<2x384xf32> to vector<2x128xf32>
    %187 = vector.extract_strided_slice %177 {offsets = [0, 384], sizes = [2, 128], strides = [1, 1]} : vector<2x512xf32> to vector<2x128xf32>
    %188 = math.tanh %187 : vector<2x128xf32>
    %189 = arith.mulf %185, %172 : vector<2x128xf32>
    %190 = arith.mulf %184, %188 : vector<2x128xf32>
    %191 = arith.addf %189, %190 : vector<2x128xf32>
    %192 = math.tanh %191 : vector<2x128xf32>
    %193 = arith.mulf %186, %192 : vector<2x128xf32>
    %194 = math.tanh %193 : vector<2x128xf32>
    %195 = vector.shape_cast %194 : vector<2x128xf32> to vector<2x1x128xf32>
    %c0_38 = arith.constant 0 : index
    %c6 = arith.constant 6 : index
    %c0_39 = arith.constant 0 : index
    %196 = vector.load %arg17[%c0_38, %c6, %c0_39] : memref<2x8x128xf32, #tpu.memory_space<vmem>>, vector<2x1x128xf32>
    tpu.vector_store %arg17[%c0_38, %c6, %c0_39], %195 {strides = array<i32>} : memref<2x8x128xf32, #tpu.memory_space<vmem>>, vector<2x1x128xf32>,
    %197 = tpu.iota {dimensions = array<i32: 1>} : vector<1x128xi32>
    %c64_i32_40 = arith.constant 64 : i32
    %198 = vector.broadcast %c64_i32_40 : i32 to vector<1x128xi32>
    %199 = arith.cmpi slt, %197, %198 : vector<1x128xi32>
    %200 = vector.shape_cast %199 : vector<1x128xi1> to vector<1x128xi1>
    %201 = vector.broadcast %200 : vector<1x128xi1> to vector<2x128xi1>
    %202 = arith.select %201, %193, %169 : vector<2x128xi1>, vector<2x128xf32>
    %203 = vector.shape_cast %199 : vector<1x128xi1> to vector<1x128xi1>
    %204 = vector.broadcast %203 : vector<1x128xi1> to vector<2x128xi1>
    %205 = arith.select %204, %191, %172 : vector<2x128xi1>, vector<2x128xf32>
    %206 = vector.extract_strided_slice %7 {offsets = [7, 0, 0], sizes = [1, 2, 512], strides = [1, 1, 1]} : vector<8x2x512xf32> to vector<1x2x512xf32>
    %207 = vector.shape_cast %206 : vector<1x2x512xf32> to vector<2x512xf32>
    %208 = arith.truncf %202 : vector<2x128xf32> to vector<2x128xbf16>
    %cst_41 = arith.constant dense<0.000000e+00> : vector<2x512xf32>
    %209 = tpu.matmul %208, %8, %cst_41 {dimension_numbers = #tpu.dot_dimension_numbers<[1], [0], [0], [1], [0, 0, 1, 1], [], []>} : vector<2x128xbf16>, vector<128x512xbf16>, vector<2x512xf32> -> vector<2x512xf32>
    %210 = arith.addf %207, %209 : vector<2x512xf32>
    %211 = vector.extract_strided_slice %210 {offsets = [0, 0], sizes = [2, 384], strides = [1, 1]} : vector<2x512xf32> to vector<2x384xf32>
    %212 = arith.negf %211 : vector<2x384xf32>
    %213 = math.exp %212 : vector<2x384xf32>
    %cst_42 = arith.constant 1.000000e+00 : f32
    %214 = vector.broadcast %cst_42 : f32 to vector<2x384xf32>
    %215 = arith.addf %214, %213 : vector<2x384xf32>
    %216 = arith.divf %214, %215 : vector<2x384xf32>
    %217 = vector.extract_strided_slice %216 {offsets = [0, 0], sizes = [2, 128], strides = [1, 1]} : vector<2x384xf32> to vector<2x128xf32>
    %218 = vector.extract_strided_slice %216 {offsets = [0, 128], sizes = [2, 128], strides = [1, 1]} : vector<2x384xf32> to vector<2x128xf32>
    %219 = vector.extract_strided_slice %216 {offsets = [0, 256], sizes = [2, 128], strides = [1, 1]} : vector<2x384xf32> to vector<2x128xf32>
    %220 = vector.extract_strided_slice %210 {offsets = [0, 384], sizes = [2, 128], strides = [1, 1]} : vector<2x512xf32> to vector<2x128xf32>
    %221 = math.tanh %220 : vector<2x128xf32>
    %222 = arith.mulf %218, %205 : vector<2x128xf32>
    %223 = arith.mulf %217, %221 : vector<2x128xf32>
    %224 = arith.addf %222, %223 : vector<2x128xf32>
    %225 = math.tanh %224 : vector<2x128xf32>
    %226 = arith.mulf %219, %225 : vector<2x128xf32>
    %227 = math.tanh %226 : vector<2x128xf32>
    %228 = vector.shape_cast %227 : vector<2x128xf32> to vector<2x1x128xf32>
    %c0_43 = arith.constant 0 : index
    %c7 = arith.constant 7 : index
    %c0_44 = arith.constant 0 : index
    %229 = vector.load %arg17[%c0_43, %c7, %c0_44] : memref<2x8x128xf32, #tpu.memory_space<vmem>>, vector<2x1x128xf32>
    tpu.vector_store %arg17[%c0_43, %c7, %c0_44], %228 {strides = array<i32>} : memref<2x8x128xf32, #tpu.memory_space<vmem>>, vector<2x1x128xf32>,
    %c0_45 = arith.constant 0 : index
    %c0_46 = arith.constant 0 : index
    %c0_47 = arith.constant 0 : index
    %230 = vector.load %arg17[%c0_45, %c0_46, %c0_47] : memref<2x8x128xf32, #tpu.memory_space<vmem>>, vector<2x8x128xf32>
    %231 = vector.extract_strided_slice %230 {offsets = [0, 0, 0], sizes = [2, 8, 32], strides = [1, 1, 1]} : vector<2x8x128xf32> to vector<2x8x32xf32>
    %232 = vector.extract_strided_slice %230 {offsets = [0, 0, 32], sizes = [2, 8, 32], strides = [1, 1, 1]} : vector<2x8x128xf32> to vector<2x8x32xf32>
    %233 = tpu.iota {dimensions = array<i32: 1>} : vector<2x8x8xi32>
    %234 = tpu.iota {dimensions = array<i32: 2>} : vector<2x8x8xi32>
    %235 = arith.addi %233, %234 : vector<2x8x8xi32>
    %c7_i32 = arith.constant 7 : i32
    %236 = vector.broadcast %c7_i32 : i32 to vector<2x8x8xi32>
    %237 = arith.cmpi eq, %235, %236 : vector<2x8x8xi32>
    %238 = arith.extui %237 : vector<2x8x8xi1> to vector<2x8x8xi32>
    %239 = arith.sitofp %238 : vector<2x8x8xi32> to vector<2x8x8xf32>
    "tpu.trace_start"() <{level = 10 : i32, message = "bts,bsf->btf"}> : () -> ()
    %cst_48 = arith.constant dense<0.000000e+00> : vector<2x8x32xf32>
    %240 = tpu.matmul %239, %232, %cst_48 {dimension_numbers = #tpu.dot_dimension_numbers<[2], [1], [1], [2], [0, 0, 0, 1, 1, 2], [0], [0]>} : vector<2x8x8xf32>, vector<2x8x32xf32>, vector<2x8x32xf32> -> vector<2x8x32xf32>
    "tpu.trace_stop"() : () -> ()
    %241 = tpu.concatenate %231, %240 in 2 : vector<2x8x32xf32>, vector<2x8x32xf32> -> vector<2x8x64xf32>
    %242 = vector.extract_strided_slice %230 {offsets = [0, 0, 64], sizes = [2, 4, 32], strides = [1, 1, 1]} : vector<2x8x128xf32> to vector<2x4x32xf32>
    %243 = vector.extract_strided_slice %230 {offsets = [0, 0, 96], sizes = [2, 4, 32], strides = [1, 1, 1]} : vector<2x8x128xf32> to vector<2x4x32xf32>
    %244 = tpu.iota {dimensions = array<i32: 1>} : vector<2x4x4xi32>
    %245 = tpu.iota {dimensions = array<i32: 2>} : vector<2x4x4xi32>
    %246 = arith.addi %244, %245 : vector<2x4x4xi32>
    %c3_i32 = arith.constant 3 : i32
    %247 = vector.broadcast %c3_i32 : i32 to vector<2x4x4xi32>
    %248 = arith.cmpi eq, %246, %247 : vector<2x4x4xi32>
    %249 = arith.extui %248 : vector<2x4x4xi1> to vector<2x4x4xi32>
    %250 = arith.sitofp %249 : vector<2x4x4xi32> to vector<2x4x4xf32>
    "tpu.trace_start"() <{level = 10 : i32, message = "bts,bsf->btf"}> : () -> ()
    %cst_49 = arith.constant dense<0.000000e+00> : vector<2x4x32xf32>
    %251 = tpu.matmul %250, %243, %cst_49 {dimension_numbers = #tpu.dot_dimension_numbers<[2], [1], [1], [2], [0, 0, 0, 1, 1, 2], [0], [0]>} : vector<2x4x4xf32>, vector<2x4x32xf32>, vector<2x4x32xf32> -> vector<2x4x32xf32>
    "tpu.trace_stop"() : () -> ()
    %252 = tpu.concatenate %242, %251 in 2 : vector<2x4x32xf32>, vector<2x4x32xf32> -> vector<2x4x64xf32>
    %253 = vector.shape_cast %252 : vector<2x4x64xf32> to vector<8x64xf32>
    %254 = arith.truncf %253 : vector<8x64xf32> to vector<8x64xbf16>
    %c0_50 = arith.constant 0 : index
    %c0_51 = arith.constant 0 : index
    %255 = vector.load %arg5[%c0_50, %c0_51] : memref<64x192xbf16, #tpu.memory_space<vmem>>, vector<64x192xbf16>
    %cst_52 = arith.constant dense<0.000000e+00> : vector<8x192xf32>
    %256 = tpu.matmul %254, %255, %cst_52 {dimension_numbers = #tpu.dot_dimension_numbers<[1], [0], [0], [1], [0, 0, 1, 1], [], []>} : vector<8x64xbf16>, vector<64x192xbf16>, vector<8x192xf32> -> vector<8x192xf32>
    %c0_53 = arith.constant 0 : index
    %c0_54 = arith.constant 0 : index
    %257 = vector.load %arg6[%c0_53, %c0_54] : memref<1x192xf32, #tpu.memory_space<vmem>>, vector<1x192xf32>
    %258 = vector.broadcast %257 : vector<1x192xf32> to vector<8x192xf32>
    %259 = arith.addf %256, %258 : vector<8x192xf32>
    %260 = vector.shape_cast %259 : vector<8x192xf32> to vector<2x4x192xf32>
    %261 = vector.extract_strided_slice %260 {offsets = [0, 0, 0], sizes = [2, 4, 64], strides = [1, 1, 1]} : vector<2x4x192xf32> to vector<2x4x64xf32>
    %262 = arith.truncf %261 : vector<2x4x64xf32> to vector<2x4x64xbf16>
    %263 = vector.extract_strided_slice %260 {offsets = [0, 0, 64], sizes = [2, 4, 64], strides = [1, 1, 1]} : vector<2x4x192xf32> to vector<2x4x64xf32>
    %264 = arith.truncf %263 : vector<2x4x64xf32> to vector<2x4x64xbf16>
    %265 = vector.extract_strided_slice %260 {offsets = [0, 0, 128], sizes = [2, 4, 64], strides = [1, 1, 1]} : vector<2x4x192xf32> to vector<2x4x64xf32>
    "tpu.trace_start"() <{level = 10 : i32, message = "bqd,bkd->bqk"}> : () -> ()
    %cst_55 = arith.constant dense<0.000000e+00> : vector<2x4x4xf32>
    %266 = tpu.matmul %262, %264, %cst_55 {dimension_numbers = #tpu.dot_dimension_numbers<[2], [2], [1], [1], [0, 0, 0, 1, 1, 1], [0], [0]>} : vector<2x4x64xbf16>, vector<2x4x64xbf16>, vector<2x4x4xf32> -> vector<2x4x4xf32>
    "tpu.trace_stop"() : () -> ()
    %cst_56 = arith.constant dense<0xFF800000> : vector<2x4xf32>
    %267 = vector.multi_reduction <maximumf>, %266, %cst_56 [2] : vector<2x4x4xf32> to vector<2x4xf32>
    %268 = vector.shape_cast %267 : vector<2x4xf32> to vector<2x4x1xf32>
    %269 = vector.broadcast %268 : vector<2x4x1xf32> to vector<2x4x4xf32>
    %270 = arith.subf %266, %269 : vector<2x4x4xf32>
    %271 = math.exp %270 : vector<2x4x4xf32>
    %cst_57 = arith.constant dense<0.000000e+00> : vector<2x4xf32>
    %272 = vector.multi_reduction <add>, %271, %cst_57 [2] : vector<2x4x4xf32> to vector<2x4xf32>
    %273 = vector.shape_cast %272 : vector<2x4xf32> to vector<2x4x1xf32>
    %274 = tpu.reciprocal %273 {approx = true} : vector<2x4x1xf32> -> vector<2x4x1xf32>
    %275 = vector.broadcast %274 : vector<2x4x1xf32> to vector<2x4x4xf32>
    %276 = arith.mulf %271, %275 : vector<2x4x4xf32>
    %cst_58 = arith.constant dense<0.000000e+00> : vector<2x4xf32>
    %277 = vector.multi_reduction <add>, %276, %cst_58 [1] : vector<2x4x4xf32> to vector<2x4xf32>
    %278 = vector.shape_cast %277 : vector<2x4xf32> to vector<2x4x1xf32>
    %279 = vector.broadcast %278 : vector<2x4x1xf32> to vector<2x4x64xf32>
    %280 = arith.mulf %279, %265 : vector<2x4x64xf32>
    %cst_59 = arith.constant dense<0.000000e+00> : vector<2x64xf32>
    %281 = vector.multi_reduction <add>, %280, %cst_59 [1] : vector<2x4x64xf32> to vector<2x64xf32>
    %282 = arith.truncf %281 : vector<2x64xf32> to vector<2x64xbf16>
    %c0_60 = arith.constant 0 : index
    %c0_61 = arith.constant 0 : index
    %283 = vector.load %arg7[%c0_60, %c0_61] : memref<64x64xbf16, #tpu.memory_space<vmem>>, vector<64x64xbf16>
    %cst_62 = arith.constant dense<0.000000e+00> : vector<2x64xf32>
    %284 = tpu.matmul %282, %283, %cst_62 {dimension_numbers = #tpu.dot_dimension_numbers<[1], [0], [0], [1], [0, 0, 1, 1], [], []>} : vector<2x64xbf16>, vector<64x64xbf16>, vector<2x64xf32> -> vector<2x64xf32>
    %c0_63 = arith.constant 0 : index
    %c0_64 = arith.constant 0 : index
    %285 = vector.load %arg8[%c0_63, %c0_64] : memref<1x64xf32, #tpu.memory_space<vmem>>, vector<1x64xf32>
    %cst_65 = arith.constant 4.000000e+00 : f32
    %286 = vector.broadcast %cst_65 : f32 to vector<1x64xf32>
    %287 = arith.mulf %286, %285 : vector<1x64xf32>
    %288 = vector.broadcast %287 : vector<1x64xf32> to vector<2x64xf32>
    %289 = arith.addf %284, %288 : vector<2x64xf32>
    %290 = vector.shape_cast %241 : vector<2x8x64xf32> to vector<16x64xf32>
    %291 = arith.truncf %290 : vector<16x64xf32> to vector<16x64xbf16>
    %c0_66 = arith.constant 0 : index
    %c0_67 = arith.constant 0 : index
    %292 = vector.load %arg9[%c0_66, %c0_67] : memref<64x192xbf16, #tpu.memory_space<vmem>>, vector<64x192xbf16>
    %cst_68 = arith.constant dense<0.000000e+00> : vector<16x192xf32>
    %293 = tpu.matmul %291, %292, %cst_68 {dimension_numbers = #tpu.dot_dimension_numbers<[1], [0], [0], [1], [0, 0, 1, 1], [], []>} : vector<16x64xbf16>, vector<64x192xbf16>, vector<16x192xf32> -> vector<16x192xf32>
    %c0_69 = arith.constant 0 : index
    %c0_70 = arith.constant 0 : index
    %294 = vector.load %arg10[%c0_69, %c0_70] : memref<1x192xf32, #tpu.memory_space<vmem>>, vector<1x192xf32>
    %295 = vector.broadcast %294 : vector<1x192xf32> to vector<16x192xf32>
    %296 = arith.addf %293, %295 : vector<16x192xf32>
    %297 = vector.shape_cast %296 : vector<16x192xf32> to vector<2x8x192xf32>
    %298 = vector.extract_strided_slice %297 {offsets = [0, 0, 0], sizes = [2, 8, 64], strides = [1, 1, 1]} : vector<2x8x192xf32> to vector<2x8x64xf32>
    %299 = arith.truncf %298 : vector<2x8x64xf32> to vector<2x8x64xbf16>
    %300 = vector.extract_strided_slice %297 {offsets = [0, 0, 64], sizes = [2, 8, 64], strides = [1, 1, 1]} : vector<2x8x192xf32> to vector<2x8x64xf32>
    %301 = arith.truncf %300 : vector<2x8x64xf32> to vector<2x8x64xbf16>
    %302 = vector.extract_strided_slice %297 {offsets = [0, 0, 128], sizes = [2, 8, 64], strides = [1, 1, 1]} : vector<2x8x192xf32> to vector<2x8x64xf32>
    "tpu.trace_start"() <{level = 10 : i32, message = "bqd,bkd->bqk"}> : () -> ()
    %cst_71 = arith.constant dense<0.000000e+00> : vector<2x8x8xf32>
    %303 = tpu.matmul %299, %301, %cst_71 {dimension_numbers = #tpu.dot_dimension_numbers<[2], [2], [1], [1], [0, 0, 0, 1, 1, 1], [0], [0]>} : vector<2x8x64xbf16>, vector<2x8x64xbf16>, vector<2x8x8xf32> -> vector<2x8x8xf32>
    "tpu.trace_stop"() : () -> ()
    %cst_72 = arith.constant dense<0xFF800000> : vector<2x8xf32>
    %304 = vector.multi_reduction <maximumf>, %303, %cst_72 [2] : vector<2x8x8xf32> to vector<2x8xf32>
    %305 = vector.shape_cast %304 : vector<2x8xf32> to vector<2x8x1xf32>
    %306 = vector.broadcast %305 : vector<2x8x1xf32> to vector<2x8x8xf32>
    %307 = arith.subf %303, %306 : vector<2x8x8xf32>
    %308 = math.exp %307 : vector<2x8x8xf32>
    %cst_73 = arith.constant dense<0.000000e+00> : vector<2x8xf32>
    %309 = vector.multi_reduction <add>, %308, %cst_73 [2] : vector<2x8x8xf32> to vector<2x8xf32>
    %310 = vector.shape_cast %309 : vector<2x8xf32> to vector<2x8x1xf32>
    %311 = tpu.reciprocal %310 {approx = true} : vector<2x8x1xf32> -> vector<2x8x1xf32>
    %312 = vector.broadcast %311 : vector<2x8x1xf32> to vector<2x8x8xf32>
    %313 = arith.mulf %308, %312 : vector<2x8x8xf32>
    %cst_74 = arith.constant dense<0.000000e+00> : vector<2x8xf32>
    %314 = vector.multi_reduction <add>, %313, %cst_74 [1] : vector<2x8x8xf32> to vector<2x8xf32>
    %315 = vector.shape_cast %314 : vector<2x8xf32> to vector<2x8x1xf32>
    %316 = vector.broadcast %315 : vector<2x8x1xf32> to vector<2x8x64xf32>
    %317 = arith.mulf %316, %302 : vector<2x8x64xf32>
    %cst_75 = arith.constant dense<0.000000e+00> : vector<2x64xf32>
    %318 = vector.multi_reduction <add>, %317, %cst_75 [1] : vector<2x8x64xf32> to vector<2x64xf32>
    %319 = arith.truncf %318 : vector<2x64xf32> to vector<2x64xbf16>
    %c0_76 = arith.constant 0 : index
    %c0_77 = arith.constant 0 : index
    %320 = vector.load %arg11[%c0_76, %c0_77] : memref<64x64xbf16, #tpu.memory_space<vmem>>, vector<64x64xbf16>
    %cst_78 = arith.constant dense<0.000000e+00> : vector<2x64xf32>
    %321 = tpu.matmul %319, %320, %cst_78 {dimension_numbers = #tpu.dot_dimension_numbers<[1], [0], [0], [1], [0, 0, 1, 1], [], []>} : vector<2x64xbf16>, vector<64x64xbf16>, vector<2x64xf32> -> vector<2x64xf32>
    %c0_79 = arith.constant 0 : index
    %c0_80 = arith.constant 0 : index
    %322 = vector.load %arg12[%c0_79, %c0_80] : memref<1x64xf32, #tpu.memory_space<vmem>>, vector<1x64xf32>
    %cst_81 = arith.constant 8.000000e+00 : f32
    %323 = vector.broadcast %cst_81 : f32 to vector<1x64xf32>
    %324 = arith.mulf %323, %322 : vector<1x64xf32>
    %325 = vector.broadcast %324 : vector<1x64xf32> to vector<2x64xf32>
    %326 = arith.addf %321, %325 : vector<2x64xf32>
    %327 = vector.shape_cast %289 : vector<2x64xf32> to vector<2x1x64xf32>
    %328 = vector.broadcast %327 : vector<2x1x64xf32> to vector<2x8x64xf32>
    %329 = arith.mulf %241, %328 : vector<2x8x64xf32>
    %cst_82 = arith.constant dense<0.000000e+00> : vector<2x8xf32>
    %330 = vector.multi_reduction <add>, %329, %cst_82 [2] : vector<2x8x64xf32> to vector<2x8xf32>
    %cst_83 = arith.constant dense<0xFF800000> : vector<2xf32>
    %331 = vector.multi_reduction <maximumf>, %330, %cst_83 [1] : vector<2x8xf32> to vector<2xf32>
    %332 = vector.shape_cast %331 : vector<2xf32> to vector<2x1xf32>
    %333 = vector.broadcast %332 : vector<2x1xf32> to vector<2x8xf32>
    %334 = arith.subf %330, %333 : vector<2x8xf32>
    %335 = math.exp %334 : vector<2x8xf32>
    %cst_84 = arith.constant dense<0.000000e+00> : vector<2xf32>
    %336 = vector.multi_reduction <add>, %335, %cst_84 [1] : vector<2x8xf32> to vector<2xf32>
    %337 = vector.shape_cast %336 : vector<2xf32> to vector<2x1xf32>
    %338 = tpu.reciprocal %337 {approx = true} : vector<2x1xf32> -> vector<2x1xf32>
    %339 = vector.broadcast %338 : vector<2x1xf32> to vector<2x8xf32>
    %340 = arith.mulf %335, %339 : vector<2x8xf32>
    %341 = vector.shape_cast %340 : vector<2x8xf32> to vector<2x8x1xf32>
    %342 = vector.broadcast %341 : vector<2x8x1xf32> to vector<2x8x64xf32>
    %343 = arith.mulf %241, %342 : vector<2x8x64xf32>
    %cst_85 = arith.constant dense<0.000000e+00> : vector<2x64xf32>
    %344 = vector.multi_reduction <add>, %343, %cst_85 [1] : vector<2x8x64xf32> to vector<2x64xf32>
    %345 = arith.truncf %326 : vector<2x64xf32> to vector<2x64xbf16>
    %c0_86 = arith.constant 0 : index
    %c0_87 = arith.constant 0 : index
    %346 = vector.load %arg13[%c0_86, %c0_87] : memref<64x3xbf16, #tpu.memory_space<vmem>>, vector<64x3xbf16>
    %cst_88 = arith.constant dense<0.000000e+00> : vector<2x3xf32>
    %347 = tpu.matmul %345, %346, %cst_88 {dimension_numbers = #tpu.dot_dimension_numbers<[1], [0], [0], [1], [0, 0, 1, 1], [], []>} : vector<2x64xbf16>, vector<64x3xbf16>, vector<2x3xf32> -> vector<2x3xf32>
    %348 = arith.truncf %344 : vector<2x64xf32> to vector<2x64xbf16>
    %c0_89 = arith.constant 0 : index
    %c0_90 = arith.constant 0 : index
    %349 = vector.load %arg14[%c0_89, %c0_90] : memref<64x3xbf16, #tpu.memory_space<vmem>>, vector<64x3xbf16>
    %cst_91 = arith.constant dense<0.000000e+00> : vector<2x3xf32>
    %350 = tpu.matmul %348, %349, %cst_91 {dimension_numbers = #tpu.dot_dimension_numbers<[1], [0], [0], [1], [0, 0, 1, 1], [], []>} : vector<2x64xbf16>, vector<64x3xbf16>, vector<2x3xf32> -> vector<2x3xf32>
    %351 = arith.addf %347, %350 : vector<2x3xf32>
    %c0_92 = arith.constant 0 : index
    %c0_93 = arith.constant 0 : index
    %352 = vector.load %arg15[%c0_92, %c0_93] : memref<1x3xf32, #tpu.memory_space<vmem>>, vector<1x3xf32>
    %353 = vector.broadcast %352 : vector<1x3xf32> to vector<2x3xf32>
    %354 = arith.addf %351, %353 : vector<2x3xf32>
    %c0_94 = arith.constant 0 : index
    %c0_95 = arith.constant 0 : index
    %355 = vector.load %arg16[%c0_94, %c0_95] : memref<2x3xf32, #tpu.memory_space<vmem>>, vector<2x3xf32>
    tpu.vector_store %arg16[%c0_94, %c0_95], %354 {strides = array<i32>} : memref<2x3xf32, #tpu.memory_space<vmem>>, vector<2x3xf32>,
    return
  }
  func.func @transform_0(%arg0: i32) -> (i32, i32, i32) {
    %c0_i32 = arith.constant 0 : i32
    %c0_i32_0 = arith.constant 0 : i32
    %c0_i32_1 = arith.constant 0 : i32
    return %c0_i32, %arg0, %c0_i32_0 : i32, i32, i32
  }
  func.func @transform_1(%arg0: i32) -> (i32, i32) {
    %c0_i32 = arith.constant 0 : i32
    %c0_i32_0 = arith.constant 0 : i32
    %c0_i32_1 = arith.constant 0 : i32
    return %c0_i32, %c0_i32_0 : i32, i32
  }
  func.func @transform_2(%arg0: i32) -> (i32, i32) {
    %c0_i32 = arith.constant 0 : i32
    %c0_i32_0 = arith.constant 0 : i32
    %c0_i32_1 = arith.constant 0 : i32
    return %c0_i32, %c0_i32_0 : i32, i32
  }
  func.func @transform_3(%arg0: i32) -> (i32, i32) {
    %c0_i32 = arith.constant 0 : i32
    %c0_i32_0 = arith.constant 0 : i32
    %c0_i32_1 = arith.constant 0 : i32
    return %c0_i32, %c0_i32_0 : i32, i32
  }
  func.func @transform_4(%arg0: i32) -> (i32, i32) {
    %c0_i32 = arith.constant 0 : i32
    %c0_i32_0 = arith.constant 0 : i32
    %c0_i32_1 = arith.constant 0 : i32
    return %c0_i32, %c0_i32_0 : i32, i32
  }
  func.func @transform_5(%arg0: i32) -> (i32, i32) {
    %c0_i32 = arith.constant 0 : i32
    %c0_i32_0 = arith.constant 0 : i32
    %c0_i32_1 = arith.constant 0 : i32
    return %c0_i32, %c0_i32_0 : i32, i32
  }
  func.func @transform_6(%arg0: i32) -> (i32, i32) {
    %c0_i32 = arith.constant 0 : i32
    %c0_i32_0 = arith.constant 0 : i32
    %c0_i32_1 = arith.constant 0 : i32
    return %c0_i32, %c0_i32_0 : i32, i32
  }
  func.func @transform_7(%arg0: i32) -> (i32, i32) {
    %c0_i32 = arith.constant 0 : i32
    %c0_i32_0 = arith.constant 0 : i32
    %c0_i32_1 = arith.constant 0 : i32
    return %c0_i32, %c0_i32_0 : i32, i32
  }
  func.func @transform_8(%arg0: i32) -> (i32, i32) {
    %c0_i32 = arith.constant 0 : i32
    %c0_i32_0 = arith.constant 0 : i32
    %c0_i32_1 = arith.constant 0 : i32
    return %c0_i32, %c0_i32_0 : i32, i32
  }
  func.func @transform_9(%arg0: i32) -> (i32, i32) {
    %c0_i32 = arith.constant 0 : i32
    %c0_i32_0 = arith.constant 0 : i32
    %c0_i32_1 = arith.constant 0 : i32
    return %c0_i32, %c0_i32_0 : i32, i32
  }
  func.func @transform_10(%arg0: i32) -> (i32, i32) {
    %c0_i32 = arith.constant 0 : i32
    %c0_i32_0 = arith.constant 0 : i32
    %c0_i32_1 = arith.constant 0 : i32
    return %c0_i32, %c0_i32_0 : i32, i32
  }
  func.func @transform_11(%arg0: i32) -> (i32, i32) {
    %c0_i32 = arith.constant 0 : i32
    %c0_i32_0 = arith.constant 0 : i32
    %c0_i32_1 = arith.constant 0 : i32
    return %c0_i32, %c0_i32_0 : i32, i32
  }
  func.func @transform_12(%arg0: i32) -> (i32, i32) {
    %c0_i32 = arith.constant 0 : i32
    %c0_i32_0 = arith.constant 0 : i32
    %c0_i32_1 = arith.constant 0 : i32
    return %c0_i32, %c0_i32_0 : i32, i32
  }
  func.func @transform_13(%arg0: i32) -> (i32, i32) {
    %c0_i32 = arith.constant 0 : i32
    %c0_i32_0 = arith.constant 0 : i32
    %c0_i32_1 = arith.constant 0 : i32
    return %c0_i32, %c0_i32_0 : i32, i32
  }
  func.func @transform_14(%arg0: i32) -> (i32, i32) {
    %c0_i32 = arith.constant 0 : i32
    %c0_i32_0 = arith.constant 0 : i32
    %c0_i32_1 = arith.constant 0 : i32
    return %c0_i32, %c0_i32_0 : i32, i32
  }
  func.func @transform_15(%arg0: i32) -> (i32, i32) {
    %c0_i32 = arith.constant 0 : i32
    %c0_i32_0 = arith.constant 0 : i32
    return %arg0, %c0_i32 : i32, i32
  }
}

</mosaic_0001>

<bundles_post_ra>
// kernel: opinion_mining3_forward.1
= control target key start
LH: loop header
LB: loop body
LE: loop exit
PB: predicated region body
PF: predicated region fallthrough
CT: control target
= control target key end

     0   :  { %s4328_s0 = inlined_call_operand.vmem [shape: bf16[8,2,128], index: 0, kind: input, shape index: {}]   ;;  %s4329_s1 = inlined_call_operand.vmem [shape: bf16[128,512], index: 1, kind: input, shape index: {}]   ;;  %s4330_s2 = inlined_call_operand.vmem [shape: bf16[128,512], index: 2, kind: input, shape index: {}]   ;;  %s4331_s3 = inlined_call_operand.vmem [shape: f32[1,512], index: 3, kind: input, shape index: {}]   ;;  %s4332_s4 = inlined_call_operand.vmem [shape: bf16[64,192], index: 4, kind: input, shape index: {}]   ;;  %s4333_s5 = inlined_call_operand.vmem [shape: f32[1,192], index: 5, kind: input, shape index: {}]   ;;  %s4334_s6 = inlined_call_operand.vmem [shape: bf16[64,64], index: 6, kind: input, shape index: {}]   ;;  %s4335_s7 = inlined_call_operand.vmem [shape: f32[1,64], index: 7, kind: input, shape index: {}]   ;;  %s4336_s8 = inlined_call_operand.vmem [shape: bf16[64,192], index: 8, kind: input, shape index: {}]   ;;  %s4337_s9 = inlined_call_operand.vmem [shape: f32[1,192], index: 9, kind: input, shape index: {}]   ;;  %s4338_s10 = inlined_call_operand.vmem [shape: bf16[64,64], index: 10, kind: input, shape index: {}]   ;;  %s4339_s11 = inlined_call_operand.vmem [shape: f32[1,64], index: 11, kind: input, shape index: {}]   ;;  %s4340_s12 = inlined_call_operand.vmem [shape: bf16[64,3], index: 12, kind: input, shape index: {}]   ;;  %s4341_s13 = inlined_call_operand.vmem [shape: bf16[64,3], index: 13, kind: input, shape index: {}]   ;;  %s4342_s14 = inlined_call_operand.vmem [shape: f32[1,3], index: 14, kind: input, shape index: {}]   ;;  %s4343_s15 = inlined_call_operand.hbm [shape: f32[2,3], index: 15, kind: output, shape index: {}]  }
   0x1   :  { %v2533_v0 = vld [vmem:[%s4329_s1 + $0xe0] sm:$0xf]  ;;  %v2861_v1 = vld [vmem:[%s4329_s1 + $0xec] sm:$0xf0]  ;;  %v2859_v2 = vld [vmem:[%s4329_s1 + $0xe4] sm:$0xf] }
   0x2   :  { %v2534_v3 = vor.u32 %v2861_v1, %v2533_v0  ;;  %v2535_v4 = vld [vmem:[%s4329_s1 + $0xf0] sm:$0xf0]  ;;  %v2541_v5 = vld [vmem:[%s4329_s1 + $0xe8] sm:$0xf]  ;;  %v2862_v6 = vld [vmem:[%s4329_s1 + $0xf4] sm:$0xf0] }
   0x3   :  { %v2538_v7 = vor.u32 %v2859_v2, %v2535_v4  ;;  %v2542_v8 = vor.u32 %v2862_v6, %v2541_v5  ;;  %v2860_v9 = vld [vmem:[%s4329_s1 + $0xec] sm:$0xf]  ;;  %v2543_v10 = vld [vmem:[%s4329_s1 + $0xf8] sm:$0xf0]  ;;  %v2517_v11 = vld [vmem:[%s4329_s1 + $0xc0] sm:$0xf] }
   0x4   :  { %287 = vmatpush.bf16.msra.mxu0 %v2534_v3  ;;  %v2546_v12 = vor.u32 %v2860_v9, %v2543_v10  ;;  %v2857_v13 = vld [vmem:[%s4329_s1 + $0xcc] sm:$0xf0]  ;;  %v2855_v14 = vld [vmem:[%s4329_s1 + $0xc4] sm:$0xf]  ;;  %v2519_v15 = vld [vmem:[%s4329_s1 + $0xd0] sm:$0xf0] }
   0x5   :  { %301 = vmatpush.bf16.msra.mxu1 %v2538_v7  ;;  %315 = vmatpush.bf16.msra.mxu2 %v2542_v8  ;;  %v2518_v16 = vor.u32 %v2857_v13, %v2517_v11  ;;  %v2522_v17 = vor.u32 %v2855_v14, %v2519_v15  ;;  %v2525_v18 = vld [vmem:[%s4329_s1 + $0xc8] sm:$0xf]  ;;  %v2858_v19 = vld [vmem:[%s4329_s1 + $0xd4] sm:$0xf0]  ;;  %v2856_v20 = vld [vmem:[%s4329_s1 + $0xcc] sm:$0xf] }
   0x6   :  { %329 = vmatpush.bf16.msra.mxu3 %v2546_v12  ;;  %v2526_v21 = vor.u32 %v2858_v19, %v2525_v18  ;;  %v2527_v22 = vld [vmem:[%s4329_s1 + $0xd8] sm:$0xf0]  ;;  %v2501_v23 = vld [vmem:[%s4329_s1 + $0xa0] sm:$0xf]  ;;  %v2853_v24 = vld [vmem:[%s4329_s1 + $0xac] sm:$0xf0] }
   0x7   :  { %v2530_v25 = vor.u32 %v2856_v20, %v2527_v22  ;;  %v2851_v26 = vld [vmem:[%s4329_s1 + $0xa4] sm:$0xf]  ;;  %v2503_v27 = vld [vmem:[%s4329_s1 + $0xb0] sm:$0xf0]  ;;  %v2509_v28 = vld [vmem:[%s4329_s1 + $0xa8] sm:$0xf]  ;;  %v2502_v29 = vor.u32 %v2853_v24, %v2501_v23 }
   0x8   :  { %288 = vmatpush.bf16.msra.mxu0 %v2518_v16  ;;  %v2854_v30 = vld [vmem:[%s4329_s1 + $0xb4] sm:$0xf0]  ;;  %v2852_v31 = vld [vmem:[%s4329_s1 + $0xac] sm:$0xf]  ;;  %v2511_v32 = vld [vmem:[%s4329_s1 + $0xb8] sm:$0xf0]  ;;  %v2506_v33 = vor.u32 %v2851_v26, %v2503_v27 }
   0x9   :  { %302 = vmatpush.bf16.msra.mxu1 %v2522_v17  ;;  %316 = vmatpush.bf16.msra.mxu2 %v2526_v21  ;;  %v2510_v34 = vor.u32 %v2854_v30, %v2509_v28  ;;  %v2485_v35 = vld [vmem:[%s4329_s1 + $0x80] sm:$0xf]  ;;  %v2849_v36 = vld [vmem:[%s4329_s1 + $0x8c] sm:$0xf0]  ;;  %v2847_v37 = vld [vmem:[%s4329_s1 + $0x84] sm:$0xf]  ;;  %v2514_v38 = vor.u32 %v2852_v31, %v2511_v32 }
   0xa   :  { %330 = vmatpush.bf16.msra.mxu3 %v2530_v25  ;;  %v2487_v39 = vld [vmem:[%s4329_s1 + $0x90] sm:$0xf0]  ;;  %v2493_v40 = vld [vmem:[%s4329_s1 + $0x88] sm:$0xf]  ;;  %v2850_v41 = vld [vmem:[%s4329_s1 + $0x94] sm:$0xf0]  ;;  %v2486_v44 = vor.u32 %v2849_v36, %v2485_v35 }
   0xb   :  { %v2848_v42 = vld [vmem:[%s4329_s1 + $0x8c] sm:$0xf]  ;;  %v2495_v43 = vld [vmem:[%s4329_s1 + $0x98] sm:$0xf0]  ;;  %v2490_v45 = vor.u32 %v2847_v37, %v2487_v39  ;;  %v2494_v46 = vor.u32 %v2850_v41, %v2493_v40  ;;  %v2469_v47 = vld [vmem:[%s4329_s1 + $0x60] sm:$0xf] }
   0xc   :  { %289 = vmatpush.bf16.msra.mxu0 %v2502_v29  ;;  %v2845_v48 = vld [vmem:[%s4329_s1 + $0x6c] sm:$0xf0]  ;;  %v2843_v49 = vld [vmem:[%s4329_s1 + $0x64] sm:$0xf]  ;;  %v2498_v50 = vor.u32 %v2848_v42, %v2495_v43  ;;  %v2471_v51 = vld [vmem:[%s4329_s1 + $0x70] sm:$0xf0] }
   0xd   :  { %303 = vmatpush.bf16.msra.mxu1 %v2506_v33  ;;  %317 = vmatpush.bf16.msra.mxu2 %v2510_v34  ;;  %v2477_v52 = vld [vmem:[%s4329_s1 + $0x68] sm:$0xf]  ;;  %v2846_v53 = vld [vmem:[%s4329_s1 + $0x74] sm:$0xf0]  ;;  %v2844_v54 = vld [vmem:[%s4329_s1 + $0x6c] sm:$0xf]  ;;  %v2470_v56 = vor.u32 %v2845_v48, %v2469_v47  ;;  %v2474_v57 = vor.u32 %v2843_v49, %v2471_v51 }
   0xe   :  { %331 = vmatpush.bf16.msra.mxu3 %v2514_v38  ;;  %v2479_v55 = vld [vmem:[%s4329_s1 + $0x78] sm:$0xf0]  ;;  %v2478_v58 = vor.u32 %v2846_v53, %v2477_v52  ;;  %v2453_v59 = vld [vmem:[%s4329_s1 + $0x40] sm:$0xf]  ;;  %v2841_v60 = vld [vmem:[%s4329_s1 + $0x4c] sm:$0xf0] }
   0xf   :  { %v2839_v61 = vld [vmem:[%s4329_s1 + $0x44] sm:$0xf]  ;;  %v2482_v62 = vor.u32 %v2844_v54, %v2479_v55  ;;  %v2455_v63 = vld [vmem:[%s4329_s1 + $0x50] sm:$0xf0]  ;;  %v2461_v0 = vld [vmem:[%s4329_s1 + $0x48] sm:$0xf]  ;;  %v2454_v4 = vor.u32 %v2841_v60, %v2453_v59 }
  0x10   :  { %290 = vmatpush.bf16.msra.mxu0 %v2486_v44  ;;  %v2842_v1 = vld [vmem:[%s4329_s1 + $0x54] sm:$0xf0]  ;;  %v2840_v2 = vld [vmem:[%s4329_s1 + $0x4c] sm:$0xf]  ;;  %v2463_v3 = vld [vmem:[%s4329_s1 + $0x58] sm:$0xf0]  ;;  %v2458_v6 = vor.u32 %v2839_v61, %v2455_v63 }
  0x11   :  { %304 = vmatpush.bf16.msra.mxu1 %v2490_v45  ;;  %318 = vmatpush.bf16.msra.mxu2 %v2494_v46  ;;  %v2437_v5 = vld [vmem:[%s4329_s1 + $0x20] sm:$0xf]  ;;  %v2462_v7 = vor.u32 %v2842_v1, %v2461_v0  ;;  %v2837_v8 = vld [vmem:[%s4329_s1 + $0x2c] sm:$0xf0]  ;;  %v2835_v9 = vld [vmem:[%s4329_s1 + $0x24] sm:$0xf]  ;;  %v2466_v11 = vor.u32 %v2840_v2, %v2463_v3 }
  0x12   :  { %332 = vmatpush.bf16.msra.mxu3 %v2498_v50  ;;  %v2439_v10 = vld [vmem:[%s4329_s1 + $0x30] sm:$0xf0]  ;;  %v2445_v12 = vld [vmem:[%s4329_s1 + $0x28] sm:$0xf]  ;;  %v2838_v13 = vld [vmem:[%s4329_s1 + $0x34] sm:$0xf0]  ;;  %v2438_v18 = vor.u32 %v2837_v8, %v2437_v5 }
  0x13   :  { %v2836_v14 = vld [vmem:[%s4329_s1 + $0x2c] sm:$0xf]  ;;  %v2447_v15 = vld [vmem:[%s4329_s1 + $0x38] sm:$0xf0]  ;;  %v2421_v16 = vld [vmem:[%s4329_s1] sm:$0xf]  ;;  %v2442_v23 = vor.u32 %v2835_v9, %v2439_v10  ;;  %v2446_v24 = vor.u32 %v2838_v13, %v2445_v12 }
  0x14   :  { %291 = vmatpush.bf16.msra.mxu0 %v2470_v56  ;;  %v2833_v17 = vld [vmem:[%s4329_s1 + $0xc] sm:$0xf0]  ;;  %v2831_v19 = vld [vmem:[%s4329_s1 + $0x4] sm:$0xf]  ;;  %v2423_v20 = vld [vmem:[%s4329_s1 + $0x10] sm:$0xf0]  ;;  %v2450_v28 = vor.u32 %v2836_v14, %v2447_v15 }
  0x15   :  { %305 = vmatpush.bf16.msra.mxu1 %v2474_v57  ;;  %319 = vmatpush.bf16.msra.mxu2 %v2478_v58  ;;  %v2429_v21 = vld [vmem:[%s4329_s1 + $0x8] sm:$0xf]  ;;  %v2834_v22 = vld [vmem:[%s4329_s1 + $0x14] sm:$0xf0]  ;;  %v2832_v25 = vld [vmem:[%s4329_s1 + $0xc] sm:$0xf]  ;;  %v2422_v35 = vor.u32 %v2833_v17, %v2421_v16  ;;  %v2426_v39 = vor.u32 %v2831_v19, %v2423_v20 }
  0x16   :  { %333 = vmatpush.bf16.msra.mxu3 %v2482_v62  ;;  %v2431_v26 = vld [vmem:[%s4329_s1 + $0x18] sm:$0xf0]  ;;  %v2661_v27 = vld [vmem:[%s4330_s2 + $0xe0] sm:$0xf]  ;;  %v2893_v29 = vld [vmem:[%s4330_s2 + $0xec] sm:$0xf0]  ;;  %v2430_v40 = vor.u32 %v2834_v22, %v2429_v21 }
  0x17   :  { %v2891_v30 = vld [vmem:[%s4330_s2 + $0xe4] sm:$0xf]  ;;  %v2663_v31 = vld [vmem:[%s4330_s2 + $0xf0] sm:$0xf0]  ;;  %v2669_v32 = vld [vmem:[%s4330_s2 + $0xe8] sm:$0xf]  ;;  %v2434_v44 = vor.u32 %v2832_v25, %v2431_v26  ;;  %v3389_v45 = vor.u32 %v2893_v29, %v2661_v27 }
  0x18   :  { %292 = vmatpush.bf16.msra.mxu0 %v2454_v4  ;;  %v2894_v33 = vld [vmem:[%s4330_s2 + $0xf4] sm:$0xf0]  ;;  %v52_v34 = vld [vmem:[%s4328_s0] sm:$0x1]  ;;  %v2892_v36 = vld [vmem:[%s4330_s2 + $0xec] sm:$0xf]  ;;  %v3406_v51 = vor.u32 %v2891_v30, %v2663_v31 }
  0x19   :  { %306 = vmatpush.bf16.msra.mxu1 %v2458_v6  ;;  %320 = vmatpush.bf16.msra.mxu2 %v2462_v7  ;;  %v2671_v37 = vld [vmem:[%s4330_s2 + $0xf8] sm:$0xf0]  ;;  %v53_v38 = vld [vmem:[%s4328_s0 + $0x1] sm:$0x1]  ;;  %v2889_v42 = vld [vmem:[%s4330_s2 + $0xcc] sm:$0xf0]  ;;  %v3408_v52 = vor.u32 %v2894_v33, %v2669_v32 }
  0x1a   :  { %334 = vmatpush.bf16.msra.mxu3 %v2466_v11  ;;  %v2645_v41 = vld [vmem:[%s4330_s2 + $0xc0] sm:$0xf]  ;;  %v2887_v46 = vld [vmem:[%s4330_s2 + $0xc4] sm:$0xf]  ;;  %v2647_v47 = vld [vmem:[%s4330_s2 + $0xd0] sm:$0xf0]  ;;  %v3416_v55 = vor.u32 %v2892_v36, %v2671_v37 }
  0x1b   :  { %v54_v43 = vld [vmem:[%s4328_s0 + $0x2] sm:$0x1]  ;;  %v2653_v48 = vld [vmem:[%s4330_s2 + $0xc8] sm:$0xf]  ;;  %v2890_v49 = vld [vmem:[%s4330_s2 + $0xd4] sm:$0xf0]  ;;  %v3431_v60 = vor.u32 %v2889_v42, %v2645_v41  ;;  %v3441_v63 = vor.u32 %v2887_v46, %v2647_v47 }
  0x1c   :  { %293 = vmatpush.bf16.msra.mxu0 %v2438_v18  ;;  %v55_v50 = vld [vmem:[%s4328_s0 + $0x3] sm:$0x1]  ;;  %103 = vst [vmem:[#allocation1] ss:$9 sm:$0xff] %v52_v34  ;;  %v2888_v53 = vld [vmem:[%s4330_s2 + $0xcc] sm:$0xf]  ;;  %v3443_v0 = vor.u32 %v2890_v49, %v2653_v48 }
  0x1d   :  { %307 = vmatpush.bf16.msra.mxu1 %v2442_v23  ;;  %321 = vmatpush.bf16.msra.mxu2 %v2446_v24  ;;  %v56_v54 = vld [vmem:[%s4328_s0 + $0x4] sm:$0x1]  ;;  %106 = vst [vmem:[#allocation1 + $0x1] ss:$9 sm:$0xff] %v53_v38  ;;  %v2655_v56 = vld [vmem:[%s4330_s2 + $0xd8] sm:$0xf0] }
  0x1e   :  { %335 = vmatpush.bf16.msra.mxu3 %v2450_v28  ;;  %v57_v57 = vld [vmem:[%s4328_s0 + $0x5] sm:$0x1]  ;;  %109 = vst [vmem:[#allocation1 + $0x2] ss:$9 sm:$0xff] %v54_v43  ;;  %v58_v58 = vld [vmem:[%s4328_s0 + $0x6] sm:$0x1]  ;;  %v3452_v3 = vor.u32 %v2888_v53, %v2655_v56 }
  0x1f   :  { %v59_v59 = vld [vmem:[%s4328_s0 + $0x7] sm:$0x1]  ;;  %112 = vst [vmem:[#allocation1 + $0x3] ss:$9 sm:$0xff] %v55_v50  ;;  %v2629_v61 = vld [vmem:[%s4330_s2 + $0xa0] sm:$0xf] }
  0x20   :  { %294 = vmatpush.bf16.msra.mxu0 %v2422_v35  ;;  %115 = vst [vmem:[#allocation1 + $0x4] ss:$9 sm:$0xff] %v56_v54  ;;  %v2885_v62 = vld [vmem:[%s4330_s2 + $0xac] sm:$0xf0]  ;;  %v2883_v1 = vld [vmem:[%s4330_s2 + $0xa4] sm:$0xf] }
  0x21   :  { %308 = vmatpush.bf16.msra.mxu1 %v2426_v39  ;;  %322 = vmatpush.bf16.msra.mxu2 %v2430_v40  ;;  %118 = vst [vmem:[#allocation1 + $0x5] ss:$9 sm:$0xff] %v57_v57  ;;  %v2631_v2 = vld [vmem:[%s4330_s2 + $0xb0] sm:$0xf0]  ;;  %v2637_v4 = vld [vmem:[%s4330_s2 + $0xa8] sm:$0xf]  ;;  %v3467_v8 = vor.u32 %v2885_v62, %v2629_v61 }
  0x22   :  { %336 = vmatpush.bf16.msra.mxu3 %v2434_v44  ;;  %121 = vst [vmem:[#allocation1 + $0x6] ss:$9 sm:$0xff] %v58_v58  ;;  %v2886_v5 = vld [vmem:[%s4330_s2 + $0xb4] sm:$0xf0]  ;;  %v2884_v6 = vld [vmem:[%s4330_s2 + $0xac] sm:$0xf]  ;;  %v3471_v9 = vor.u32 %v2883_v1, %v2631_v2 }
  0x23   :  { %124 = vst [vmem:[#allocation1 + $0x7] ss:$9 sm:$0xff] %v59_v59  ;;  %v2639_v7 = vld [vmem:[%s4330_s2 + $0xb8] sm:$0xf0]  ;;  %v3473_v10 = vor.u32 %v2886_v5, %v2637_v4  ;;  %v2613_v11 = vld [vmem:[%s4330_s2 + $0x80] sm:$0xf] }
  0x24   :  { %593 = vmatpush.bf16.msrb.mxu0 %v3389_v45  ;;  %v2881_v12 = vld [vmem:[%s4330_s2 + $0x8c] sm:$0xf0]  ;;  %v2879_v13 = vld [vmem:[%s4330_s2 + $0x84] sm:$0xf]  ;;  %v3485_v14 = vor.u32 %v2884_v6, %v2639_v7  ;;  %v2615_v15 = vld [vmem:[%s4330_s2 + $0x90] sm:$0xf0] }
  0x25   :  { %606 = vmatpush.bf16.msrb.mxu1 %v3406_v51  ;;  %619 = vmatpush.bf16.msrb.mxu2 %v3408_v52  ;;  %v2621_v16 = vld [vmem:[%s4330_s2 + $0x88] sm:$0xf]  ;;  %v2882_v17 = vld [vmem:[%s4330_s2 + $0x94] sm:$0xf0]  ;;  %v2880_v18 = vld [vmem:[%s4330_s2 + $0x8c] sm:$0xf]  ;;  %v3503_v20 = vor.u32 %v2881_v12, %v2613_v11  ;;  %v3510_v22 = vor.u32 %v2879_v13, %v2615_v15 }
  0x26   :  { %632 = vmatpush.bf16.msrb.mxu3 %v3416_v55  ;;  %v2623_v19 = vld [vmem:[%s4330_s2 + $0x98] sm:$0xf0]  ;;  %v2597_v21 = vld [vmem:[%s4330_s2 + $0x60] sm:$0xf]  ;;  %v3512_v23 = vor.u32 %v2882_v17, %v2621_v16  ;;  %v2877_v24 = vld [vmem:[%s4330_s2 + $0x6c] sm:$0xf0] }
  0x27   :  { %v2875_v25 = vld [vmem:[%s4330_s2 + $0x64] sm:$0xf]  ;;  %v2599_v26 = vld [vmem:[%s4330_s2 + $0x70] sm:$0xf0]  ;;  %v3524_v28 = vor.u32 %v2880_v18, %v2623_v19  ;;  %v2605_v29 = vld [vmem:[%s4330_s2 + $0x68] sm:$0xf]  ;;  %v3539_v33 = vor.u32 %v2877_v24, %v2597_v21 }
  0x28   :  { %594 = vmatpush.bf16.msrb.mxu0 %v3431_v60  ;;  %v2878_v30 = vld [vmem:[%s4330_s2 + $0x74] sm:$0xf0]  ;;  %v2876_v31 = vld [vmem:[%s4330_s2 + $0x6c] sm:$0xf]  ;;  %v2607_v32 = vld [vmem:[%s4330_s2 + $0x78] sm:$0xf0]  ;;  %v3543_v34 = vor.u32 %v2875_v25, %v2599_v26 }
  0x29   :  { %607 = vmatpush.bf16.msrb.mxu1 %v3441_v63  ;;  %620 = vmatpush.bf16.msrb.mxu2 %v3443_v0  ;;  %v3545_v35 = vor.u32 %v2878_v30, %v2605_v29  ;;  %v2581_v36 = vld [vmem:[%s4330_s2 + $0x40] sm:$0xf]  ;;  %v2873_v37 = vld [vmem:[%s4330_s2 + $0x4c] sm:$0xf0]  ;;  %v2871_v38 = vld [vmem:[%s4330_s2 + $0x44] sm:$0xf]  ;;  %v3557_v39 = vor.u32 %v2876_v31, %v2607_v32 }
  0x2a   :  { %633 = vmatpush.bf16.msrb.mxu3 %v3452_v3  ;;  %v125_v27 = vld [vmem:[#allocation1] sm:$0xff]  ;;  %v2583_v40 = vld [vmem:[%s4330_s2 + $0x50] sm:$0xf0]  ;;  %v2589_v41 = vld [vmem:[%s4330_s2 + $0x48] sm:$0xf]  ;;  %v3575_v46 = vor.u32 %v2873_v37, %v2581_v36 }
  0x2b   :  { %323 = vmatmul.bf16.vlgmr.msra.gmra.mxu2 %v125_v27  ;;  %337 = vmatmul.bf16.vlgmr.msra.gmra.mxu3 %v125_v27  ;;  %v2874_v42 = vld [vmem:[%s4330_s2 + $0x54] sm:$0xf0]  ;;  %v2872_v43 = vld [vmem:[%s4330_s2 + $0x4c] sm:$0xf]  ;;  %v2591_v44 = vld [vmem:[%s4330_s2 + $0x58] sm:$0xf0] }
  0x2c   :  { %595 = vmatpush.bf16.msrb.mxu0 %v3467_v8  ;;  %309 = vmatmul.bf16.vlgmr.msra.gmra.mxu1 %v125_v27 }
  0x2d   :  { %608 = vmatpush.bf16.msrb.mxu1 %v3471_v9  ;;  %621 = vmatpush.bf16.msrb.mxu2 %v3473_v10 }
  0x2e   :  { %634 = vmatpush.bf16.msrb.mxu3 %v3485_v14  ;;  %295 = vmatmul.bf16.vlgmr.msra.gmra.mxu0 %v125_v27 }
  0x30   :  { %596 = vmatpush.bf16.msrb.mxu0 %v3503_v20 }
  0x31   :  { %609 = vmatpush.bf16.msrb.mxu1 %v3510_v22  ;;  %622 = vmatpush.bf16.msrb.mxu2 %v3512_v23 }
  0x32   :  { %635 = vmatpush.bf16.msrb.mxu3 %v3524_v28 }
  0x34   :  { %597 = vmatpush.bf16.msrb.mxu0 %v3539_v33 }
  0x35   :  { %20 = vsyncpa [#allocation4], 0  ;;  %610 = vmatpush.bf16.msrb.mxu1 %v3543_v34  ;;  %623 = vmatpush.bf16.msrb.mxu2 %v3545_v35  ;;  %v3579_v47 = vor.u32 %v2871_v38, %v2583_v40  ;;  %v3581_v48 = vor.u32 %v2874_v42, %v2589_v41  ;;  %v2565_v49 = vld [vmem:[%s4330_s2 + $0x20] sm:$0xf]  ;;  %v2869_v50 = vld [vmem:[%s4330_s2 + $0x2c] sm:$0xf0]  ;;  %v3593_v54 = vor.u32 %v2872_v43, %v2591_v44 }
  0x36   :  { %v2867_v53 = vld [vmem:[%s4330_s2 + $0x24] sm:$0xf]  ;;  %636 = vmatpush.bf16.msrb.mxu3 %v3557_v39  ;;  %v2567_v56 = vld [vmem:[%s4330_s2 + $0x30] sm:$0xf0]  ;;  %v2573_v57 = vld [vmem:[%s4330_s2 + $0x28] sm:$0xf]  ;;  %v3611_v62 = vor.u32 %v2869_v50, %v2565_v49 }
  0x37   :  { %v2870_v58 = vld [vmem:[%s4330_s2 + $0x34] sm:$0xf0]  ;;  %v2868_v59 = vld [vmem:[%s4330_s2 + $0x2c] sm:$0xf]  ;;  %v2575_v61 = vld [vmem:[%s4330_s2 + $0x38] sm:$0xf0]  ;;  %v3615_v1 = vor.u32 %v2867_v53, %v2567_v56 }
  0x38   :  { %598 = vmatpush.bf16.msrb.mxu0 %v3575_v46  ;;  %v3617_v2 = vor.u32 %v2870_v58, %v2573_v57  ;;  %v2549_v4 = vld [vmem:[%s4330_s2] sm:$0xf]  ;;  %v2865_v5 = vld [vmem:[%s4330_s2 + $0xc] sm:$0xf0]  ;;  %v2863_v6 = vld [vmem:[%s4330_s2 + $0x4] sm:$0xf]  ;;  %v3629_v7 = vor.u32 %v2868_v59, %v2575_v61 }
  0x39   :  { %611 = vmatpush.bf16.msrb.mxu1 %v3579_v47  ;;  %624 = vmatpush.bf16.msrb.mxu2 %v3581_v48  ;;  %v2551_v11 = vld [vmem:[%s4330_s2 + $0x10] sm:$0xf0]  ;;  %v2557_v12 = vld [vmem:[%s4330_s2 + $0x8] sm:$0xf]  ;;  %v2866_v13 = vld [vmem:[%s4330_s2 + $0x14] sm:$0xf0]  ;;  %v3647_v17 = vor.u32 %v2865_v5, %v2549_v4 }
  0x3a   :  { %637 = vmatpush.bf16.msrb.mxu3 %v3593_v54  ;;  %v2864_v15 = vld [vmem:[%s4330_s2 + $0xc] sm:$0xf]  ;;  %v2559_v16 = vld [vmem:[%s4330_s2 + $0x18] sm:$0xf0]  ;;  %v3651_v18 = vor.u32 %v2863_v6, %v2551_v11  ;;  %v3653_v19 = vor.u32 %v2866_v13, %v2557_v12  ;;  %v3072_v24 = vmov 0   ;;  %vm359_vm0 = vcmask 1045508  }
  0x3b   :  { %v3656_v21 = vor.u32 %v2864_v15, %v2559_v16  ;;  %v92_v25 = vld [vmem:[%s4331_s3] sm:$0xf]  ;;  %vm363_vm1 = vcmask 1043458   ;;  %vm365_vm2 = vcmask 1045504   ;;  %vm357_vm3 = vcmask 1041408   ;;  %s3073_s3 = smov 64  }
  0x3c   :  { %599 = vmatpush.bf16.msrb.mxu0 %v3611_v62  ;;  %v95_v26 = vperm.slane %v92_v25, 1  ;;  %v94_v27 = vperm.slane %v92_v25, 0  ;;  %v96_v31 = vperm.slane %v92_v25, 2  ;;  %v97_v32 = vperm.slane %v92_v25, 3  ;;  %s3074_s21 = smov 32   ;;  %s3075_s22 = smov 96  }
  0x3d   :  { %612 = vmatpush.bf16.msrb.mxu1 %v3615_v1  ;;  %625 = vmatpush.bf16.msrb.mxu2 %v3617_v2  ;;  %vm367_vm4 = vcmask 1045506   ;;  %vm361_vm5 = vcmask 1043456   ;;  %vm695_vm10 = vcmask 1040384   ;;  %vm697_vm11 = vcmask 1042434   ;;  %s2410_s23 = sshll.u32 %s4343_s15, 4  ;;  %s2411_s23 = int_to_ptr.hbm [resolvable:$true] %s2410_s23 }
  0x3e   :  { %638 = vmatpush.bf16.msrb.mxu3 %v3629_v7  ;;  %vm700_vm12 = vcmask 1041409   ;;  %vm702_vm13 = vcmask 1043459   ;;  %vm704_vm14 = vcmask 1042433  }
  0x40   :  { %600 = vmatpush.bf16.msrb.mxu0 %v3647_v17 }
  0x41   :  { %613 = vmatpush.bf16.msrb.mxu1 %v3651_v18  ;;  %626 = vmatpush.bf16.msrb.mxu2 %v3653_v19 }
  0x42   :  { %639 = vmatpush.bf16.msrb.mxu3 %v3656_v21 }
  0x43   :  { %601 = vmatmul.bf16.vlgmr.msrb.gmra.mxu0 %v3072_v24 }
  0x44   :  { %712 = vmatpush.bf16.msra.mxu0 %v3389_v45  ;;  %614 = vmatmul.bf16.vlgmr.msrb.gmra.mxu1 %v3072_v24 }
  0x45   :  { %725 = vmatpush.bf16.msra.mxu1 %v3406_v51  ;;  %627 = vmatmul.bf16.vlgmr.msrb.gmra.mxu2 %v3072_v24 }
  0x46   :  { %640 = vmatmul.bf16.vlgmr.msrb.gmra.mxu3 %v3072_v24  ;;  %738 = vmatpush.bf16.msra.mxu2 %v3408_v52 }
  0x47   :  { %751 = vmatpush.bf16.msra.mxu3 %v3416_v55 }
  0x48   :  { %713 = vmatpush.bf16.msra.mxu0 %v3431_v60 }
  0x49   :  { %726 = vmatpush.bf16.msra.mxu1 %v3441_v63 }
  0x4a   :  { %739 = vmatpush.bf16.msra.mxu2 %v3443_v0 }
  0x4b   :  { %752 = vmatpush.bf16.msra.mxu3 %v3452_v3 }
  0x4c   :  { %714 = vmatpush.bf16.msra.mxu0 %v3467_v8 }
  0x4d   :  { %727 = vmatpush.bf16.msra.mxu1 %v3471_v9 }
  0x4e   :  { %740 = vmatpush.bf16.msra.mxu2 %v3473_v10 }
  0x4f   :  { %753 = vmatpush.bf16.msra.mxu3 %v3485_v14 }
  0x50   :  { %715 = vmatpush.bf16.msra.mxu0 %v3503_v20 }
  0x51   :  { %728 = vmatpush.bf16.msra.mxu1 %v3510_v22 }
  0x52   :  { %741 = vmatpush.bf16.msra.mxu2 %v3512_v23 }
  0x53   :  { %754 = vmatpush.bf16.msra.mxu3 %v3524_v28 }
  0x54   :  { %716 = vmatpush.bf16.msra.mxu0 %v3539_v33 }
  0x55   :  { %729 = vmatpush.bf16.msra.mxu1 %v3543_v34 }
  0x56   :  { %742 = vmatpush.bf16.msra.mxu2 %v3545_v35 }
  0x57   :  { %755 = vmatpush.bf16.msra.mxu3 %v3557_v39 }
  0x58   :  { %717 = vmatpush.bf16.msra.mxu0 %v3575_v46 }
  0x59   :  { %730 = vmatpush.bf16.msra.mxu1 %v3579_v47 }
  0x5a   :  { %743 = vmatpush.bf16.msra.mxu2 %v3581_v48 }
  0x5b   :  { %756 = vmatpush.bf16.msra.mxu3 %v3593_v54 }
  0x5c   :  { %718 = vmatpush.bf16.msra.mxu0 %v3611_v62 }
  0x5d   :  { %731 = vmatpush.bf16.msra.mxu1 %v3615_v1 }
  0x5e   :  { %744 = vmatpush.bf16.msra.mxu2 %v3617_v2 }
  0x5f   :  { %757 = vmatpush.bf16.msra.mxu3 %v3629_v7 }
  0x60   :  { %719 = vmatpush.bf16.msra.mxu0 %v3647_v17 }
  0x61   :  { %732 = vmatpush.bf16.msra.mxu1 %v3651_v18 }
  0x62   :  { %745 = vmatpush.bf16.msra.mxu2 %v3653_v19 }
  0x63   :  { %758 = vmatpush.bf16.msra.mxu3 %v3656_v21 }
  0x64   :  { %826 = vmatpush.bf16.msrb.mxu0 %v3389_v45 }
  0x65   :  { %839 = vmatpush.bf16.msrb.mxu1 %v3406_v51 }
  0x66   :  { %852 = vmatpush.bf16.msrb.mxu2 %v3408_v52 }
  0x67   :  { %865 = vmatpush.bf16.msrb.mxu3 %v3416_v55 }
  0x68   :  { %827 = vmatpush.bf16.msrb.mxu0 %v3431_v60 }
  0x69   :  { %840 = vmatpush.bf16.msrb.mxu1 %v3441_v63 }
  0x6a   :  { %853 = vmatpush.bf16.msrb.mxu2 %v3443_v0 }
  0x6b   :  { %866 = vmatpush.bf16.msrb.mxu3 %v3452_v3 }
  0x6c   :  { %828 = vmatpush.bf16.msrb.mxu0 %v3467_v8 }
  0x6d   :  { %841 = vmatpush.bf16.msrb.mxu1 %v3471_v9 }
  0x6e   :  { %854 = vmatpush.bf16.msrb.mxu2 %v3473_v10 }
  0x6f   :  { %867 = vmatpush.bf16.msrb.mxu3 %v3485_v14 }
  0x70   :  { %829 = vmatpush.bf16.msrb.mxu0 %v3503_v20 }
  0x71   :  { %842 = vmatpush.bf16.msrb.mxu1 %v3510_v22 }
  0x72   :  { %855 = vmatpush.bf16.msrb.mxu2 %v3512_v23 }
  0x73   :  { %868 = vmatpush.bf16.msrb.mxu3 %v3524_v28 }
  0x74   :  { %830 = vmatpush.bf16.msrb.mxu0 %v3539_v33 }
  0x75   :  { %843 = vmatpush.bf16.msrb.mxu1 %v3543_v34 }
  0x76   :  { %856 = vmatpush.bf16.msrb.mxu2 %v3545_v35 }
  0x77   :  { %869 = vmatpush.bf16.msrb.mxu3 %v3557_v39 }
  0x78   :  { %831 = vmatpush.bf16.msrb.mxu0 %v3575_v46 }
  0x79   :  { %844 = vmatpush.bf16.msrb.mxu1 %v3579_v47 }
  0x7a   :  { %857 = vmatpush.bf16.msrb.mxu2 %v3581_v48 }
  0x7b   :  { %870 = vmatpush.bf16.msrb.mxu3 %v3593_v54 }
  0x7c   :  { %832 = vmatpush.bf16.msrb.mxu0 %v3611_v62 }
  0x7d   :  { %845 = vmatpush.bf16.msrb.mxu1 %v3615_v1 }
  0x7e   :  { %858 = vmatpush.bf16.msrb.mxu2 %v3617_v2 }
  0x7f   :  { %871 = vmatpush.bf16.msrb.mxu3 %v3629_v7 }
  0x80   :  { %833 = vmatpush.bf16.msrb.mxu0 %v3647_v17 }
  0x81   :  { %846 = vmatpush.bf16.msrb.mxu1 %v3651_v18 }
  0x82   :  { %859 = vmatpush.bf16.msrb.mxu2 %v3653_v19 }
  0x83   :  { %872 = vmatpush.bf16.msrb.mxu3 %v3656_v21 }
  0xa9   :  { %v310_v29 = vpop.f32.mrf.mxu1 }
  0xaa   :  { %v311_v30 = vadd.f32 %v310_v29, %v95_v26 }
  0xab   :  { %v296_v36 = vpop.f32.mrf.mxu0 }
  0xac   :  { %v351_v37 = vrot.slane %v311_v30, 6  ;;  %v297_v38 = vadd.f32 %v296_v36, %v94_v27 }
  0xae   :  { %v324_v40 = vpop.f32.mrf.mxu2  ;;  %v338_v41 = vpop.f32.mrf.mxu3  ;;  %v364_v42 = vsel %vm363_vm1, %v297_v38, %v351_v37  ;;  %v370_v43 = vsel %vm359_vm0, %v297_v38, %v351_v37  ;;  %v374_v44 = vsel %vm365_vm2, %v351_v37, %v297_v38 }
  0xaf   :  { %v325_v49 = vadd.f32 %v324_v40, %v96_v31  ;;  %v339_v50 = vadd.f32 %v338_v41, %v97_v32 }
  0xb1   :  { %v352_v53 = vrot.slane %v325_v49, 4  ;;  %v353_v56 = vrot.slane %v339_v50, 2  ;;  %v312_v57 = vpop.f32.mrf.mxu1 }
  0xb2   :  { %v313_v58 = vadd.f32 %v312_v57, %v95_v26 }
  0xb3   :  { %v366_v59 = vsel %vm365_vm2, %v353_v56, %v352_v53  ;;  %v371_v61 = vsel %vm357_vm3, %v352_v53, %v353_v56  ;;  %v375_v4 = vsel %vm363_vm1, %v352_v53, %v353_v56  ;;  %v298_v5 = vpop.f32.mrf.mxu0 }
  0xb4   :  { %v354_v6 = vrot.slane %v313_v58, 6  ;;  %v299_v11 = vadd.f32 %v298_v5, %v94_v27  ;;  %v3740_v12 = vsel %vm367_vm4, %v364_v42, %v366_v59  ;;  %v3743_v13 = vsel %vm361_vm5, %v371_v61, %v370_v43 }
  0xb5   :  { %v3746_v15 = vsel %vm367_vm4, %v375_v4, %v374_v44 }
  0xb6   :  { %v326_v16 = vpop.f32.mrf.mxu2  ;;  %v340_v25 = vpop.f32.mrf.mxu3  ;;  %v378_v26 = vsel %vm357_vm3, %v299_v11, %v354_v6  ;;  %v381_v29 = vsel %vm363_vm1, %v299_v11, %v354_v6  ;;  %v385_v30 = vsel %vm359_vm0, %v299_v11, %v354_v6  ;;  %v389_v36 = vsel %vm365_vm2, %v354_v6, %v299_v11 }
  0xb7   :  { %v327_v27 = vadd.f32 %v326_v16, %v96_v31  ;;  %v341_v40 = vadd.f32 %v340_v25, %v97_v32  ;;  %v360_v25 = vsel %vm359_vm0, %v352_v53, %v353_v56 }
  0xb9   :  { %v355_v41 = vrot.slane %v327_v27, 4  ;;  %v356_v42 = vrot.slane %v341_v40, 2 }
  0xbb   :  { %v379_v43 = vsel %vm359_vm0, %v355_v41, %v356_v42  ;;  %v382_v49 = vsel %vm365_vm2, %v356_v42, %v355_v41  ;;  %v386_v44 = vsel %vm357_vm3, %v355_v41, %v356_v42  ;;  %v390_v50 = vsel %vm363_vm1, %v355_v41, %v356_v42 }
  0xbc   :  { %v3757_v58 = vsel %vm361_vm5, %v378_v26, %v379_v43  ;;  %v3760_v59 = vsel %vm367_vm4, %v381_v29, %v382_v49  ;;  %v3763_v31 = vsel %vm361_vm5, %v386_v44, %v385_v30  ;;  %v3766_v32 = vsel %vm367_vm4, %v390_v50, %v389_v36 }
  0xbd   :  { %v358_v26 = vsel %vm357_vm3, %v297_v38, %v351_v37 }
  0xbe   :  { %v362_v41 = vsel %vm361_vm5, %v358_v26, %v360_v25 }
  0xc0   :  { %v602_v57 = vpop.f32.mrf.mxu0 }
  0xc1   :  { %v615_v61 = vpop.f32.mrf.mxu1 }
  0xc2   :  { %v649_v4 = vrot.slane %v615_v61, 6 }
  0xc4   :  { %v652_v27 = vsel %vm357_vm3, %v602_v57, %v649_v4 }
  0xc8   :  { %v628_v5 = vpop.f32.mrf.mxu2  ;;  %v604_v16 = vpop.f32.mrf.mxu0 }
  0xc9   :  { %v650_v6 = vrot.slane %v628_v5, 4  ;;  %v641_v11 = vpop.f32.mrf.mxu3  ;;  %v617_v40 = vpop.f32.mrf.mxu1 }
  0xca   :  { %v651_v29 = vrot.slane %v641_v11, 2 }
  0xcc   :  { %v653_v30 = vsel %vm359_vm0, %v650_v6, %v651_v29 }
  0xcd   :  { %v654_v36 = vsel %vm361_vm5, %v652_v27, %v653_v30 }
  0xce   :  { %v656_v42 = vadd.f32 %v654_v36, %v362_v41 }
  0xd0   :  { %v2675_v43 = vmul.f32 -1.442695, %v656_v42  ;;  %v630_v49 = vpop.f32.mrf.mxu2  ;;  %v677_v38 = vrot.slane %v656_v42, 6 }
  0xd1   :  { %v643_v44 = vpop.f32.mrf.mxu3 }
  0xd2   :  { %2944 = vpow2.f32 %v2675_v43 }
  0xd8   :  { %v2945_v50 = vpop.eup %2944 }
  0xd9   :  { %v660_v61 = vadd.f32 1.0, %v2945_v50 }
  0xdb   :  { %2946 = vrcp.f32 %v660_v61  ;;  %v672_v57 = vand.u32 2147483648, %v660_v61  ;;  %v670_v5 = vand.u32 2147483647, %v660_v61  ;;  %vm666_vm7 = vweird.f32 %v660_v61 }
  0xdc   :  { %2948 = vtanh.f32 %v677_v38 }
  0xdd   :  { %v673_v11 = vor.u32 1.1754944e-38, %v672_v57  ;;  %vm671_vm9 = vcmp.eq.f32.partialorder %v670_v5, 8.507059e+37 }
  0xe1   :  { %v2947_v53 = vpop.eup %2946 }
  0xe2   :  { %v662_v37 = vmul.f32 %v2947_v53, %v660_v61  ;;  %vm667_vm6 = vweird.f32 %v2947_v53  ;;  %v2949_v27 = vpop.eup %2948 }
  0xe3   :  { %vm668_vm8 = vmor %vm666_vm7, %vm667_vm6 }
  0xe4   :  { %v663_v56 = vsub.f32 1.0, %v662_v37 }
  0xe6   :  { %v664_v4 = vmul.f32 %v2947_v53, %v663_v56 }
  0xe8   :  { %v665_v6 = vadd.f32 %v2947_v53, %v664_v4 }
  0xea   :  { %v669_v16 = vsel %vm668_vm8, %v2947_v53, %v665_v6 }
  0xeb   :  { %v674_v25 = vsel %vm671_vm9, %v673_v11, %v669_v16 }
  0xec   :  { %v681_v26 = vrot.slane %v674_v25, 2  ;;  %v684_v40 = vmul.f32 %v2949_v27, %v674_v25  ;;  %v687_v41 = vrot.slane %v674_v25, 4 }
  0xee   :  { %v683_v29 = vmul.f32 0.0, %v681_v26 }
  0xf0   :  { %v3774_v30 = vadd.f32 %v684_v40, %v683_v29 }
  0xf2   :  { %2950 = vtanh.f32 %v3774_v30 }
  0xf8   :  { %v2951_v36 = vpop.eup %2950 }
  0xf9   :  { %v689_v42 = vmul.f32 %v2951_v36, %v687_v41 }
  0xfb   :  { %2952 = vtanh.f32 %v689_v42  ;;  %v711_v43 = vpack.c.bf16 %v689_v42, %v689_v42  ;;  %v369_v42 = vrot.slane %v3740_v12, 2 }
  0xfd   :  { %720 = vmatmul.bf16.vlgmr.msra.gmra.mxu0 %v711_v43  ;;  %733 = vmatmul.bf16.vlgmr.msra.gmra.mxu1 %v711_v43 }
  0xfe   :  { %746 = vmatmul.bf16.vlgmr.msra.gmra.mxu2 %v711_v43  ;;  %759 = vmatmul.bf16.vlgmr.msra.gmra.mxu3 %v711_v43 }
  0xff   :  { %940 = vmatpush.bf16.msra.mxu0 %v3389_v45  ;;  %953 = vmatpush.bf16.msra.mxu1 %v3406_v51 }
 0x100   :  { %966 = vmatpush.bf16.msra.mxu2 %v3408_v52  ;;  %979 = vmatpush.bf16.msra.mxu3 %v3416_v55 }
 0x101   :  { %v2953_v49 = vpop.eup %2952 }
 0x102   :  { %v692_v44 = vrot.slane %v2953_v49, 1  ;;  %v693_v50 = vrot.slane %v2953_v49, 2  ;;  %v694_v61 = vrot.slane %v2953_v49, 3 }
 0x103   :  { %941 = vmatpush.bf16.msra.mxu0 %v3431_v60  ;;  %954 = vmatpush.bf16.msra.mxu1 %v3441_v63 }
 0x104   :  { %967 = vmatpush.bf16.msra.mxu2 %v3443_v0  ;;  %980 = vmatpush.bf16.msra.mxu3 %v3452_v3  ;;  %v696_v53 = vsel %vm695_vm10, %v2953_v49, %v692_v44  ;;  %v698_v37 = vsel %vm697_vm11, %v693_v50, %v694_v61  ;;  %v701_v38 = vsel %vm700_vm12, %v2953_v49, %v692_v44 }
 0x105   :  { %v699_v56 = vsel %vm357_vm3, %v696_v53, %v698_v37  ;;  %v703_v57 = vsel %vm702_vm13, %v693_v50, %v694_v61 }
 0x106   :  { %709 = vst [vmem:[#allocation2] sm:$0x1] %v699_v56  ;;  %v705_v4 = vsel %vm704_vm14, %v701_v38, %v703_v57 }
 0x107   :  { %942 = vmatpush.bf16.msra.mxu0 %v3467_v8  ;;  %955 = vmatpush.bf16.msra.mxu1 %v3471_v9  ;;  %v706_v5 = vrot.slane %v705_v4, 1 }
 0x108   :  { %968 = vmatpush.bf16.msra.mxu2 %v3473_v10  ;;  %981 = vmatpush.bf16.msra.mxu3 %v3485_v14 }
 0x109   :  { %710 = vst [vmem:[#allocation2 + $0x8] sm:$0x1] %v706_v5 }
 0x10b   :  { %943 = vmatpush.bf16.msra.mxu0 %v3503_v20  ;;  %956 = vmatpush.bf16.msra.mxu1 %v3510_v22 }
 0x10c   :  { %969 = vmatpush.bf16.msra.mxu2 %v3512_v23  ;;  %982 = vmatpush.bf16.msra.mxu3 %v3524_v28 }
 0x10f   :  { %944 = vmatpush.bf16.msra.mxu0 %v3539_v33  ;;  %957 = vmatpush.bf16.msra.mxu1 %v3543_v34 }
 0x110   :  { %970 = vmatpush.bf16.msra.mxu2 %v3545_v35  ;;  %983 = vmatpush.bf16.msra.mxu3 %v3557_v39 }
 0x113   :  { %945 = vmatpush.bf16.msra.mxu0 %v3575_v46  ;;  %958 = vmatpush.bf16.msra.mxu1 %v3579_v47 }
 0x114   :  { %971 = vmatpush.bf16.msra.mxu2 %v3581_v48  ;;  %984 = vmatpush.bf16.msra.mxu3 %v3593_v54 }
 0x117   :  { %946 = vmatpush.bf16.msra.mxu0 %v3611_v62  ;;  %959 = vmatpush.bf16.msra.mxu1 %v3615_v1 }
 0x118   :  { %972 = vmatpush.bf16.msra.mxu2 %v3617_v2  ;;  %985 = vmatpush.bf16.msra.mxu3 %v3629_v7 }
 0x11b   :  { %947 = vmatpush.bf16.msra.mxu0 %v3647_v17  ;;  %960 = vmatpush.bf16.msra.mxu1 %v3651_v18 }
 0x11c   :  { %973 = vmatpush.bf16.msra.mxu2 %v3653_v19  ;;  %986 = vmatpush.bf16.msra.mxu3 %v3656_v21 }
 0x17a   :  { %v721_v6 = vpop.f32.mrf.mxu0  ;;  %v734_v11 = vpop.f32.mrf.mxu1 }
 0x17b   :  { %v768_v16 = vrot.slane %v734_v11, 6 }
 0x17d   :  { %v771_v36 = vsel %vm357_vm3, %v721_v6, %v768_v16 }
 0x181   :  { %v747_v25 = vpop.f32.mrf.mxu2  ;;  %v760_v26 = vpop.f32.mrf.mxu3 }
 0x182   :  { %v769_v27 = vrot.slane %v747_v25, 4  ;;  %v770_v29 = vrot.slane %v760_v26, 2  ;;  %v723_v40 = vpop.f32.mrf.mxu0  ;;  %v736_v41 = vpop.f32.mrf.mxu1 }
 0x184   :  { %v772_v43 = vsel %vm359_vm0, %v769_v27, %v770_v29 }
 0x185   :  { %v773_v49 = vsel %vm361_vm5, %v771_v36, %v772_v43 }
 0x186   :  { %v775_v44 = vadd.f32 %v773_v49, %v369_v42 }
 0x188   :  { %v2676_v50 = vmul.f32 -1.442695, %v775_v44  ;;  %v796_v4 = vrot.slane %v775_v44, 6 }
 0x189   :  { %v749_v61 = vpop.f32.mrf.mxu2  ;;  %v762_v53 = vpop.f32.mrf.mxu3 }
 0x18a   :  { %2954 = vpow2.f32 %v2676_v50 }
 0x190   :  { %v2955_v37 = vpop.eup %2954 }
 0x191   :  { %v779_v38 = vadd.f32 1.0, %v2955_v37 }
 0x193   :  { %2956 = vrcp.f32 %v779_v38  ;;  %v791_v11 = vand.u32 2147483648, %v779_v38  ;;  %v789_v12 = vand.u32 2147483647, %v779_v38  ;;  %vm785_vm1 = vweird.f32 %v779_v38 }
 0x194   :  { %2958 = vtanh.f32 %v796_v4 }
 0x195   :  { %v792_v25 = vor.u32 1.1754944e-38, %v791_v11  ;;  %vm790_vm4 = vcmp.eq.f32.partialorder %v789_v12, 8.507059e+37 }
 0x199   :  { %v2957_v56 = vpop.eup %2956 }
 0x19a   :  { %v781_v57 = vmul.f32 %v2957_v56, %v779_v38  ;;  %vm786_vm15 = vweird.f32 %v2957_v56  ;;  %v2959_v40 = vpop.eup %2958 }
 0x19b   :  { %vm787_vm2 = vmor %vm785_vm1, %vm786_vm15 }
 0x19c   :  { %v782_v5 = vsub.f32 1.0, %v781_v57 }
 0x19e   :  { %v783_v6 = vmul.f32 %v2957_v56, %v782_v5 }
 0x1a0   :  { %v784_v16 = vadd.f32 %v2957_v56, %v783_v6 }
 0x1a2   :  { %v788_v26 = vsel %vm787_vm2, %v2957_v56, %v784_v16 }
 0x1a3   :  { %v793_v27 = vsel %vm790_vm4, %v792_v25, %v788_v26 }
 0x1a4   :  { %v800_v29 = vrot.slane %v793_v27, 2  ;;  %v803_v36 = vmul.f32 %v2959_v40, %v793_v27  ;;  %v806_v43 = vrot.slane %v793_v27, 4 }
 0x1a6   :  { %v802_v41 = vmul.f32 %v800_v29, %v3774_v30 }
 0x1a8   :  { %v3820_v42 = vadd.f32 %v803_v36, %v802_v41 }
 0x1aa   :  { %2960 = vtanh.f32 %v3820_v42 }
 0x1b0   :  { %v2961_v49 = vpop.eup %2960 }
 0x1b1   :  { %v808_v44 = vmul.f32 %v2961_v49, %v806_v43  ;;  %v373_v49 = vrot.slane %v3743_v13, 4 }
 0x1b3   :  { %2962 = vtanh.f32 %v808_v44  ;;  %v825_v50 = vpack.c.bf16 %v808_v44, %v808_v44 }
 0x1b5   :  { %834 = vmatmul.bf16.vlgmr.msrb.gmra.mxu0 %v825_v50  ;;  %847 = vmatmul.bf16.vlgmr.msrb.gmra.mxu1 %v825_v50 }
 0x1b6   :  { %860 = vmatmul.bf16.vlgmr.msrb.gmra.mxu2 %v825_v50  ;;  %873 = vmatmul.bf16.vlgmr.msrb.gmra.mxu3 %v825_v50 }
 0x1b7   :  { %1054 = vmatpush.bf16.msrb.mxu0 %v3389_v45  ;;  %1067 = vmatpush.bf16.msrb.mxu1 %v3406_v51 }
 0x1b8   :  { %1080 = vmatpush.bf16.msrb.mxu2 %v3408_v52  ;;  %1093 = vmatpush.bf16.msrb.mxu3 %v3416_v55 }
 0x1b9   :  { %v2963_v30 = vpop.eup %2962 }
 0x1ba   :  { %v811_v61 = vrot.slane %v2963_v30, 1  ;;  %v812_v53 = vrot.slane %v2963_v30, 2  ;;  %v813_v37 = vrot.slane %v2963_v30, 3 }
 0x1bb   :  { %1055 = vmatpush.bf16.msrb.mxu0 %v3431_v60  ;;  %1068 = vmatpush.bf16.msrb.mxu1 %v3441_v63 }
 0x1bc   :  { %1081 = vmatpush.bf16.msrb.mxu2 %v3443_v0  ;;  %1094 = vmatpush.bf16.msrb.mxu3 %v3452_v3  ;;  %v814_v38 = vsel %vm695_vm10, %v2963_v30, %v811_v61  ;;  %v815_v56 = vsel %vm697_vm11, %v812_v53, %v813_v37  ;;  %v817_v57 = vsel %vm700_vm12, %v2963_v30, %v811_v61 }
 0x1bd   :  { %v816_v4 = vsel %vm357_vm3, %v814_v38, %v815_v56  ;;  %v818_v5 = vsel %vm702_vm13, %v812_v53, %v813_v37 }
 0x1be   :  { %823 = vst [vmem:[#allocation2 + $0x1] sm:$0x1] %v816_v4  ;;  %v819_v11 = vsel %vm704_vm14, %v817_v57, %v818_v5 }
 0x1bf   :  { %1056 = vmatpush.bf16.msrb.mxu0 %v3467_v8  ;;  %1069 = vmatpush.bf16.msrb.mxu1 %v3471_v9  ;;  %v820_v6 = vrot.slane %v819_v11, 1 }
 0x1c0   :  { %1082 = vmatpush.bf16.msrb.mxu2 %v3473_v10  ;;  %1095 = vmatpush.bf16.msrb.mxu3 %v3485_v14 }
 0x1c1   :  { %824 = vst [vmem:[#allocation2 + $0x9] sm:$0x1] %v820_v6 }
 0x1c3   :  { %1057 = vmatpush.bf16.msrb.mxu0 %v3503_v20  ;;  %1070 = vmatpush.bf16.msrb.mxu1 %v3510_v22 }
 0x1c4   :  { %1083 = vmatpush.bf16.msrb.mxu2 %v3512_v23  ;;  %1096 = vmatpush.bf16.msrb.mxu3 %v3524_v28 }
 0x1c7   :  { %1058 = vmatpush.bf16.msrb.mxu0 %v3539_v33  ;;  %1071 = vmatpush.bf16.msrb.mxu1 %v3543_v34 }
 0x1c8   :  { %1084 = vmatpush.bf16.msrb.mxu2 %v3545_v35  ;;  %1097 = vmatpush.bf16.msrb.mxu3 %v3557_v39 }
 0x1cb   :  { %1059 = vmatpush.bf16.msrb.mxu0 %v3575_v46  ;;  %1072 = vmatpush.bf16.msrb.mxu1 %v3579_v47 }
 0x1cc   :  { %1085 = vmatpush.bf16.msrb.mxu2 %v3581_v48  ;;  %1098 = vmatpush.bf16.msrb.mxu3 %v3593_v54 }
 0x1cf   :  { %1060 = vmatpush.bf16.msrb.mxu0 %v3611_v62  ;;  %1073 = vmatpush.bf16.msrb.mxu1 %v3615_v1 }
 0x1d0   :  { %1086 = vmatpush.bf16.msrb.mxu2 %v3617_v2  ;;  %1099 = vmatpush.bf16.msrb.mxu3 %v3629_v7 }
 0x1d3   :  { %1061 = vmatpush.bf16.msrb.mxu0 %v3647_v17  ;;  %1074 = vmatpush.bf16.msrb.mxu1 %v3651_v18 }
 0x1d4   :  { %1087 = vmatpush.bf16.msrb.mxu2 %v3653_v19  ;;  %1100 = vmatpush.bf16.msrb.mxu3 %v3656_v21 }
 0x232   :  { %v835_v12 = vpop.f32.mrf.mxu0  ;;  %v848_v16 = vpop.f32.mrf.mxu1 }
 0x233   :  { %v882_v25 = vrot.slane %v848_v16, 6 }
 0x235   :  { %v885_v43 = vsel %vm357_vm3, %v835_v12, %v882_v25 }
 0x239   :  { %v861_v26 = vpop.f32.mrf.mxu2  ;;  %v874_v27 = vpop.f32.mrf.mxu3 }
 0x23a   :  { %v883_v29 = vrot.slane %v861_v26, 4  ;;  %v884_v40 = vrot.slane %v874_v27, 2  ;;  %v837_v41 = vpop.f32.mrf.mxu0  ;;  %v850_v36 = vpop.f32.mrf.mxu1 }
 0x23c   :  { %v886_v44 = vsel %vm359_vm0, %v883_v29, %v884_v40 }
 0x23d   :  { %v887_v50 = vsel %vm361_vm5, %v885_v43, %v886_v44 }
 0x23e   :  { %v889_v30 = vadd.f32 %v887_v50, %v373_v49 }
 0x240   :  { %v2677_v61 = vmul.f32 -1.442695, %v889_v30  ;;  %v910_v5 = vrot.slane %v889_v30, 6 }
 0x241   :  { %v863_v53 = vpop.f32.mrf.mxu2  ;;  %v876_v37 = vpop.f32.mrf.mxu3 }
 0x242   :  { %2964 = vpow2.f32 %v2677_v61 }
 0x248   :  { %v2965_v38 = vpop.eup %2964 }
 0x249   :  { %v893_v56 = vadd.f32 1.0, %v2965_v38 }
 0x24b   :  { %2966 = vrcp.f32 %v893_v56  ;;  %v905_v6 = vand.u32 2147483648, %v893_v56  ;;  %v903_v13 = vand.u32 2147483647, %v893_v56  ;;  %vm899_vm7 = vweird.f32 %v893_v56 }
 0x24c   :  { %2968 = vtanh.f32 %v910_v5 }
 0x24d   :  { %v906_v25 = vor.u32 1.1754944e-38, %v905_v6  ;;  %vm904_vm9 = vcmp.eq.f32.partialorder %v903_v13, 8.507059e+37 }
 0x251   :  { %v2967_v57 = vpop.eup %2966 }
 0x252   :  { %v895_v4 = vmul.f32 %v2967_v57, %v893_v56  ;;  %vm900_vm6 = vweird.f32 %v2967_v57  ;;  %v2969_v40 = vpop.eup %2968 }
 0x253   :  { %vm901_vm8 = vmor %vm899_vm7, %vm900_vm6 }
 0x254   :  { %v896_v11 = vsub.f32 1.0, %v895_v4 }
 0x256   :  { %v897_v12 = vmul.f32 %v2967_v57, %v896_v11 }
 0x258   :  { %v898_v16 = vadd.f32 %v2967_v57, %v897_v12 }
 0x25a   :  { %v902_v26 = vsel %vm901_vm8, %v2967_v57, %v898_v16 }
 0x25b   :  { %v907_v27 = vsel %vm904_vm9, %v906_v25, %v902_v26 }
 0x25c   :  { %v914_v29 = vrot.slane %v907_v27, 2  ;;  %v917_v36 = vmul.f32 %v2969_v40, %v907_v27  ;;  %v920_v49 = vrot.slane %v907_v27, 4 }
 0x25e   :  { %v916_v41 = vmul.f32 %v914_v29, %v3820_v42 }
 0x260   :  { %v3866_v43 = vadd.f32 %v917_v36, %v916_v41 }
 0x262   :  { %2970 = vtanh.f32 %v3866_v43 }
 0x268   :  { %v2971_v44 = vpop.eup %2970 }
 0x269   :  { %v922_v50 = vmul.f32 %v2971_v44, %v920_v49  ;;  %v377_v49 = vrot.slane %v3746_v15, 6 }
 0x26b   :  { %2972 = vtanh.f32 %v922_v50  ;;  %v939_v30 = vpack.c.bf16 %v922_v50, %v922_v50 }
 0x26d   :  { %948 = vmatmul.bf16.vlgmr.msra.gmra.mxu0 %v939_v30  ;;  %961 = vmatmul.bf16.vlgmr.msra.gmra.mxu1 %v939_v30 }
 0x26e   :  { %974 = vmatmul.bf16.vlgmr.msra.gmra.mxu2 %v939_v30  ;;  %987 = vmatmul.bf16.vlgmr.msra.gmra.mxu3 %v939_v30 }
 0x26f   :  { %1175 = vmatpush.bf16.msra.mxu0 %v3389_v45  ;;  %1188 = vmatpush.bf16.msra.mxu1 %v3406_v51 }
 0x270   :  { %1201 = vmatpush.bf16.msra.mxu2 %v3408_v52  ;;  %1214 = vmatpush.bf16.msra.mxu3 %v3416_v55 }
 0x271   :  { %v2973_v42 = vpop.eup %2972 }
 0x272   :  { %v925_v61 = vrot.slane %v2973_v42, 1  ;;  %v926_v53 = vrot.slane %v2973_v42, 2  ;;  %v927_v37 = vrot.slane %v2973_v42, 3 }
 0x273   :  { %1176 = vmatpush.bf16.msra.mxu0 %v3431_v60  ;;  %1189 = vmatpush.bf16.msra.mxu1 %v3441_v63 }
 0x274   :  { %1202 = vmatpush.bf16.msra.mxu2 %v3443_v0  ;;  %1215 = vmatpush.bf16.msra.mxu3 %v3452_v3  ;;  %v928_v38 = vsel %vm695_vm10, %v2973_v42, %v925_v61  ;;  %v929_v56 = vsel %vm697_vm11, %v926_v53, %v927_v37  ;;  %v931_v57 = vsel %vm700_vm12, %v2973_v42, %v925_v61 }
 0x275   :  { %v930_v4 = vsel %vm357_vm3, %v928_v38, %v929_v56  ;;  %v932_v5 = vsel %vm702_vm13, %v926_v53, %v927_v37 }
 0x276   :  { %937 = vst [vmem:[#allocation2 + $0x2] sm:$0x1] %v930_v4  ;;  %v933_v11 = vsel %vm704_vm14, %v931_v57, %v932_v5 }
 0x277   :  { %1177 = vmatpush.bf16.msra.mxu0 %v3467_v8  ;;  %1190 = vmatpush.bf16.msra.mxu1 %v3471_v9  ;;  %v934_v6 = vrot.slane %v933_v11, 1 }
 0x278   :  { %1203 = vmatpush.bf16.msra.mxu2 %v3473_v10  ;;  %1216 = vmatpush.bf16.msra.mxu3 %v3485_v14 }
 0x279   :  { %938 = vst [vmem:[#allocation2 + $0xa] sm:$0x1] %v934_v6 }
 0x27b   :  { %1178 = vmatpush.bf16.msra.mxu0 %v3503_v20  ;;  %1191 = vmatpush.bf16.msra.mxu1 %v3510_v22 }
 0x27c   :  { %1204 = vmatpush.bf16.msra.mxu2 %v3512_v23  ;;  %1217 = vmatpush.bf16.msra.mxu3 %v3524_v28 }
 0x27f   :  { %1179 = vmatpush.bf16.msra.mxu0 %v3539_v33  ;;  %1192 = vmatpush.bf16.msra.mxu1 %v3543_v34 }
 0x280   :  { %1205 = vmatpush.bf16.msra.mxu2 %v3545_v35  ;;  %1218 = vmatpush.bf16.msra.mxu3 %v3557_v39 }
 0x283   :  { %1180 = vmatpush.bf16.msra.mxu0 %v3575_v46  ;;  %1193 = vmatpush.bf16.msra.mxu1 %v3579_v47 }
 0x284   :  { %1206 = vmatpush.bf16.msra.mxu2 %v3581_v48  ;;  %1219 = vmatpush.bf16.msra.mxu3 %v3593_v54 }
 0x287   :  { %1181 = vmatpush.bf16.msra.mxu0 %v3611_v62  ;;  %1194 = vmatpush.bf16.msra.mxu1 %v3615_v1 }
 0x288   :  { %1207 = vmatpush.bf16.msra.mxu2 %v3617_v2  ;;  %1220 = vmatpush.bf16.msra.mxu3 %v3629_v7 }
 0x28b   :  { %1182 = vmatpush.bf16.msra.mxu0 %v3647_v17  ;;  %1195 = vmatpush.bf16.msra.mxu1 %v3651_v18 }
 0x28c   :  { %1208 = vmatpush.bf16.msra.mxu2 %v3653_v19  ;;  %1221 = vmatpush.bf16.msra.mxu3 %v3656_v21 }
 0x2ea   :  { %v949_v12 = vpop.f32.mrf.mxu0  ;;  %v962_v13 = vpop.f32.mrf.mxu1 }
 0x2eb   :  { %v996_v16 = vrot.slane %v962_v13, 6 }
 0x2ed   :  { %v999_v36 = vsel %vm357_vm3, %v949_v12, %v996_v16 }
 0x2f1   :  { %v975_v25 = vpop.f32.mrf.mxu2  ;;  %v988_v26 = vpop.f32.mrf.mxu3 }
 0x2f2   :  { %v997_v27 = vrot.slane %v975_v25, 4  ;;  %v998_v29 = vrot.slane %v988_v26, 2  ;;  %v951_v40 = vpop.f32.mrf.mxu0  ;;  %v964_v41 = vpop.f32.mrf.mxu1 }
 0x2f4   :  { %v1000_v44 = vsel %vm359_vm0, %v997_v27, %v998_v29 }
 0x2f5   :  { %v1001_v50 = vsel %vm361_vm5, %v999_v36, %v1000_v44 }
 0x2f6   :  { %v1003_v30 = vadd.f32 %v1001_v50, %v377_v49 }
 0x2f8   :  { %v2678_v42 = vmul.f32 -1.442695, %v1003_v30  ;;  %v1024_v4 = vrot.slane %v1003_v30, 6 }
 0x2f9   :  { %v977_v61 = vpop.f32.mrf.mxu2  ;;  %v990_v53 = vpop.f32.mrf.mxu3 }
 0x2fa   :  { %2974 = vpow2.f32 %v2678_v42 }
 0x300   :  { %v2975_v37 = vpop.eup %2974 }
 0x301   :  { %v1007_v38 = vadd.f32 1.0, %v2975_v37 }
 0x303   :  { %2976 = vrcp.f32 %v1007_v38  ;;  %v1019_v11 = vand.u32 2147483648, %v1007_v38  ;;  %v1017_v15 = vand.u32 2147483647, %v1007_v38  ;;  %vm1013_vm1 = vweird.f32 %v1007_v38 }
 0x304   :  { %2978 = vtanh.f32 %v1024_v4 }
 0x305   :  { %v1020_v13 = vor.u32 1.1754944e-38, %v1019_v11  ;;  %vm1018_vm4 = vcmp.eq.f32.partialorder %v1017_v15, 8.507059e+37 }
 0x309   :  { %v2977_v56 = vpop.eup %2976 }
 0x30a   :  { %v1009_v57 = vmul.f32 %v2977_v56, %v1007_v38  ;;  %vm1014_vm15 = vweird.f32 %v2977_v56  ;;  %v2979_v27 = vpop.eup %2978 }
 0x30b   :  { %vm1015_vm2 = vmor %vm1013_vm1, %vm1014_vm15 }
 0x30c   :  { %v1010_v5 = vsub.f32 1.0, %v1009_v57 }
 0x30e   :  { %v1011_v6 = vmul.f32 %v2977_v56, %v1010_v5 }
 0x310   :  { %v1012_v12 = vadd.f32 %v2977_v56, %v1011_v6 }
 0x312   :  { %v1016_v16 = vsel %vm1015_vm2, %v2977_v56, %v1012_v12 }
 0x313   :  { %v1021_v25 = vsel %vm1018_vm4, %v1020_v13, %v1016_v16 }
 0x314   :  { %v1028_v26 = vrot.slane %v1021_v25, 2  ;;  %v1031_v40 = vmul.f32 %v2979_v27, %v1021_v25  ;;  %v1034_v36 = vrot.slane %v1021_v25, 4 }
 0x316   :  { %v1030_v29 = vmul.f32 %v1028_v26, %v3866_v43 }
 0x318   :  { %v3912_v41 = vadd.f32 %v1031_v40, %v1030_v29 }
 0x31a   :  { %2980 = vtanh.f32 %v3912_v41 }
 0x320   :  { %v2981_v49 = vpop.eup %2980 }
 0x321   :  { %v3915_v44 = vmul.f32 %v2981_v49, %v1034_v36 }
 0x323   :  { %2982 = vtanh.f32 %v3915_v44  ;;  %v1053_v50 = vpack.c.bf16 %v3915_v44, %v3915_v44 }
 0x325   :  { %1062 = vmatmul.bf16.vlgmr.msrb.gmra.mxu0 %v1053_v50  ;;  %1075 = vmatmul.bf16.vlgmr.msrb.gmra.mxu1 %v1053_v50 }
 0x326   :  { %1088 = vmatmul.bf16.vlgmr.msrb.gmra.mxu2 %v1053_v50  ;;  %1101 = vmatmul.bf16.vlgmr.msrb.gmra.mxu3 %v1053_v50 }
 0x327   :  { %1291 = vmatpush.bf16.msrb.mxu0 %v3389_v45  ;;  %1304 = vmatpush.bf16.msrb.mxu1 %v3406_v51 }
 0x328   :  { %1317 = vmatpush.bf16.msrb.mxu2 %v3408_v52  ;;  %1330 = vmatpush.bf16.msrb.mxu3 %v3416_v55 }
 0x329   :  { %v2983_v43 = vpop.eup %2982 }
 0x32a   :  { %v1039_v30 = vrot.slane %v2983_v43, 1  ;;  %v1040_v42 = vrot.slane %v2983_v43, 2  ;;  %v1041_v61 = vrot.slane %v2983_v43, 3 }
 0x32b   :  { %1292 = vmatpush.bf16.msrb.mxu0 %v3431_v60  ;;  %1305 = vmatpush.bf16.msrb.mxu1 %v3441_v63 }
 0x32c   :  { %1318 = vmatpush.bf16.msrb.mxu2 %v3443_v0  ;;  %1331 = vmatpush.bf16.msrb.mxu3 %v3452_v3  ;;  %v1042_v53 = vsel %vm695_vm10, %v2983_v43, %v1039_v30  ;;  %v1043_v37 = vsel %vm697_vm11, %v1040_v42, %v1041_v61  ;;  %v1045_v38 = vsel %vm700_vm12, %v2983_v43, %v1039_v30 }
 0x32d   :  { %v1044_v56 = vsel %vm357_vm3, %v1042_v53, %v1043_v37  ;;  %v1046_v57 = vsel %vm702_vm13, %v1040_v42, %v1041_v61 }
 0x32e   :  { %1051 = vst [vmem:[#allocation2 + $0x3] sm:$0x1] %v1044_v56  ;;  %v1047_v4 = vsel %vm704_vm14, %v1045_v38, %v1046_v57 }
 0x32f   :  { %1293 = vmatpush.bf16.msrb.mxu0 %v3467_v8  ;;  %1306 = vmatpush.bf16.msrb.mxu1 %v3471_v9  ;;  %v1048_v5 = vrot.slane %v1047_v4, 1 }
 0x330   :  { %1319 = vmatpush.bf16.msrb.mxu2 %v3473_v10  ;;  %1332 = vmatpush.bf16.msrb.mxu3 %v3485_v14 }
 0x331   :  { %1052 = vst [vmem:[#allocation2 + $0xb] sm:$0x1] %v1048_v5 }
 0x333   :  { %1294 = vmatpush.bf16.msrb.mxu0 %v3503_v20  ;;  %1307 = vmatpush.bf16.msrb.mxu1 %v3510_v22 }
 0x334   :  { %1320 = vmatpush.bf16.msrb.mxu2 %v3512_v23  ;;  %1333 = vmatpush.bf16.msrb.mxu3 %v3524_v28 }
 0x337   :  { %1295 = vmatpush.bf16.msrb.mxu0 %v3539_v33  ;;  %1308 = vmatpush.bf16.msrb.mxu1 %v3543_v34 }
 0x338   :  { %1321 = vmatpush.bf16.msrb.mxu2 %v3545_v35  ;;  %1334 = vmatpush.bf16.msrb.mxu3 %v3557_v39 }
 0x33b   :  { %1296 = vmatpush.bf16.msrb.mxu0 %v3575_v46  ;;  %1309 = vmatpush.bf16.msrb.mxu1 %v3579_v47 }
 0x33c   :  { %1322 = vmatpush.bf16.msrb.mxu2 %v3581_v48  ;;  %1335 = vmatpush.bf16.msrb.mxu3 %v3593_v54 }
 0x33f   :  { %1297 = vmatpush.bf16.msrb.mxu0 %v3611_v62  ;;  %1310 = vmatpush.bf16.msrb.mxu1 %v3615_v1 }
 0x340   :  { %1323 = vmatpush.bf16.msrb.mxu2 %v3617_v2  ;;  %1336 = vmatpush.bf16.msrb.mxu3 %v3629_v7 }
 0x343   :  { %1298 = vmatpush.bf16.msrb.mxu0 %v3647_v17  ;;  %1311 = vmatpush.bf16.msrb.mxu1 %v3651_v18 }
 0x344   :  { %1324 = vmatpush.bf16.msrb.mxu2 %v3653_v19  ;;  %1337 = vmatpush.bf16.msrb.mxu3 %v3656_v21 }
 0x3a2   :  { %v1063_v11 = vpop.f32.mrf.mxu0  ;;  %v1076_v6 = vpop.f32.mrf.mxu1 }
 0x3a3   :  { %v1110_v15 = vrot.slane %v1076_v6, 6 }
 0x3a5   :  { %v1113_v29 = vsel %vm357_vm3, %v1063_v11, %v1110_v15 }
 0x3a9   :  { %v1089_v12 = vpop.f32.mrf.mxu2  ;;  %v1102_v13 = vpop.f32.mrf.mxu3 }
 0x3aa   :  { %v1111_v16 = vrot.slane %v1089_v12, 4  ;;  %v1112_v25 = vrot.slane %v1102_v13, 2  ;;  %v1065_v26 = vpop.f32.mrf.mxu0  ;;  %v1078_v27 = vpop.f32.mrf.mxu1 }
 0x3ab   :  { %v1167_v27 = vlaneseq }
 0x3ac   :  { %v1114_v40 = vsel %vm359_vm0, %v1111_v16, %v1112_v25 }
 0x3ad   :  { %v1115_v36 = vsel %vm361_vm5, %v1113_v29, %v1114_v40  ;;  %v3967_v29 = vand.u32 127, %v1167_v27 }
 0x3ae   :  { %v1117_v49 = vadd.f32 %v1115_v36, %v3757_v58 }
 0x3af   :  { %vm1169_vm15 = vcmp.lt.s32.totalorder %v3967_v29, 64 }
 0x3b0   :  { %v2679_v50 = vmul.f32 -1.442695, %v1117_v49  ;;  %v1138_v38 = vrot.slane %v1117_v49, 6 }
 0x3b1   :  { %v1091_v43 = vpop.f32.mrf.mxu2  ;;  %v1104_v30 = vpop.f32.mrf.mxu3 }
 0x3b2   :  { %2984 = vpow2.f32 %v2679_v50 }
 0x3b8   :  { %v2985_v42 = vpop.eup %2984 }
 0x3b9   :  { %v1121_v61 = vadd.f32 1.0, %v2985_v42 }
 0x3bb   :  { %2986 = vrcp.f32 %v1121_v61  ;;  %v1133_v57 = vand.u32 2147483648, %v1121_v61  ;;  %v1131_v5 = vand.u32 2147483647, %v1121_v61  ;;  %vm1127_vm7 = vweird.f32 %v1121_v61 }
 0x3bc   :  { %2988 = vtanh.f32 %v1138_v38 }
 0x3bd   :  { %v1134_v58 = vor.u32 1.1754944e-38, %v1133_v57  ;;  %vm1132_vm9 = vcmp.eq.f32.partialorder %v1131_v5, 8.507059e+37 }
 0x3c1   :  { %v2987_v53 = vpop.eup %2986 }
 0x3c2   :  { %v1123_v37 = vmul.f32 %v2987_v53, %v1121_v61  ;;  %vm1128_vm6 = vweird.f32 %v2987_v53  ;;  %v2989_v13 = vpop.eup %2988 }
 0x3c3   :  { %vm1129_vm8 = vmor %vm1127_vm7, %vm1128_vm6 }
 0x3c4   :  { %v1124_v56 = vsub.f32 1.0, %v1123_v37 }
 0x3c6   :  { %v1125_v4 = vmul.f32 %v2987_v53, %v1124_v56 }
 0x3c8   :  { %v1126_v11 = vadd.f32 %v2987_v53, %v1125_v4 }
 0x3ca   :  { %v1130_v6 = vsel %vm1129_vm8, %v2987_v53, %v1126_v11 }
 0x3cb   :  { %v1135_v15 = vsel %vm1132_vm9, %v1134_v58, %v1130_v6 }
 0x3cc   :  { %v1142_v12 = vrot.slane %v1135_v15, 2  ;;  %v1145_v25 = vmul.f32 %v2989_v13, %v1135_v15  ;;  %v1148_v40 = vrot.slane %v1135_v15, 4 }
 0x3ce   :  { %v1144_v16 = vmul.f32 %v1142_v12, %v3912_v41 }
 0x3d0   :  { %v3963_v26 = vadd.f32 %v1145_v25, %v1144_v16 }
 0x3d2   :  { %2990 = vtanh.f32 %v3963_v26  ;;  %v1173_v11 = vsel %vm1169_vm15, %v3963_v26, %v3912_v41 }
 0x3d8   :  { %v2991_v36 = vpop.eup %2990 }
 0x3d9   :  { %v1150_v49 = vmul.f32 %v2991_v36, %v1148_v40 }
 0x3db   :  { %2992 = vtanh.f32 %v1150_v49  ;;  %v1172_v50 = vsel %vm1169_vm15, %v1150_v49, %v3915_v44 }
 0x3dc   :  { %v1174_v43 = vpack.c.bf16 %v1172_v50, %v1172_v50 }
 0x3de   :  { %1183 = vmatmul.bf16.vlgmr.msra.gmra.mxu0 %v1174_v43  ;;  %1196 = vmatmul.bf16.vlgmr.msra.gmra.mxu1 %v1174_v43 }
 0x3df   :  { %1209 = vmatmul.bf16.vlgmr.msra.gmra.mxu2 %v1174_v43  ;;  %1222 = vmatmul.bf16.vlgmr.msra.gmra.mxu3 %v1174_v43 }
 0x3e0   :  { %1407 = vmatpush.bf16.msra.mxu0 %v3389_v45  ;;  %1420 = vmatpush.bf16.msra.mxu1 %v3406_v51 }
 0x3e1   :  { %v2993_v30 = vpop.eup %2992  ;;  %1433 = vmatpush.bf16.msra.mxu2 %v3408_v52  ;;  %1446 = vmatpush.bf16.msra.mxu3 %v3416_v55 }
 0x3e2   :  { %v1153_v42 = vrot.slane %v2993_v30, 1  ;;  %v1154_v61 = vrot.slane %v2993_v30, 2  ;;  %v1155_v53 = vrot.slane %v2993_v30, 3 }
 0x3e4   :  { %1408 = vmatpush.bf16.msra.mxu0 %v3431_v60  ;;  %1421 = vmatpush.bf16.msra.mxu1 %v3441_v63  ;;  %v1156_v37 = vsel %vm695_vm10, %v2993_v30, %v1153_v42  ;;  %v1157_v38 = vsel %vm697_vm11, %v1154_v61, %v1155_v53  ;;  %v1159_v45 = vsel %vm700_vm12, %v2993_v30, %v1153_v42 }
 0x3e5   :  { %1434 = vmatpush.bf16.msra.mxu2 %v3443_v0  ;;  %1447 = vmatpush.bf16.msra.mxu3 %v3452_v3  ;;  %v1158_v51 = vsel %vm357_vm3, %v1156_v37, %v1157_v38  ;;  %v1160_v52 = vsel %vm702_vm13, %v1154_v61, %v1155_v53 }
 0x3e6   :  { %1165 = vst [vmem:[#allocation2 + $0x4] sm:$0x1] %v1158_v51  ;;  %v1161_v55 = vsel %vm704_vm14, %v1159_v45, %v1160_v52 }
 0x3e7   :  { %v1162_v60 = vrot.slane %v1161_v55, 1 }
 0x3e8   :  { %1409 = vmatpush.bf16.msra.mxu0 %v3467_v8  ;;  %1422 = vmatpush.bf16.msra.mxu1 %v3471_v9 }
 0x3e9   :  { %1435 = vmatpush.bf16.msra.mxu2 %v3473_v10  ;;  %1448 = vmatpush.bf16.msra.mxu3 %v3485_v14  ;;  %1166 = vst [vmem:[#allocation2 + $0xc] sm:$0x1] %v1162_v60 }
 0x3ec   :  { %1410 = vmatpush.bf16.msra.mxu0 %v3503_v20  ;;  %1423 = vmatpush.bf16.msra.mxu1 %v3510_v22 }
 0x3ed   :  { %1436 = vmatpush.bf16.msra.mxu2 %v3512_v23  ;;  %1449 = vmatpush.bf16.msra.mxu3 %v3524_v28  ;;  %v384_v28 = vrot.slane %v3760_v59, 2 }
 0x3f0   :  { %1411 = vmatpush.bf16.msra.mxu0 %v3539_v33  ;;  %1424 = vmatpush.bf16.msra.mxu1 %v3543_v34 }
 0x3f1   :  { %1437 = vmatpush.bf16.msra.mxu2 %v3545_v35  ;;  %1450 = vmatpush.bf16.msra.mxu3 %v3557_v39 }
 0x3f4   :  { %1412 = vmatpush.bf16.msra.mxu0 %v3575_v46  ;;  %1425 = vmatpush.bf16.msra.mxu1 %v3579_v47 }
 0x3f5   :  { %1438 = vmatpush.bf16.msra.mxu2 %v3581_v48  ;;  %1451 = vmatpush.bf16.msra.mxu3 %v3593_v54 }
 0x3f8   :  { %1413 = vmatpush.bf16.msra.mxu0 %v3611_v62  ;;  %1426 = vmatpush.bf16.msra.mxu1 %v3615_v1 }
 0x3f9   :  { %1439 = vmatpush.bf16.msra.mxu2 %v3617_v2  ;;  %1452 = vmatpush.bf16.msra.mxu3 %v3629_v7 }
 0x3fc   :  { %1414 = vmatpush.bf16.msra.mxu0 %v3647_v17  ;;  %1427 = vmatpush.bf16.msra.mxu1 %v3651_v18 }
 0x3fd   :  { %1440 = vmatpush.bf16.msra.mxu2 %v3653_v19  ;;  %1453 = vmatpush.bf16.msra.mxu3 %v3656_v21 }
 0x45b   :  { %v1184_v63 = vpop.f32.mrf.mxu0  ;;  %v1197_v0 = vpop.f32.mrf.mxu1 }
 0x45c   :  { %v1231_v3 = vrot.slane %v1197_v0, 6 }
 0x45e   :  { %v1234_v23 = vsel %vm357_vm3, %v1184_v63, %v1231_v3 }
 0x462   :  { %v1210_v8 = vpop.f32.mrf.mxu2  ;;  %v1223_v9 = vpop.f32.mrf.mxu3 }
 0x463   :  { %v1232_v10 = vrot.slane %v1210_v8, 4  ;;  %v1233_v14 = vrot.slane %v1223_v9, 2  ;;  %v1186_v20 = vpop.f32.mrf.mxu0  ;;  %v1199_v22 = vpop.f32.mrf.mxu1 }
 0x465   :  { %v1235_v33 = vsel %vm359_vm0, %v1232_v10, %v1233_v14  ;;  %v388_v10 = vrot.slane %v3763_v31, 4 }
 0x466   :  { %v1236_v34 = vsel %vm361_vm5, %v1234_v23, %v1235_v33 }
 0x467   :  { %v1238_v35 = vadd.f32 %v1236_v34, %v384_v28 }
 0x469   :  { %v2680_v39 = vmul.f32 -1.442695, %v1238_v35  ;;  %v1259_v2 = vrot.slane %v1238_v35, 6 }
 0x46a   :  { %v1212_v46 = vpop.f32.mrf.mxu2  ;;  %v1225_v47 = vpop.f32.mrf.mxu3 }
 0x46b   :  { %2994 = vpow2.f32 %v2680_v39 }
 0x471   :  { %v2995_v48 = vpop.eup %2994 }
 0x472   :  { %v1242_v54 = vadd.f32 1.0, %v2995_v48 }
 0x474   :  { %2996 = vrcp.f32 %v1242_v54  ;;  %v1254_v17 = vand.u32 2147483648, %v1242_v54  ;;  %v1252_v19 = vand.u32 2147483647, %v1242_v54  ;;  %vm1248_vm2 = vweird.f32 %v1242_v54 }
 0x475   :  { %2998 = vtanh.f32 %v1259_v2 }
 0x476   :  { %v1255_v59 = vor.u32 1.1754944e-38, %v1254_v17  ;;  %vm1253_vm6 = vcmp.eq.f32.partialorder %v1252_v19, 8.507059e+37 }
 0x47a   :  { %v2997_v62 = vpop.eup %2996 }
 0x47b   :  { %v1244_v1 = vmul.f32 %v2997_v62, %v1242_v54  ;;  %vm1249_vm1 = vweird.f32 %v2997_v62  ;;  %v2999_v5 = vpop.eup %2998 }
 0x47c   :  { %vm1250_vm4 = vmor %vm1248_vm2, %vm1249_vm1 }
 0x47d   :  { %v1245_v7 = vsub.f32 1.0, %v1244_v1 }
 0x47f   :  { %v1246_v18 = vmul.f32 %v2997_v62, %v1245_v7 }
 0x481   :  { %v1247_v21 = vadd.f32 %v2997_v62, %v1246_v18 }
 0x483   :  { %v1251_v56 = vsel %vm1250_vm4, %v2997_v62, %v1247_v21 }
 0x484   :  { %v1256_v57 = vsel %vm1253_vm6, %v1255_v59, %v1251_v56 }
 0x485   :  { %v1263_v4 = vrot.slane %v1256_v57, 2  ;;  %v1266_v6 = vmul.f32 %v2999_v5, %v1256_v57  ;;  %v1269_v12 = vrot.slane %v1256_v57, 4 }
 0x487   :  { %v1265_v58 = vmul.f32 %v1263_v4, %v1173_v11 }
 0x489   :  { %v4019_v15 = vadd.f32 %v1266_v6, %v1265_v58 }
 0x48b   :  { %3000 = vtanh.f32 %v4019_v15  ;;  %v1289_v21 = vsel %vm1169_vm15, %v4019_v15, %v3912_v41 }
 0x491   :  { %v3001_v13 = vpop.eup %3000 }
 0x492   :  { %v1271_v16 = vmul.f32 %v3001_v13, %v1269_v12 }
 0x494   :  { %3002 = vtanh.f32 %v1271_v16  ;;  %v1288_v25 = vsel %vm1169_vm15, %v1271_v16, %v3915_v44 }
 0x495   :  { %v1290_v40 = vpack.c.bf16 %v1288_v25, %v1288_v25 }
 0x497   :  { %1299 = vmatmul.bf16.vlgmr.msrb.gmra.mxu0 %v1290_v40  ;;  %1312 = vmatmul.bf16.vlgmr.msrb.gmra.mxu1 %v1290_v40 }
 0x498   :  { %1325 = vmatmul.bf16.vlgmr.msrb.gmra.mxu2 %v1290_v40  ;;  %1338 = vmatmul.bf16.vlgmr.msrb.gmra.mxu3 %v1290_v40 }
 0x49a   :  { %v3003_v26 = vpop.eup %3002 }
 0x49b   :  { %v1274_v36 = vrot.slane %v3003_v26, 1  ;;  %v1275_v49 = vrot.slane %v3003_v26, 2  ;;  %v1276_v50 = vrot.slane %v3003_v26, 3 }
 0x49d   :  { %v1277_v43 = vsel %vm695_vm10, %v3003_v26, %v1274_v36  ;;  %v1278_v30 = vsel %vm697_vm11, %v1275_v49, %v1276_v50  ;;  %v1280_v42 = vsel %vm700_vm12, %v3003_v26, %v1274_v36  ;;  %v1281_v61 = vsel %vm702_vm13, %v1275_v49, %v1276_v50 }
 0x49e   :  { %v1279_v53 = vsel %vm357_vm3, %v1277_v43, %v1278_v30  ;;  %v1282_v37 = vsel %vm704_vm14, %v1280_v42, %v1281_v61 }
 0x49f   :  { %1286 = vst [vmem:[#allocation2 + $0x5] sm:$0x1] %v1279_v53  ;;  %v1283_v38 = vrot.slane %v1282_v37, 1 }
 0x4a1   :  { %1287 = vst [vmem:[#allocation2 + $0xd] sm:$0x1] %v1283_v38 }
 0x514   :  { %v1300_v45 = vpop.f32.mrf.mxu0  ;;  %v1313_v51 = vpop.f32.mrf.mxu1 }
 0x515   :  { %v1347_v52 = vrot.slane %v1313_v51, 6 }
 0x517   :  { %v1350_v9 = vsel %vm357_vm3, %v1300_v45, %v1347_v52 }
 0x51b   :  { %v1326_v55 = vpop.f32.mrf.mxu2  ;;  %v1339_v60 = vpop.f32.mrf.mxu3 }
 0x51c   :  { %v1348_v63 = vrot.slane %v1326_v55, 4  ;;  %v1349_v0 = vrot.slane %v1339_v60, 2  ;;  %v1302_v3 = vpop.f32.mrf.mxu0  ;;  %v1315_v8 = vpop.f32.mrf.mxu1  ;;  %v392_v55 = vrot.slane %v3766_v32, 6 }
 0x51e   :  { %v1351_v14 = vsel %vm359_vm0, %v1348_v63, %v1349_v0 }
 0x51f   :  { %v1352_v20 = vsel %vm361_vm5, %v1350_v9, %v1351_v14 }
 0x520   :  { %v1354_v22 = vadd.f32 %v1352_v20, %v388_v10 }
 0x522   :  { %v2681_v23 = vmul.f32 -1.442695, %v1354_v22  ;;  %v1375_v47 = vrot.slane %v1354_v22, 6 }
 0x523   :  { %v1328_v28 = vpop.f32.mrf.mxu2  ;;  %v1341_v33 = vpop.f32.mrf.mxu3 }
 0x524   :  { %3004 = vpow2.f32 %v2681_v23 }
 0x52a   :  { %v3005_v34 = vpop.eup %3004 }
 0x52b   :  { %v1358_v35 = vadd.f32 1.0, %v3005_v34 }
 0x52d   :  { %3006 = vrcp.f32 %v1358_v35  ;;  %v1370_v54 = vand.u32 2147483648, %v1358_v35  ;;  %v1368_v31 = vand.u32 2147483647, %v1358_v35  ;;  %vm1364_vm8 = vweird.f32 %v1358_v35 }
 0x52e   :  { %3008 = vtanh.f32 %v1375_v47 }
 0x52f   :  { %v1371_v2 = vor.u32 1.1754944e-38, %v1370_v54  ;;  %vm1369_vm1 = vcmp.eq.f32.partialorder %v1368_v31, 8.507059e+37 }
 0x533   :  { %v3007_v39 = vpop.eup %3006 }
 0x534   :  { %v1360_v46 = vmul.f32 %v3007_v39, %v1358_v35  ;;  %vm1365_vm7 = vweird.f32 %v3007_v39  ;;  %v3009_v19 = vpop.eup %3008 }
 0x535   :  { %vm1366_vm9 = vmor %vm1364_vm8, %vm1365_vm7  ;;  %vm1870_vm7 = vcmask 519168   ;;  %vm2227_vm8 = vcmask 58368  }
 0x536   :  { %v1361_v48 = vsub.f32 1.0, %v1360_v46 }
 0x538   :  { %v1362_v62 = vmul.f32 %v3007_v39, %v1361_v48 }
 0x53a   :  { %v1363_v1 = vadd.f32 %v3007_v39, %v1362_v62 }
 0x53c   :  { %v1367_v7 = vsel %vm1366_vm9, %v3007_v39, %v1363_v1  ;;  %vm2401_vm9 = vcmask 17408  }
 0x53d   :  { %v1372_v17 = vsel %vm1369_vm1, %v1371_v2, %v1367_v7 }
 0x53e   :  { %v1379_v18 = vrot.slane %v1372_v17, 2  ;;  %v1382_v56 = vmul.f32 %v3009_v19, %v1372_v17  ;;  %v1385_v4 = vrot.slane %v1372_v17, 4 }
 0x540   :  { %v1381_v59 = vmul.f32 %v1379_v18, %v1289_v21 }
 0x542   :  { %v4039_v57 = vadd.f32 %v1382_v56, %v1381_v59 }
 0x544   :  { %3010 = vtanh.f32 %v4039_v57  ;;  %v1405_v62 = vsel %vm1169_vm15, %v4039_v57, %v3912_v41 }
 0x54a   :  { %v3011_v5 = vpop.eup %3010 }
 0x54b   :  { %v1387_v11 = vmul.f32 %v3011_v5, %v1385_v4 }
 0x54d   :  { %3012 = vtanh.f32 %v1387_v11  ;;  %v1404_v58 = vsel %vm1169_vm15, %v1387_v11, %v3915_v44  ;;  %vm1724_vm15 = vcmask 523264  }
 0x54e   :  { %v1406_v6 = vpack.c.bf16 %v1404_v58, %v1404_v58 }
 0x550   :  { %1415 = vmatmul.bf16.vlgmr.msra.gmra.mxu0 %v1406_v6  ;;  %1428 = vmatmul.bf16.vlgmr.msra.gmra.mxu1 %v1406_v6 }
 0x551   :  { %1441 = vmatmul.bf16.vlgmr.msra.gmra.mxu2 %v1406_v6  ;;  %1454 = vmatmul.bf16.vlgmr.msra.gmra.mxu3 %v1406_v6 }
 0x553   :  { %v3013_v15 = vpop.eup %3012 }
 0x554   :  { %v1390_v12 = vrot.slane %v3013_v15, 1  ;;  %v1391_v13 = vrot.slane %v3013_v15, 2  ;;  %v1392_v16 = vrot.slane %v3013_v15, 3 }
 0x556   :  { %v1393_v25 = vsel %vm695_vm10, %v3013_v15, %v1390_v12  ;;  %v1394_v40 = vsel %vm697_vm11, %v1391_v13, %v1392_v16  ;;  %v1396_v26 = vsel %vm700_vm12, %v3013_v15, %v1390_v12  ;;  %v1397_v36 = vsel %vm702_vm13, %v1391_v13, %v1392_v16 }
 0x557   :  { %v1395_v49 = vsel %vm357_vm3, %v1393_v25, %v1394_v40  ;;  %v1398_v44 = vsel %vm704_vm14, %v1396_v26, %v1397_v36  ;;  %v1523_v16 = vshrl.u32 %v1167_v27, 7  ;;  %v3076_v40 = vmov 0.0  }
 0x558   :  { %1402 = vst [vmem:[#allocation2 + $0x6] sm:$0x1] %v1395_v49  ;;  %v1399_v50 = vrot.slane %v1398_v44, 1 }
 0x559   :  { %2939 = vset.pattern.permute.xlu0 %v1523_v16  ;;  %2938 = vset.pattern.permute.xlu2 %v1523_v16  ;;  %v1524_v25 = vadd.s32 %v1523_v16, %v3967_v29 }
 0x55a   :  { %1403 = vst [vmem:[#allocation2 + $0xe] sm:$0x1] %v1399_v50  ;;  %2940 = vset.pattern.permute.xlu1 %v1523_v16 }
 0x5cd   :  { %v1416_v43 = vpop.f32.mrf.mxu0  ;;  %v1429_v30 = vpop.f32.mrf.mxu1 }
 0x5ce   :  { %v1463_v42 = vrot.slane %v1429_v30, 6 }
 0x5d0   :  { %v1466_v52 = vsel %vm357_vm3, %v1416_v43, %v1463_v42 }
 0x5d4   :  { %v1442_v61 = vpop.f32.mrf.mxu2  ;;  %v1455_v53 = vpop.f32.mrf.mxu3 }
 0x5d5   :  { %v1464_v37 = vrot.slane %v1442_v61, 4  ;;  %v1465_v38 = vrot.slane %v1455_v53, 2  ;;  %v1418_v45 = vpop.f32.mrf.mxu0  ;;  %v1431_v51 = vpop.f32.mrf.mxu1  ;;  %v2717_v53 = vld [vmem:[%s4332_s4 + $0x30] sm:$0xf] }
 0x5d6   :  { %v2719_v51 = vld [vmem:[%s4332_s4 + $0x38] sm:$0xf0] }
 0x5d7   :  { %v1467_v60 = vsel %vm359_vm0, %v1464_v37, %v1465_v38  ;;  %v2902_v37 = vld [vmem:[%s4332_s4 + $0x34] sm:$0xf0]  ;;  %v2901_v38 = vld [vmem:[%s4332_s4 + $0x34] sm:$0xf] }
 0x5d8   :  { %v1468_v63 = vsel %vm361_vm5, %v1466_v52, %v1467_v60  ;;  %v2718_v45 = vor.u32 %v2902_v37, %v2717_v53  ;;  %v2722_v52 = vor.u32 %v2901_v38, %v2719_v51  ;;  %v2900_v60 = vld [vmem:[%s4332_s4 + $0x24] sm:$0xf0]  ;;  %v2770_v37 = vld [vmem:[%s4336_s8 + $0x30] sm:$0xf]  ;;  %v2914_v38 = vld [vmem:[%s4336_s8 + $0x34] sm:$0xf0] }
 0x5d9   :  { %v1470_v0 = vadd.f32 %v1468_v63, %v392_v55  ;;  %v2709_v55 = vld [vmem:[%s4332_s4 + $0x20] sm:$0xf]  ;;  %v2899_v63 = vld [vmem:[%s4332_s4 + $0x24] sm:$0xf]  ;;  %v2748_v51 = vld [vmem:[%s4336_s8 + $0x8] sm:$0xf0] }
 0x5db   :  { %v2682_v3 = vmul.f32 -1.442695, %v1470_v0  ;;  %v1491_v23 = vrot.slane %v1470_v0, 6  ;;  %v2710_v0 = vor.u32 %v2900_v60, %v2709_v55 }
 0x5dc   :  { %v1444_v8 = vpop.f32.mrf.mxu2  ;;  %v1457_v9 = vpop.f32.mrf.mxu3 }
 0x5dd   :  { %3014 = vpow2.f32 %v2682_v3  ;;  %v2711_v3 = vld [vmem:[%s4332_s4 + $0x28] sm:$0xf0]  ;;  %v2701_v9 = vld [vmem:[%s4332_s4 + $0x10] sm:$0xf] }
 0x5de   :  { %v2714_v8 = vor.u32 %v2899_v63, %v2711_v3  ;;  %v2762_v63 = vld [vmem:[%s4336_s8 + $0x20] sm:$0xf] }
 0x5e3   :  { %v3015_v10 = vpop.eup %3014 }
 0x5e4   :  { %v1474_v14 = vadd.f32 1.0, %v3015_v10  ;;  %v2898_v10 = vld [vmem:[%s4332_s4 + $0x14] sm:$0xf0] }
 0x5e6   :  { %3016 = vrcp.f32 %v1474_v14  ;;  %v1486_v33 = vand.u32 2147483648, %v1474_v14  ;;  %v1484_v32 = vand.u32 2147483647, %v1474_v14  ;;  %vm1480_vm0 = vweird.f32 %v1474_v14 }
 0x5e7   :  { %3018 = vtanh.f32 %v1491_v23  ;;  %v2693_v23 = vld [vmem:[%s4332_s4] sm:$0xf] }
 0x5e8   :  { %v1487_v39 = vor.u32 1.1754944e-38, %v1486_v33  ;;  %vm1485_vm6 = vcmp.eq.f32.partialorder %v1484_v32, 8.507059e+37  ;;  %v2695_v32 = vld [vmem:[%s4332_s4 + $0x8] sm:$0xf0] }
 0x5ec   :  { %v3017_v20 = vpop.eup %3016 }
 0x5ed   :  { %v1476_v22 = vmul.f32 %v3017_v20, %v1474_v14  ;;  %vm1481_vm2 = vweird.f32 %v3017_v20  ;;  %v3019_v54 = vpop.eup %3018  ;;  %v2897_v14 = vld [vmem:[%s4332_s4 + $0x14] sm:$0xf] }
 0x5ee   :  { %vm1482_vm4 = vmor %vm1480_vm0, %vm1481_vm2 }
 0x5ef   :  { %v1477_v28 = vsub.f32 1.0, %v1476_v22  ;;  %v2703_v22 = vld [vmem:[%s4332_s4 + $0x18] sm:$0xf0] }
 0x5f0   :  { %v2706_v33 = vor.u32 %v2897_v14, %v2703_v22  ;;  %v2908_v22 = vld [vmem:[%s4336_s8 + $0x4] sm:$0xf0] }
 0x5f1   :  { %v1478_v34 = vmul.f32 %v3017_v20, %v1477_v28  ;;  %v2896_v28 = vld [vmem:[%s4332_s4 + $0x4] sm:$0xf0] }
 0x5f3   :  { %v1479_v35 = vadd.f32 %v3017_v20, %v1478_v34  ;;  %v2895_v34 = vld [vmem:[%s4332_s4 + $0x4] sm:$0xf] }
 0x5f5   :  { %v1483_v46 = vsel %vm1482_vm4, %v3017_v20, %v1479_v35  ;;  %v2702_v20 = vor.u32 %v2898_v10, %v2701_v9  ;;  %v2694_v35 = vor.u32 %v2896_v28, %v2693_v23  ;;  %v2754_v9 = vld [vmem:[%s4336_s8 + $0x10] sm:$0xf]  ;;  %v2910_v10 = vld [vmem:[%s4336_s8 + $0x14] sm:$0xf0] }
 0x5f6   :  { %v1488_v47 = vsel %vm1485_vm6, %v1487_v39, %v1483_v46  ;;  %v2698_v39 = vor.u32 %v2895_v34, %v2695_v32  ;;  %v2755_v14 = vor.u32 %v2910_v10, %v2754_v9 }
 0x5f7   :  { %v1495_v48 = vrot.slane %v1488_v47, 2  ;;  %v1498_v1 = vmul.f32 %v3019_v54, %v1488_v47  ;;  %v1501_v7 = vrot.slane %v1488_v47, 4 }
 0x5f9   :  { %v1497_v31 = vmul.f32 %v1495_v48, %v1405_v62 }
 0x5fb   :  { %v1499_v2 = vadd.f32 %v1498_v1, %v1497_v31 }
 0x5fd   :  { %3020 = vtanh.f32 %v1499_v2 }
 0x603   :  { %v3021_v17 = vpop.eup %3020 }
 0x604   :  { %v1503_v18 = vmul.f32 %v3021_v17, %v1501_v7  ;;  %v1678_v17 = vld [vmem:[%s4333_s5] sm:$0x3] }
 0x606   :  { %3022 = vtanh.f32 %v1503_v18  ;;  %v1681_v18 = vperm.slane %v1678_v17, 1 }
 0x60c   :  { %v3023_v19 = vpop.eup %3022 }
 0x60d   :  { %v1506_v21 = vrot.slane %v3023_v19, 1  ;;  %v1507_v59 = vrot.slane %v3023_v19, 2  ;;  %v1508_v56 = vrot.slane %v3023_v19, 3 }
 0x60f   :  { %v1509_v4 = vsel %vm695_vm10, %v3023_v19, %v1506_v21  ;;  %v1510_v5 = vsel %vm697_vm11, %v1507_v59, %v1508_v56  ;;  %v1512_v11 = vsel %vm700_vm12, %v3023_v19, %v1506_v21  ;;  %v1513_v41 = vsel %vm702_vm13, %v1507_v59, %v1508_v56 }
 0x610   :  { %v1511_v57 = vsel %vm357_vm3, %v1509_v4, %v1510_v5  ;;  %v1514_v58 = vsel %vm704_vm14, %v1512_v11, %v1513_v41  ;;  %vm1591_vm3 = vcmp.eq.s32.totalorder %v1524_v25, 3  ;;  %vm1596_vm10 = vcmask 31744  }
 0x611   :  { %1518 = vst [vmem:[#allocation2 + $0x7] sm:$0x1] %v1511_v57  ;;  %v1515_v6 = vrot.slane %v1514_v58, 1  ;;  %v2686_v26 = vsel %vm1591_vm3, 1.0, %v3076_v40  ;;  %vm1525_vm11 = vcmp.eq.s32.totalorder %v1524_v25, 7  ;;  %vm1532_vm13 = vcmask 64512  }
 0x612   :  { %v2683_v43 = vsel %vm1525_vm11, 1.0, %v3076_v40  ;;  %vm1588_vm14 = vcmask 261120   ;;  %v1680_v19 = vperm.slane %v1678_v17, 0 }
 0x613   :  { %1519 = vst [vmem:[#allocation2 + $0xf] sm:$0x1] %v1515_v6 }
 0x618   :  { %v4065_v15 = vld [vmem:[#allocation2] sm:$0xff] }
 0x619   :  { %1646 = vrot.lane.b32.xlu1 %v4065_v15, %s3073_s3  ;;  %1594 = vrot.lane.b32.xlu0 %v4065_v15, %s3074_s21 }
 0x61a   :  { %v4071_v12 = vld [vmem:[#allocation2 + $0x8] sm:$0xff] }
 0x61b   :  { %v2933_v13 = vpack.i.bf16 %v4065_v15, %v4071_v12 }
 0x621   :  { %1648 = vrot.lane.b32.xlu1 %v4071_v12, %s3073_s3  ;;  %1622 = vrot.lane.b32.xlu0 %v4071_v12, %s3074_s21 }
 0x629   :  { %2934 = vrot.lane.b32.xlu0 %v2933_v13, %s3075_s22 }
 0x68b   :  { %v1595_v36 = vpop.permute.xlu0 %1594  ;;  %v1647_v46 = vpop.permute.xlu1 %1646 }
 0x68c   :  { %2687 = vmatpush.msk.msrb.mxu2 %vm361_vm5, %v1595_v36 }
 0x68d   :  { %2688 = vmatmul.msk.f32.vlgmr.msrb.gmra.mxu2 %vm1596_vm10, %v2686_v26 }
 0x693   :  { %v1623_v49 = vpop.permute.xlu0 %1622  ;;  %v1649_v54 = vpop.permute.xlu1 %1648 }
 0x694   :  { %2689 = vmatpush.msk.msrb.mxu3 %vm361_vm5, %v1623_v49  ;;  %v2913_v49 = vld [vmem:[%s4336_s8 + $0x34] sm:$0xf] }
 0x695   :  { %2690 = vmatmul.msk.f32.vlgmr.msrb.gmra.mxu3 %vm1596_vm10, %v2686_v26 }
 0x69b   :  { %v2935_v44 = vpop.permute.xlu0 %2934 }
 0x69c   :  { %v2937_v27 = vunpack.i.h.bf16 %v2935_v44  ;;  %v2936_v50 = vunpack.i.l.bf16 %v2935_v44  ;;  %v2772_v44 = vld [vmem:[%s4336_s8 + $0x38] sm:$0xf0] }
 0x69e   :  { %1551 = vmatpush.msrb.mxu0 %v2937_v27  ;;  %1575 = vmatpush.msrb.mxu1 %v2936_v50  ;;  %v2775_v27 = vor.u32 %v2913_v49, %v2772_v44  ;;  %v2911_v50 = vld [vmem:[%s4336_s8 + $0x24] sm:$0xf] }
 0x69f   :  { %2684 = vmatmul.msk.f32.vlgmr.msrb.gmra.mxu0 %vm1532_vm13, %v2683_v43  ;;  %2685 = vmatmul.msk.f32.vlgmr.msrb.gmra.mxu1 %vm1532_vm13, %v2683_v43  ;;  %v2764_v43 = vld [vmem:[%s4336_s8 + $0x28] sm:$0xf0] }
 0x6a0   :  { %1732 = vmatpush.bf16.msra.mxu0 %v2718_v45  ;;  %1745 = vmatpush.bf16.msra.mxu1 %v2722_v52  ;;  %v2907_v45 = vld [vmem:[%s4336_s8 + $0x4] sm:$0xf]  ;;  %v2771_v52 = vor.u32 %v2914_v38, %v2770_v37 }
 0x6a1   :  { %v2751_v55 = vor.u32 %v2907_v45, %v2748_v51 }
 0x6a4   :  { %1733 = vmatpush.bf16.msra.mxu0 %v2710_v0  ;;  %1746 = vmatpush.bf16.msra.mxu1 %v2714_v8  ;;  %v2912_v0 = vld [vmem:[%s4336_s8 + $0x24] sm:$0xf0] }
 0x6a5   :  { %v2763_v8 = vor.u32 %v2912_v0, %v2762_v63 }
 0x6a8   :  { %1734 = vmatpush.bf16.msra.mxu0 %v2702_v20  ;;  %1747 = vmatpush.bf16.msra.mxu1 %v2706_v33  ;;  %v2746_v20 = vld [vmem:[%s4336_s8] sm:$0xf] }
 0x6a9   :  { %v2747_v23 = vor.u32 %v2908_v22, %v2746_v20 }
 0x6ac   :  { %1735 = vmatpush.bf16.msra.mxu0 %v2694_v35  ;;  %1748 = vmatpush.bf16.msra.mxu1 %v2698_v39 }
 0x6b0   :  { %2022 = vmatpush.bf16.msrb.mxu0 %v2775_v27 }
 0x710   :  { %v1619_v30 = vpop.f32.mrf.mxu2 }
 0x711   :  { %1654 = vrot.lane.b32.xlu2 %v1619_v30, %s3074_s21  ;;  %v2767_v30 = vor.u32 %v2911_v50, %v2764_v43 }
 0x713   :  { %2023 = vmatpush.bf16.msrb.mxu0 %v2767_v30  ;;  %v2903_v30 = vld [vmem:[%s4334_s6] sm:$0xff] }
 0x718   :  { %v1643_v42 = vpop.f32.mrf.mxu3 }
 0x719   :  { %1656 = vrot.lane.b32.xlu2 %v1643_v42, %s3074_s21  ;;  %v2909_v42 = vld [vmem:[%s4336_s8 + $0x14] sm:$0xf] }
 0x71c   :  { %v1553_v61 = vpop.f32.mrf.mxu0  ;;  %v1577_v7 = vpop.f32.mrf.mxu1 }
 0x71d   :  { %1582 = vrot.lane.b32.xlu0 %v1553_v61, %s3074_s21  ;;  %v2756_v61 = vld [vmem:[%s4336_s8 + $0x18] sm:$0xf0] }
 0x71e   :  { %v2759_v53 = vor.u32 %v2909_v42, %v2756_v61 }
 0x720   :  { %2024 = vmatpush.bf16.msrb.mxu0 %v2759_v53 }
 0x724   :  { %2025 = vmatpush.bf16.msrb.mxu0 %v2751_v55 }
 0x76b   :  { %v1655_v47 = vpop.permute.xlu2 %1654 }
 0x76c   :  { %v1660_v48 = vsel %vm1588_vm14, %v1647_v46, %v1655_v47 }
 0x76d   :  { %1664 = vst [vmem:[#allocation1] ss:$2 sm:$0xff] %v1660_v48 }
 0x773   :  { %v1657_v62 = vpop.permute.xlu2 %1656 }
 0x774   :  { %v1661_v31 = vsel %vm1588_vm14, %v1649_v54, %v1657_v62 }
 0x775   :  { %1666 = vst [vmem:[#allocation1 + $0x1] ss:$2 sm:$0xff] %v1661_v31 }
 0x77c   :  { %v1667_v1 = vld.sshfl [vmem:[#allocation1] sm:$0xff pattern:$0x75316420] }
 0x77d   :  { %v1669_v2 = vpack.c.bf16 %v1667_v1, %v1667_v1 }
 0x77f   :  { %2723 = vmatmul.msk.bf16.vlgmr.msra.gmra.mxu0 %vm1724_vm15, %v1669_v2  ;;  %2724 = vmatmul.msk.bf16.vlgmr.msra.gmra.mxu1 %vm1724_vm15, %v1669_v2 }
 0x78f   :  { %v1583_v34 = vpop.permute.xlu0 %1582 }
 0x790   :  { %v4201_v35 = vsel %vm1588_vm14, %v4065_v15, %v1583_v34 }
 0x7fc   :  { %v1737_v21 = vpop.f32.mrf.mxu0  ;;  %v1750_v59 = vpop.f32.mrf.mxu1 }
 0x7fd   :  { %v1751_v56 = vadd.f32 %v1750_v59, %v1681_v18  ;;  %v1738_v4 = vadd.f32 %v1737_v21, %v1680_v19 }
 0x7ff   :  { %v1756_v5 = vrot.slane %v1751_v56, 4 }
 0x801   :  { %v1757_v11 = vsel %vm361_vm5, %v1738_v4, %v1756_v5  ;;  %v1758_v41 = vsel %vm361_vm5, %v1756_v5, %v1738_v4  ;;  %vm1812_vm5 = vcmask 27648  }
 0x802   :  { %v1759_v57 = vrot.slane %v1758_v41, 4  ;;  %1861 = vst [vmem:[#allocation1] ss:$2 sm:$0xff] %v1757_v11  ;;  %v1762_v58 = vpack.c.bf16 %v1757_v11, %v1757_v11 }
 0x804   :  { %1864 = vst [vmem:[#allocation1 + $0x10] ss:$2 sm:$0xff] %v1759_v57  ;;  %v1739_v6 = vpop.f32.mrf.mxu0  ;;  %v1752_v13 = vpop.f32.mrf.mxu1  ;;  %v1765_v16 = vunpack.c.l.b16 %v1762_v58  ;;  %v1763_v25 = vpack.c.bf16 %v1759_v57, %v1759_v57 }
 0x806   :  { %v1766_v40 = vpack.c.b16 %v1765_v16, %v1765_v16  ;;  %v1789_v26 = vunpack.c.l.b16 %v1763_v25 }
 0x808   :  { %1767 = vrot.lane.b32.xlu1 %v1766_v40, %s3073_s3  ;;  %v1790_v36 = vpack.c.b16 %v1789_v26, %v1789_v26  ;;  %v2905_v26 = vld [vmem:[%s4334_s6 + $0x10] sm:$0xff] }
 0x80a   :  { %1791 = vrot.lane.b32.xlu2 %v1790_v36, %s3073_s3  ;;  %v2904_v36 = vld [vmem:[%s4334_s6 + $0x8] sm:$0xff] }
 0x80b   :  { %v1865_v34 = vld.sshfl [vmem:[#allocation1 + $0x18] sm:$0xff pattern:$0x75316420] }
 0x810   :  { %1584 = vrot.lane.b32.xlu1 %v1577_v7, %s3074_s21 }
 0x864   :  { %v1792_v60 = vpop.permute.xlu2 %1791 }
 0x865   :  { %v1797_v3 = vsel %vm1724_vm15, %v1792_v60, 0 }
 0x866   :  { %1806 = vmatpush.bf16.xpose.msra.mxu3 %v1797_v3 }
 0x86d   :  { %2726 = vmatmul.msk.bf16.vlgmr.msra.gmra.mxu3 %vm1724_vm15, %v1763_v25  ;;  %v2906_v25 = vld [vmem:[%s4334_s6 + $0x18] sm:$0xff] }
 0x86e   :  { %2008 = vmatpush.bf16.msrb.mxu3 %v2771_v52 }
 0x872   :  { %2009 = vmatpush.bf16.msrb.mxu3 %v2763_v8 }
 0x876   :  { %2010 = vmatpush.bf16.msrb.mxu3 %v2755_v14 }
 0x87a   :  { %2011 = vmatpush.bf16.msrb.mxu3 %v2747_v23  ;;  %v1768_v28 = vpop.permute.xlu1 %1767  ;;  %v1862_v23 = vld.sshfl [vmem:[#allocation1 + $0x8] sm:$0xff pattern:$0x75316420] }
 0x87b   :  { %v1773_v33 = vsel %vm1724_vm15, %v1768_v28, 0 }
 0x87c   :  { %1782 = vmatpush.bf16.xpose.msra.mxu2 %v1773_v33 }
 0x882   :  { %v1585_v32 = vpop.permute.xlu1 %1584 }
 0x883   :  { %v4205_v39 = vsel %vm1588_vm14, %v4071_v12, %v1585_v32  ;;  %2725 = vmatmul.msk.bf16.vlgmr.msra.gmra.mxu2 %vm1724_vm15, %v1762_v58  ;;  %v4216_v12 = vld [vmem:[%s4337_s9] sm:$0x3] }
 0x884   :  { %v1946_v46 = vpack.c.bf16 %v4205_v39, %v4201_v35  ;;  %v1957_v62 = vperm.slane %v4216_v12, 0  ;;  %1937 = vmatpush.bf16.msrb.mxu2 %v2906_v25 }
 0x886   :  { %2776 = vmatmul.msk.bf16.vlgmr.msrb.gmra.mxu3 %vm1724_vm15, %v1946_v46  ;;  %2777 = vmatmul.msk.bf16.vlgmr.msrb.gmra.mxu0 %vm1724_vm15, %v1946_v46 }
 0x888   :  { %1938 = vmatpush.bf16.msrb.mxu2 %v2905_v26 }
 0x88c   :  { %1939 = vmatpush.bf16.msrb.mxu2 %v2904_v36  ;;  %v1895_v36 = vld [vmem:[%s4335_s7] sm:$0x1] }
 0x890   :  { %1940 = vmatpush.bf16.msrb.mxu2 %v2903_v30 }
 0x8f0   :  { %v1808_v47 = vpop.f32.mrf.mxu3 }
 0x8f1   :  { %v1816_v48 = vsel %vm1812_vm5, %v1808_v47, -inf }
 0x8f2   :  { %1817 = vmax.xlane.f32.xlu0 %v1816_v48 }
 0x8f8   :  { %v1810_v15 = vpop.f32.mrf.mxu3 }
 0x906   :  { %v1784_v54 = vpop.f32.mrf.mxu2 }
 0x907   :  { %v1813_v31 = vsel %vm1812_vm5, %v1784_v54, -inf }
 0x908   :  { %1814 = vmax.xlane.f32.xlu2 %v1813_v31 }
 0x909   :  { %v2013_v1 = vpop.f32.mrf.mxu3 }
 0x90a   :  { %v2014_v2 = vadd.f32 %v2013_v1, %v1957_v62 }
 0x90c   :  { %v2032_v8 = vpack.c.bf16 %v2014_v2, %v2014_v2 }
 0x90e   :  { %v1786_v7 = vpop.f32.mrf.mxu2  ;;  %v2035_v14 = vunpack.c.l.b16 %v2032_v8 }
 0x910   :  { %v2036_v22 = vpack.c.b16 %v2035_v14, %v2035_v14 }
 0x911   :  { %v2015_v57 = vpop.f32.mrf.mxu3 }
 0x912   :  { %v2016_v58 = vadd.f32 %v2015_v57, %v1957_v62 }
 0x914   :  { %v4222_v6 = vpack.c.bf16 %v2016_v58, %v2016_v58 }
 0x916   :  { %v2059_v13 = vunpack.c.l.b16 %v4222_v6 }
 0x918   :  { %v2060_v16 = vpack.c.b16 %v2059_v13, %v2059_v13 }
 0x965   :  { %v1818_v17 = vpop.xlane.xlu0 %1817 }
 0x966   :  { %v1820_v18 = vsub.f32 %v1808_v47, %v1818_v17 }
 0x968   :  { %v1823_v19 = vmul.f32 1.442695, %v1820_v18 }
 0x96a   :  { %3024 = vpow2.f32 %v1823_v19 }
 0x970   :  { %v3025_v21 = vpop.eup %3024 }
 0x971   :  { %v1828_v59 = vsel %vm1812_vm5, %v3025_v21, 0.0 }
 0x972   :  { %1829 = vadd.xlane.f32.xlu2 %v1828_v59 }
 0x97b   :  { %v1815_v56 = vpop.xlane.xlu2 %1814 }
 0x97c   :  { %v1819_v4 = vsub.f32 %v1784_v54, %v1815_v56 }
 0x97e   :  { %v1821_v5 = vmul.f32 1.442695, %v1819_v4 }
 0x980   :  { %3026 = vpow2.f32 %v1821_v5 }
 0x986   :  { %v3027_v11 = vpop.eup %3026 }
 0x987   :  { %v1825_v41 = vsel %vm1812_vm5, %v3027_v11, 0.0 }
 0x988   :  { %1826 = vadd.xlane.f32.xlu1 %v1825_v41 }
 0x9a1   :  { %2061 = vrot.lane.b32.xlu1 %v2060_v16, %s3073_s3 }
 0x9e5   :  { %v1830_v40 = vpop.xlane.xlu2 %1829 }
 0x9e6   :  { %3028 = vrcp.f32 %v1830_v40 }
 0x9ec   :  { %v3029_v49 = vpop.eup %3028 }
 0x9ed   :  { %v1834_v44 = vmul.f32 %v3029_v49, %v3025_v21  ;;  %v1896_v49 = vmul.f32 4.0, %v1895_v36 }
 0x9ef   :  { %v1842_v27 = vsel %vm1812_vm5, %v1834_v44, 0.0 }
 0x9f0   :  { %v1843_v50 = vrot.slane %v1842_v27, 4 }
 0x9f2   :  { %v1844_v43 = vadd.f32 %v1843_v50, %v1842_v27  ;;  %v1898_v27 = vperm.slane %v1896_v49, 0 }
 0x9f4   :  { %v1845_v42 = vrot.slane %v1844_v43, 2 }
 0x9f6   :  { %v1846_v61 = vadd.f32 %v1845_v42, %v1844_v43 }
 0x9f8   :  { %v1847_v53 = vrot.slane %v1846_v61, 1 }
 0x9fa   :  { %v1848_v37 = vadd.f32 %v1847_v53, %v1846_v61 }
 0x9fb   :  { %v1827_v38 = vpop.xlane.xlu1 %1826 }
 0x9fc   :  { %3030 = vrcp.f32 %v1827_v38  ;;  %1859 = vperm.xlu0 %2939, %v1848_v37  }
 0xa02   :  { %v3031_v45 = vpop.eup %3030 }
 0xa03   :  { %v1833_v51 = vmul.f32 %v3031_v45, %v3027_v11 }
 0xa05   :  { %v1835_v52 = vsel %vm1812_vm5, %v1833_v51, 0.0 }
 0xa06   :  { %v1836_v55 = vrot.slane %v1835_v52, 4 }
 0xa08   :  { %v1837_v60 = vadd.f32 %v1836_v55, %v1835_v52 }
 0xa0a   :  { %v1838_v63 = vrot.slane %v1837_v60, 2 }
 0xa0c   :  { %v1839_v0 = vadd.f32 %v1838_v63, %v1837_v60 }
 0xa0e   :  { %v1840_v3 = vrot.slane %v1839_v0, 1 }
 0xa10   :  { %v1841_v9 = vadd.f32 %v1840_v3, %v1839_v0 }
 0xa12   :  { %1853 = vperm.xlu2 %2938, %v1841_v9  }
 0xa13   :  { %v2062_v10 = vpop.permute.xlu1 %2061 }
 0xa14   :  { %v2067_v20 = vsel %vm1724_vm15, %v2062_v10, 0 }
 0xa15   :  { %2076 = vmatpush.bf16.xpose.msra.mxu2 %v2067_v20 }
 0xa1a   :  { %2037 = vrot.lane.b32.xlu2 %v2036_v22, %s3073_s3  ;;  %s3077_s3 = smov [#allocation3]  }
 0xa1b   :  { %2941 = vset.pattern.permute.xlu2 %v3072_v24  ;;  %s2408_s7 = sshll.u32 %s3077_s3, 4  ;;  %s2409_s7 = int_to_ptr.vmem [resolvable:$true] %s2408_s7 }
 0xa6c   :  { %v1854_v28 = vpop.permute.xlu2 %1853 }
 0xa6d   :  { %v1868_v33 = vmul.f32 %v1862_v23, %v1854_v28 }
 0xa6e   :  { %v1860_v32 = vpop.permute.xlu0 %1859 }
 0xa6f   :  { %v1871_v46 = vsel %vm1870_vm7, %v1868_v33, 0.0  ;;  %v1869_v47 = vmul.f32 %v1865_v34, %v1860_v32 }
 0xa70   :  { %v1872_v48 = vrot.slane %v1871_v46, 4 }
 0xa71   :  { %v1878_v15 = vsel %vm1870_vm7, %v1869_v47, 0.0 }
 0xa72   :  { %v1873_v54 = vadd.f32 %v1872_v48, %v1871_v46  ;;  %v1879_v62 = vrot.slane %v1878_v15, 4 }
 0xa74   :  { %v1874_v31 = vrot.slane %v1873_v54, 2  ;;  %v1880_v1 = vadd.f32 %v1879_v62, %v1878_v15  ;;  %v2038_v2 = vpop.permute.xlu2 %2037 }
 0xa75   :  { %v2043_v7 = vsel %vm1724_vm15, %v2038_v2, 0 }
 0xa76   :  { %v1875_v17 = vadd.f32 %v1874_v31, %v1873_v54  ;;  %v1881_v18 = vrot.slane %v1880_v1, 2  ;;  %2052 = vmatpush.bf16.xpose.msrb.mxu1 %v2043_v7 }
 0xa78   :  { %v1876_v19 = vrot.slane %v1875_v17, 1  ;;  %v1882_v21 = vadd.f32 %v1881_v18, %v1880_v1 }
 0xa7a   :  { %v1877_v59 = vadd.f32 %v1876_v19, %v1875_v17  ;;  %v1883_v56 = vrot.slane %v1882_v21, 1 }
 0xa7c   :  { %v1885_v4 = vpack.c.bf16 %v1877_v59, %v1877_v59  ;;  %v1884_v5 = vadd.f32 %v1883_v56, %v1882_v21 }
 0xa7d   :  { %2778 = vmatmul.msk.bf16.vlgmr.msrb.gmra.mxu1 %vm1724_vm15, %v2032_v8 }
 0xa7e   :  { %v1886_v11 = vpack.c.bf16 %v1884_v5, %v1884_v5  ;;  %v1902_v41 = vunpack.c.l.b16 %v1885_v4 }
 0xa80   :  { %v1903_v57 = vunpack.c.l.b16 %v1886_v11  ;;  %v2918_v11 = vld [vmem:[%s4338_s10 + $0x18] sm:$0xff] }
 0xa81   :  { %2198 = vmatpush.bf16.msra.mxu3 %v2918_v11 }
 0xa82   :  { %v1904_v58 = vsel %vm700_vm12, %v1903_v57, %v1902_v41  ;;  %v1958_v41 = vperm.slane %v4216_v12, 1  ;;  %v2027_v57 = vpop.f32.mrf.mxu0  ;;  %v2915_v12 = vld [vmem:[%s4338_s10] sm:$0xff] }
 0xa83   :  { %v1905_v13 = vpack.c.b16 %v1904_v58, %v1904_v58  ;;  %v2917_v58 = vld [vmem:[%s4338_s10 + $0x10] sm:$0xff] }
 0xa85   :  { %2743 = vmatmul.msk.bf16.vlgmr.msrb.gmra.mxu2 %vm1724_vm15, %v1905_v13  ;;  %2199 = vmatpush.bf16.msra.mxu3 %v2917_v58 }
 0xa95   :  { %2779 = vmatmul.msk.bf16.vlgmr.msra.gmra.mxu2 %vm1724_vm15, %v4222_v6 }
 0xafa   :  { %v2054_v16 = vpop.f32.mrf.mxu1 }
 0xafb   :  { %v2082_v25 = vsel %vm1532_vm13, %v2054_v16, -inf }
 0xafc   :  { %2083 = vmax.xlane.f32.xlu1 %v2082_v25 }
 0xb02   :  { %v2056_v40 = vpop.f32.mrf.mxu1 }
 0xb03   :  { %v2916_v40 = vld [vmem:[%s4338_s10 + $0x8] sm:$0xff] }
 0xb04   :  { %2200 = vmatpush.bf16.msra.mxu3 %v2916_v40 }
 0xb08   :  { %v1942_v26 = vpop.f32.mrf.mxu2  ;;  %2201 = vmatpush.bf16.msra.mxu3 %v2915_v12 }
 0xb09   :  { %v1943_v50 = vadd.f32 %v1942_v26, %v1898_v27 }
 0xb0b   :  { %v2209_v30 = vperm.slane %v1943_v50, 0  ;;  %v2208_v0 = vrot.slane %v1943_v50, 1 }
 0xb0d   :  { %v2213_v6 = vmul.f32 %v2209_v30, %v4201_v35  ;;  %v2210_v8 = vperm.slane %v2208_v0, 0 }
 0xb0f   :  { %v2215_v53 = vsel %vm1724_vm15, %v2213_v6, 0.0  ;;  %v2214_v10 = vmul.f32 %v2210_v8, %v4205_v39 }
 0xb10   :  { %v1944_v44 = vpop.f32.mrf.mxu2 }
 0xb11   :  { %v2218_v14 = vsel %vm1724_vm15, %v2214_v10, 0.0 }
 0xb18   :  { %v2078_v43 = vpop.f32.mrf.mxu2 }
 0xb19   :  { %v2085_v42 = vsel %vm1532_vm13, %v2078_v43, -inf }
 0xb1a   :  { %2086 = vmax.xlane.f32.xlu2 %v2085_v42  ;;  %v2029_v42 = vpop.f32.mrf.mxu0 }
 0xb20   :  { %v2080_v61 = vpop.f32.mrf.mxu2 }
 0xb22   :  { %2216 = vadd.xlane.f32.xlu2 %v2215_v53 }
 0xb6f   :  { %v2084_v37 = vpop.xlane.xlu1 %2083 }
 0xb70   :  { %v2088_v38 = vsub.f32 %v2054_v16, %v2084_v37  ;;  %v2028_v16 = vadd.f32 %v2027_v57, %v1958_v41  ;;  %v2030_v37 = vadd.f32 %v2029_v42, %v1958_v41 }
 0xb72   :  { %v2090_v45 = vmul.f32 1.442695, %v2088_v38 }
 0xb74   :  { %3032 = vpow2.f32 %v2090_v45 }
 0xb7a   :  { %v3033_v51 = vpop.eup %3032 }
 0xb7b   :  { %v2094_v52 = vsel %vm1532_vm13, %v3033_v51, 0.0 }
 0xb7c   :  { %2095 = vadd.xlane.f32.xlu0 %v2094_v52 }
 0xb8d   :  { %v2087_v55 = vpop.xlane.xlu2 %2086 }
 0xb8e   :  { %v2089_v60 = vsub.f32 %v2078_v43, %v2087_v55 }
 0xb90   :  { %v2092_v63 = vmul.f32 1.442695, %v2089_v60 }
 0xb92   :  { %3034 = vpow2.f32 %v2092_v63 }
 0xb95   :  { %v2217_v54 = vpop.xlane.xlu2 %2216 }
 0xb96   :  { %v2223_v2 = vperm.slane %v2217_v54, %v3967_v29 }
 0xb98   :  { %v3035_v3 = vpop.eup %3034 }
 0xb99   :  { %v2097_v9 = vsel %vm1532_vm13, %v3035_v3, 0.0 }
 0xb9a   :  { %2098 = vadd.xlane.f32.xlu1 %v2097_v9 }
 0xba2   :  { %2219 = vadd.xlane.f32.xlu1 %v2218_v14 }
 0xbef   :  { %v2096_v20 = vpop.xlane.xlu0 %2095 }
 0xbf0   :  { %3036 = vrcp.f32 %v2096_v20 }
 0xbf6   :  { %v3037_v22 = vpop.eup %3036 }
 0xbf7   :  { %v2102_v23 = vmul.f32 %v3037_v22, %v3033_v51 }
 0xbf9   :  { %v2104_v28 = vsel %vm1532_vm13, %v2102_v23, 0.0 }
 0xbfa   :  { %v2105_v33 = vrot.slane %v2104_v28, 4 }
 0xbfc   :  { %v2106_v34 = vadd.f32 %v2105_v33, %v2104_v28 }
 0xbfe   :  { %v2107_v32 = vrot.slane %v2106_v34, 2 }
 0xc00   :  { %v2108_v46 = vadd.f32 %v2107_v32, %v2106_v34 }
 0xc02   :  { %v2109_v47 = vrot.slane %v2108_v46, 1 }
 0xc04   :  { %v2110_v48 = vadd.f32 %v2109_v47, %v2108_v46  ;;  %v2922_v46 = vld [vmem:[%s4340_s12 + $0x18] sm:$0xff]  ;;  %v2921_v47 = vld [vmem:[%s4340_s12 + $0x10] sm:$0xff] }
 0xc05   :  { %2387 = vmatpush.bf16.msra.mxu1 %v2922_v46 }
 0xc06   :  { %2122 = vperm.xlu0 %2939, %v2110_v48   ;;  %v2920_v48 = vld [vmem:[%s4340_s12 + $0x8] sm:$0xff] }
 0xc09   :  { %2388 = vmatpush.bf16.msra.mxu1 %v2921_v47 }
 0xc0d   :  { %v2099_v15 = vpop.xlane.xlu1 %2098  ;;  %2389 = vmatpush.bf16.msra.mxu1 %v2920_v48 }
 0xc0e   :  { %3038 = vrcp.f32 %v2099_v15  ;;  %2942 = vset.pattern.permute.xlu0 %v3072_v24 }
 0xc14   :  { %v3039_v62 = vpop.eup %3038 }
 0xc15   :  { %v2103_v31 = vmul.f32 %v3039_v62, %v3035_v3  ;;  %v2220_v1 = vpop.xlane.xlu1 %2219 }
 0xc16   :  { %v2224_v7 = vperm.slane %v2220_v1, %v3967_v29 }
 0xc17   :  { %v2111_v17 = vsel %vm1532_vm13, %v2103_v31, 0.0 }
 0xc18   :  { %v2225_v18 = vsel %vm700_vm12, %v2224_v7, %v2223_v2  ;;  %v2112_v19 = vrot.slane %v2111_v17, 4  ;;  %v2919_v2 = vld [vmem:[%s4340_s12] sm:$0xff] }
 0xc19   :  { %v2228_v21 = vsel %vm2227_vm8, %v2225_v18, -inf  ;;  %2390 = vmatpush.bf16.msra.mxu1 %v2919_v2 }
 0xc1a   :  { %2229 = vmax.xlane.f32.xlu2 %v2228_v21  ;;  %v2113_v59 = vadd.f32 %v2112_v19, %v2111_v17  ;;  %v2156_v17 = vld [vmem:[%s4339_s11] sm:$0x1] }
 0xc1b   :  { %v2157_v18 = vmul.f32 8.0, %v2156_v17 }
 0xc1c   :  { %v2114_v56 = vrot.slane %v2113_v59, 2 }
 0xc1d   :  { %v2159_v19 = vperm.slane %v2157_v18, 0 }
 0xc1e   :  { %v2115_v24 = vadd.f32 %v2114_v56, %v2113_v59 }
 0xc20   :  { %v2116_v4 = vrot.slane %v2115_v24, 1 }
 0xc22   :  { %v2117_v5 = vadd.f32 %v2116_v4, %v2115_v24 }
 0xc24   :  { %2128 = vperm.xlu1 %2940, %v2117_v5  }
 0xc78   :  { %v2123_v13 = vpop.permute.xlu0 %2122 }
 0xc79   :  { %v2130_v25 = vmul.f32 %v2123_v13, %v2028_v16  ;;  %v2926_v16 = vld [vmem:[%s4341_s13 + $0x18] sm:$0xff] }
 0xc7a   :  { %2347 = vmatpush.bf16.msra.mxu0 %v2926_v16 }
 0xc7b   :  { %v2132_v26 = vsel %vm1724_vm15, %v2130_v25, 0.0  ;;  %v2925_v25 = vld [vmem:[%s4341_s13 + $0x10] sm:$0xff] }
 0xc7c   :  { %v2133_v36 = vrot.slane %v2132_v26, 4 }
 0xc7e   :  { %v2134_v50 = vadd.f32 %v2133_v36, %v2132_v26  ;;  %2348 = vmatpush.bf16.msra.mxu0 %v2925_v25  ;;  %v2924_v26 = vld [vmem:[%s4341_s13 + $0x8] sm:$0xff]  ;;  %v2923_v36 = vld [vmem:[%s4341_s13] sm:$0xff] }
 0xc80   :  { %v2135_v53 = vrot.slane %v2134_v50, 2 }
 0xc82   :  { %v2136_v51 = vadd.f32 %v2135_v53, %v2134_v50  ;;  %2349 = vmatpush.bf16.msra.mxu0 %v2924_v26 }
 0xc84   :  { %v2137_v0 = vrot.slane %v2136_v51, 1 }
 0xc86   :  { %v2138_v9 = vadd.f32 %v2137_v0, %v2136_v51  ;;  %2350 = vmatpush.bf16.msra.mxu0 %v2923_v36 }
 0xc88   :  { %v2146_v20 = vpack.c.bf16 %v2138_v9, %v2138_v9 }
 0xc8a   :  { %v2163_v28 = vunpack.c.l.b16 %v2146_v20 }
 0xc8d   :  { %v2230_v49 = vpop.xlane.xlu2 %2229 }
 0xc8e   :  { %v2232_v44 = vperm.slane %v2230_v49, 0  ;;  %v2233_v27 = vperm.slane %v2230_v49, 1 }
 0xc90   :  { %v2236_v43 = vsub.f32 %v2217_v54, %v2232_v44  ;;  %v2237_v30 = vsub.f32 %v2220_v1, %v2233_v27 }
 0xc92   :  { %v2238_v6 = vmul.f32 1.442695, %v2236_v43  ;;  %v2240_v61 = vmul.f32 1.442695, %v2237_v30 }
 0xc94   :  { %3040 = vpow2.f32 %v2238_v6 }
 0xc95   :  { %3042 = vpow2.f32 %v2240_v61 }
 0xc96   :  { %v2129_v38 = vpop.permute.xlu1 %2128 }
 0xc97   :  { %v2131_v45 = vmul.f32 %v2129_v38, %v2030_v37 }
 0xc99   :  { %v2139_v52 = vsel %vm1724_vm15, %v2131_v45, 0.0 }
 0xc9a   :  { %v3041_v55 = vpop.eup %3040  ;;  %v2140_v60 = vrot.slane %v2139_v52, 4 }
 0xc9b   :  { %v3043_v63 = vpop.eup %3042  ;;  %2245 = vperm.xlu2 %2941, %v3041_v55  }
 0xc9c   :  { %v2141_v3 = vadd.f32 %v2140_v60, %v2139_v52  ;;  %2248 = vperm.xlu0 %2942, %v3043_v63  }
 0xc9e   :  { %v2142_v8 = vrot.slane %v2141_v3, 2 }
 0xca0   :  { %v2143_v10 = vadd.f32 %v2142_v8, %v2141_v3 }
 0xca2   :  { %v2144_v14 = vrot.slane %v2143_v10, 1 }
 0xca4   :  { %v2145_v22 = vadd.f32 %v2144_v14, %v2143_v10 }
 0xca6   :  { %v2147_v23 = vpack.c.bf16 %v2145_v22, %v2145_v22 }
 0xca8   :  { %v2164_v33 = vunpack.c.l.b16 %v2147_v23 }
 0xcaa   :  { %v2165_v34 = vsel %vm700_vm12, %v2164_v33, %v2163_v28 }
 0xcab   :  { %v2166_v32 = vpack.c.b16 %v2165_v34, %v2165_v34 }
 0xcad   :  { %2796 = vmatmul.msk.bf16.vlgmr.msra.gmra.mxu3 %vm1724_vm15, %v2166_v32 }
 0xcf5   :  { %v2246_v15 = vpop.permute.xlu2 %2245 }
 0xcf6   :  { %v2250_v62 = vperm.slane %v2246_v15, %v3967_v29 }
 0xd0e   :  { %v2249_v54 = vpop.permute.xlu0 %2248 }
 0xd0f   :  { %v2251_v31 = vperm.slane %v2249_v54, %v3967_v29 }
 0xd11   :  { %v2252_v1 = vsel %vm700_vm12, %v2251_v31, %v2250_v62 }
 0xd12   :  { %v2254_v7 = vsel %vm2227_vm8, %v2252_v1, 0.0 }
 0xd13   :  { %2255 = vadd.xlane.f32.xlu1 %v2254_v7 }
 0xd30   :  { %v2203_v21 = vpop.f32.mrf.mxu3 }
 0xd31   :  { %v2204_v59 = vadd.f32 %v2203_v21, %v2159_v19 }
 0xd33   :  { %v2291_v56 = vpack.c.bf16 %v2204_v59, %v2204_v59 }
 0xd35   :  { %2830 = vmatmul.msk.bf16.vlgmr.msra.gmra.mxu1 %vm1724_vm15, %v2291_v56 }
 0xd38   :  { %v2205_v29 = vpop.f32.mrf.mxu3 }
 0xd86   :  { %v2256_v24 = vpop.xlane.xlu1 %2255 }
 0xd87   :  { %3044 = vrcp.f32 %v2256_v24 }
 0xd8d   :  { %v3045_v4 = vpop.eup %3044 }
 0xd8e   :  { %v2260_v5 = vperm.slane %v3045_v4, 1  ;;  %v2259_v11 = vperm.slane %v3045_v4, 0 }
 0xd90   :  { %v2264_v41 = vmul.f32 %v3043_v63, %v2260_v5  ;;  %v2263_v57 = vmul.f32 %v3041_v55, %v2259_v11 }
 0xd92   :  { %2272 = vperm.xlu0 %2942, %v2264_v41   ;;  %2267 = vperm.xlu2 %2941, %v2263_v57  }
 0xdb2   :  { %v2392_v58 = vpop.f32.mrf.mxu1 }
 0xdba   :  { %v2394_v13 = vpop.f32.mrf.mxu1 }
 0xdec   :  { %v2268_v40 = vpop.permute.xlu2 %2267 }
 0xded   :  { %v2275_v12 = vmul.f32 %v2268_v40, %v4201_v35 }
 0xdef   :  { %v2277_v49 = vsel %vm1724_vm15, %v2275_v12, 0.0 }
 0xdf0   :  { %v2278_v44 = vrot.slane %v2277_v49, 4 }
 0xdf2   :  { %v2279_v27 = vadd.f32 %v2278_v44, %v2277_v49 }
 0xdf4   :  { %v2280_v50 = vrot.slane %v2279_v27, 2 }
 0xdf6   :  { %v2281_v42 = vadd.f32 %v2280_v50, %v2279_v27 }
 0xdf8   :  { %v2282_v53 = vrot.slane %v2281_v42, 1 }
 0xdfa   :  { %v2283_v38 = vadd.f32 %v2282_v53, %v2281_v42 }
 0xdfc   :  { %v2300_v52 = vpack.c.bf16 %v2283_v38, %v2283_v38 }
 0xdfe   :  { %v2312_v63 = vunpack.c.l.b16 %v2300_v52 }
 0xe04   :  { %v2273_v43 = vpop.permute.xlu0 %2272 }
 0xe05   :  { %v2276_v30 = vmul.f32 %v2273_v43, %v4205_v39  ;;  %v2943_v39 = vld [vmem:[%s4342_s14] ss:$0 sm:$0xff] }
 0xe07   :  { %v2284_v6 = vsel %vm1724_vm15, %v2276_v30, 0.0 }
 0xe08   :  { %v2285_v61 = vrot.slane %v2284_v6, 4 }
 0xe0a   :  { %v2286_v35 = vadd.f32 %v2285_v61, %v2284_v6 }
 0xe0c   :  { %v2287_v37 = vrot.slane %v2286_v35, 2 }
 0xe0e   :  { %v2288_v45 = vadd.f32 %v2287_v37, %v2286_v35 }
 0xe10   :  { %v2289_v51 = vrot.slane %v2288_v45, 1 }
 0xe12   :  { %v2290_v55 = vadd.f32 %v2289_v51, %v2288_v45 }
 0xe14   :  { %v2301_v60 = vpack.c.bf16 %v2290_v55, %v2290_v55 }
 0xe16   :  { %v2313_v0 = vunpack.c.l.b16 %v2301_v60 }
 0xe18   :  { %v2314_v3 = vsel %vm700_vm12, %v2313_v0, %v2312_v63 }
 0xe19   :  { %v2315_v8 = vpack.c.b16 %v2314_v3, %v2314_v3 }
 0xe1b   :  { %2813 = vmatmul.msk.bf16.vlgmr.msra.gmra.mxu0 %vm1724_vm15, %v2315_v8 }
 0xe98   :  { %v2352_v9 = vpop.f32.mrf.mxu0 }
 0xe99   :  { %v2393_v10 = vadd.f32 %v2392_v58, %v2352_v9 }
 0xe9b   :  { %v2400_v14 = vadd.f32 %v2943_v39, %v2393_v10 }
 0xe9d   :  { %2402 = vst.msk [vmem:[#allocation3] sm:$0x3] %vm2401_vm9, %v2400_v14 }
 0xe9e   :  { %2413 = dma.vmem_to_hbm [thread:$0]  %s2409_s7, 32, %s2411_s23, [#allocation4]  }
 0xea0   :  { %v2354_v20 = vpop.f32.mrf.mxu0 }
 0xea1   :  { %3070 = dma.done.wait [#allocation4], 32  }
 0xea2   :  { %3071 = vsyncadd [#allocation4], 4294967264 }
 0xea3   :  { %2418 = vsyncpa [#allocation4], 1 }

</bundles_post_ra>
